<compile_context>
chip_gen: v5e
topology: v5e:2x2
jax: 0.10.0
libtpu: 0.0.40
codegen_flags: <defaults>
</compile_context>

<pallas_src>
import functools

import jax
import jax.numpy as jnp
from jax.experimental import pallas as pl
from jax.experimental.pallas import tpu as pltpu


# ----------------------------------------------------------------------------
# Tiling helper
# ----------------------------------------------------------------------------

def _pick_tile(p, max_tile=512):
    """Largest power-of-two row tile dividing p that leaves >= 2 grid steps
    (so both v7x TensorCores get work); fall back to a single full-array block."""
    for t in (512, 256, 128, 64, 32, 16, 8):
        if t <= max_tile and p % t == 0 and p // t >= 2:
            return t
    return p


# ----------------------------------------------------------------------------
# Pallas kernels
# ----------------------------------------------------------------------------

def _linear_kernel(x_ref, w_ref, b_ref, o_ref, *, relu):
    # x: (tp, Cin), w: (Cin, Cout) bf16, b: (1, Cout) f32 -> o: (tp, Cout)
    x = x_ref[...].astype(jnp.bfloat16)
    y = jnp.dot(x, w_ref[...], preferred_element_type=jnp.float32) + b_ref[...]
    if relu:
        y = jnp.maximum(y, 0.0)
    o_ref[...] = y.astype(o_ref.dtype)


def _sa_fused_kernel(gf_ref, gx_ref, wf_ref, wx_ref, b1_ref, wp_ref, bp_ref, o_ref, *, K):
    # Fused SA stage: split-weight pre-MLP + ReLU + max over K neighbors + post-MLP.
    # gf: (tm*K, C) bf16 grouped features, gx: (tm*K, 3) f32 relative xyz.
    rows, _ = gf_ref.shape
    gf = gf_ref[...]
    gx = gx_ref[...].astype(jnp.bfloat16)
    y = jnp.dot(gf, wf_ref[...], preferred_element_type=jnp.float32)
    y = y + jnp.dot(gx, wx_ref[...], preferred_element_type=jnp.float32)
    y = jnp.maximum(y + b1_ref[...], 0.0)                      # (tm*K, Cmid) f32
    cmid = y.shape[-1]
    agg = jnp.max(y.reshape(rows // K, K, cmid), axis=1)       # (tm, Cmid) f32
    z = jnp.dot(agg.astype(jnp.bfloat16), wp_ref[...], preferred_element_type=jnp.float32)
    z = jnp.maximum(z + bp_ref[...], 0.0)
    o_ref[...] = z.astype(o_ref.dtype)


def _fp_fused_kernel(g_ref, w3_ref, skip_ref, wi_ref, ws_ref, b1_ref, w2_ref, b2_ref, o_ref):
    # Fused feature propagation: 3-NN weighted interpolation + split-weight first
    # layer (interp @ Wi + skip @ Ws) + ReLU + second layer + ReLU.
    g = g_ref[...].astype(jnp.float32)                         # (tp, 3, C)
    w3 = w3_ref[...]                                           # (tp, 3) f32
    interp = jnp.sum(g * w3[:, :, None], axis=1)               # (tp, C) f32
    y = jnp.dot(interp.astype(jnp.bfloat16), wi_ref[...], preferred_element_type=jnp.float32)
    y = y + jnp.dot(skip_ref[...], ws_ref[...], preferred_element_type=jnp.float32)
    y = jnp.maximum(y + b1_ref[...], 0.0)                      # (tp, C1)
    z = jnp.dot(y.astype(jnp.bfloat16), w2_ref[...], preferred_element_type=jnp.float32)
    z = jnp.maximum(z + b2_ref[...], 0.0)
    o_ref[...] = z.astype(o_ref.dtype)


def _head_fused_kernel(x_ref, w1_ref, b1_ref, w2_ref, b2_ref, o_ref):
    # Fused SceneSegHeadPointNet: Conv1d(in,32)+ReLU (+Dropout no-op) + Conv1d(32,nc).
    y = jnp.dot(x_ref[...], w1_ref[...], preferred_element_type=jnp.float32)
    y = jnp.maximum(y + b1_ref[...], 0.0)
    z = jnp.dot(y.astype(jnp.bfloat16), w2_ref[...], preferred_element_type=jnp.float32)
    z = z + b2_ref[...]
    o_ref[...] = z.astype(o_ref.dtype)                         # f32 logits, single store


def _knn_kernel(q_ref, rt_ref, rn_ref, idx_ref, dist_ref, *, k):
    # Pairwise squared distances via ||q||^2 + ||r||^2 - 2 q@r^T (MXU), then an
    # unrolled k-step min-selection entirely in VMEM.
    q = q_ref[...]                                             # (tm, 3) f32
    rt = rt_ref[...]                                           # (3, Nr) f32
    rn = rn_ref[...]                                           # (1, Nr) f32
    qn = jnp.sum(q * q, axis=-1, keepdims=True)                # (tm, 1)
    d = qn + rn - 2.0 * jnp.dot(q, rt, preferred_element_type=jnp.float32)  # (tm, Nr)
    nr = d.shape[-1]
    iota_f = jax.lax.broadcasted_iota(jnp.int32, d.shape, 1).astype(jnp.float32)
    big = jnp.float32(1e30)
    idx_cols, dist_cols = [], []
    for _ in range(k):
        mn = jnp.min(d, axis=-1, keepdims=True)                              # (tm, 1)
        sel = jnp.min(jnp.where(d <= mn, iota_f, jnp.float32(nr)),
                      axis=-1, keepdims=True)                                # (tm, 1)
        idx_cols.append(sel)
        dist_cols.append(mn)
        d = jnp.where(iota_f == sel, big, d)
    idx_ref[...] = jnp.concatenate(idx_cols, axis=-1).astype(jnp.int32)
    dist_ref[...] = jnp.concatenate(dist_cols, axis=-1)


# ----------------------------------------------------------------------------
# Pallas wrappers
# ----------------------------------------------------------------------------

def pallas_linear(x, w, b, relu=True, out_dtype=jnp.bfloat16):
    P, Cin = x.shape
    Cout = w.shape[1]
    tp = _pick_tile(P)
    kernel = functools.partial(_linear_kernel, relu=relu)
    return pl.pallas_call(
        kernel,
        out_shape=jax.ShapeDtypeStruct((P, Cout), out_dtype),
        grid=(P // tp,),
        in_specs=[
            pl.BlockSpec((tp, Cin), lambda i: (i, 0)),
            pl.BlockSpec((Cin, Cout), lambda i: (0, 0)),
            pl.BlockSpec((1, Cout), lambda i: (0, 0)),
        ],
        out_specs=pl.BlockSpec((tp, Cout), lambda i: (i, 0)),
        compiler_params=pltpu.CompilerParams(dimension_semantics=("parallel",)),
    )(x, w, b)


def pallas_sa_stage(grouped_f, grouped_xyz, stage, K):
    # grouped_f: (P, K, C) bf16, grouped_xyz: (P, K, 3) f32 -> (P, Cout) bf16
    P, _, C = grouped_f.shape
    Cmid = stage['wf'].shape[1]
    Cout = stage['wp'].shape[1]
    gf = grouped_f.reshape(P * K, C)
    gx = grouped_xyz.reshape(P * K, 3)
    tm = _pick_tile(P)
    kernel = functools.partial(_sa_fused_kernel, K=K)
    return pl.pallas_call(
        kernel,
        out_shape=jax.ShapeDtypeStruct((P, Cout), jnp.bfloat16),
        grid=(P // tm,),
        in_specs=[
            pl.BlockSpec((tm * K, C), lambda i: (i, 0)),
            pl.BlockSpec((tm * K, 3), lambda i: (i, 0)),
            pl.BlockSpec((C, Cmid), lambda i: (0, 0)),
            pl.BlockSpec((3, Cmid), lambda i: (0, 0)),
            pl.BlockSpec((1, Cmid), lambda i: (0, 0)),
            pl.BlockSpec((Cmid, Cout), lambda i: (0, 0)),
            pl.BlockSpec((1, Cout), lambda i: (0, 0)),
        ],
        out_specs=pl.BlockSpec((tm, Cout), lambda i: (i, 0)),
        compiler_params=pltpu.CompilerParams(dimension_semantics=("parallel",)),
    )(gf, gx, stage['wf'], stage['wx'], stage['b1'], stage['wp'], stage['bp'])


def pallas_fp_stage(gathered, w3, skip, fp):
    # gathered: (P, 3, C) bf16, w3: (P, 3) f32, skip: (P, Cs) bf16 -> (P, C2) bf16
    P, _, C = gathered.shape
    Cs = skip.shape[-1]
    C1 = fp['wi'].shape[1]
    C2 = fp['w2'].shape[1]
    tp = _pick_tile(P)
    return pl.pallas_call(
        _fp_fused_kernel,
        out_shape=jax.ShapeDtypeStruct((P, C2), jnp.bfloat16),
        grid=(P // tp,),
        in_specs=[
            pl.BlockSpec((tp, 3, C), lambda i: (i, 0, 0)),
            pl.BlockSpec((tp, 3), lambda i: (i, 0)),
            pl.BlockSpec((tp, Cs), lambda i: (i, 0)),
            pl.BlockSpec((C, C1), lambda i: (0, 0)),
            pl.BlockSpec((Cs, C1), lambda i: (0, 0)),
            pl.BlockSpec((1, C1), lambda i: (0, 0)),
            pl.BlockSpec((C1, C2), lambda i: (0, 0)),
            pl.BlockSpec((1, C2), lambda i: (0, 0)),
        ],
        out_specs=pl.BlockSpec((tp, C2), lambda i: (i, 0)),
        compiler_params=pltpu.CompilerParams(dimension_semantics=("parallel",)),
    )(gathered, w3, skip, fp['wi'], fp['ws'], fp['b1'], fp['w2'], fp['b2'])


def pallas_head(x, head):
    P, C = x.shape
    C1 = head['w1'].shape[1]
    nc = head['w2'].shape[1]
    tp = _pick_tile(P)
    return pl.pallas_call(
        _head_fused_kernel,
        out_shape=jax.ShapeDtypeStruct((P, nc), jnp.float32),
        grid=(P // tp,),
        in_specs=[
            pl.BlockSpec((tp, C), lambda i: (i, 0)),
            pl.BlockSpec((C, C1), lambda i: (0, 0)),
            pl.BlockSpec((1, C1), lambda i: (0, 0)),
            pl.BlockSpec((C1, nc), lambda i: (0, 0)),
            pl.BlockSpec((1, nc), lambda i: (0, 0)),
        ],
        out_specs=pl.BlockSpec((tp, nc), lambda i: (i, 0)),
        compiler_params=pltpu.CompilerParams(dimension_semantics=("parallel",)),
    )(x, head['w1'], head['b1'], head['w2'], head['b2'])


def pallas_knn(query, ref, k):
    """k nearest refs per query point. query: (B, M, 3), ref: (B, Nr, 3)
    -> idx (B, M, k) int32, squared dist (B, M, k) f32."""
    B, M, _ = query.shape
    Nr = ref.shape[1]
    rt = jnp.transpose(ref, (0, 2, 1))                         # (B, 3, Nr)
    rn = jnp.sum(ref * ref, axis=-1)[:, None, :]               # (B, 1, Nr)
    tm = _pick_tile(M)
    kernel = functools.partial(_knn_kernel, k=k)
    # TODO(synk): for very large Nr, switch to a streaming per-tile top-k over the
    # reference axis instead of holding a full (tm, Nr) distance slab in VMEM.
    idx, dist = pl.pallas_call(
        kernel,
        out_shape=(jax.ShapeDtypeStruct((B, M, k), jnp.int32),
                   jax.ShapeDtypeStruct((B, M, k), jnp.float32)),
        grid=(B, M // tm),
        in_specs=[
            pl.BlockSpec((None, tm, 3), lambda b, i: (b, i, 0)),
            pl.BlockSpec((None, 3, Nr), lambda b, i: (b, 0, 0)),
            pl.BlockSpec((None, 1, Nr), lambda b, i: (b, 0, 0)),
        ],
        out_specs=[pl.BlockSpec((None, tm, k), lambda b, i: (b, i, 0)),
                   pl.BlockSpec((None, tm, k), lambda b, i: (b, i, 0))],
        compiler_params=pltpu.CompilerParams(dimension_semantics=("parallel", "parallel")),
    )(query, rt, rn)
    return idx, dist


# ----------------------------------------------------------------------------
# Glue (plain JAX): neighbor gather
# ----------------------------------------------------------------------------

def gather_points(x, idx):
    # x: (B, N, C), idx: (B, M, K) -> (B, M, K, C)
    # TODO(synk): fuse this gather into the SA/FP kernels via scalar-prefetched
    # neighbor indices + manual DMA instead of an XLA gather round trip.
    return jax.vmap(lambda xb, ib: xb[ib])(x, idx)


# ----------------------------------------------------------------------------
# ASSANetSeg forward (encoder -> decoder -> SceneSegHeadPointNet)
# ----------------------------------------------------------------------------

def assanet_seg_forward(params, xyz, features, sa_cfg):
    """xyz: (B, N, 3) f32, features: (B, C_in, N) [PyTorch NCW] -> logits (B, num_classes, N)."""
    B, N, _ = xyz.shape
    f = jnp.transpose(features, (0, 2, 1))                     # (B, N, C_in), channels-last

    # ---- encoder stem (Conv1d 1x1 + BN(identity) + ReLU) ----
    w_stem, b_stem = params['stem']
    f = pallas_linear(f.reshape(B * N, -1), w_stem, b_stem, relu=True).reshape(B, N, -1)

    l_xyz, l_feat = [xyz], [f]

    # ---- SA stages (ASSA set abstraction, fused pre-MLP / K-max / post-MLP) ----
    # TODO(synk): furthest-point-sampling replaced by deterministic stride sampling;
    # anisotropic per-group positional weighting replaced by split-weight rel-xyz term + max agg.
    for stage, (npoint, K) in zip(params['sa'], sa_cfg):
        xyz_prev, f_prev = l_xyz[-1], l_feat[-1]
        n_prev = xyz_prev.shape[1]
        samp = jnp.arange(npoint) * (n_prev // npoint)
        new_xyz = xyz_prev[:, samp]                            # (B, M, 3)

        nbr, _ = pallas_knn(new_xyz, xyz_prev, K)              # (B, M, K) int32
        grouped_f = gather_points(f_prev, nbr)                 # (B, M, K, C) bf16
        grouped_xyz = gather_points(xyz_prev, nbr) - new_xyz[:, :, None, :]  # (B, M, K, 3) f32

        out = pallas_sa_stage(grouped_f.reshape(B * npoint, K, -1),
                              grouped_xyz.reshape(B * npoint, K, 3),
                              stage, K)                        # (B*M, Cout) bf16
        l_xyz.append(new_xyz)
        l_feat.append(out.reshape(B, npoint, -1))

    # ---- decoder (fused 3-NN interpolation + split-weight skip concat + 2-layer MLP) ----
    feat = l_feat[-1]
    for di, fp in enumerate(params['fp']):
        lvl = len(l_xyz) - 1 - di                              # sparse level index
        xyz_sparse, xyz_dense = l_xyz[lvl], l_xyz[lvl - 1]
        skip = l_feat[lvl - 1]

        idx3, d3 = pallas_knn(xyz_dense, xyz_sparse, 3)        # (B, Nd, 3)
        d3 = jnp.maximum(d3, 1e-10)
        w3 = 1.0 / d3
        w3 = w3 / jnp.sum(w3, axis=-1, keepdims=True)          # inverse-distance weights

        gathered = gather_points(feat, idx3)                   # (B, Nd, 3, C) bf16
        nd = xyz_dense.shape[1]
        feat = pallas_fp_stage(gathered.reshape(B * nd, 3, -1),
                               w3.reshape(B * nd, 3),
                               skip.reshape(B * nd, -1),
                               fp).reshape(B, nd, -1)

    # ---- SceneSegHeadPointNet (fused; dropout is an inference no-op) ----
    logits = pallas_head(feat.reshape(B * N, -1), params['head']).reshape(B, N, -1)
    return jnp.transpose(logits, (0, 2, 1))                    # (B, num_classes, N)


# ----------------------------------------------------------------------------
# Deterministic parameter init (kaiming-normal weights, zero biases, identity BN)
# ----------------------------------------------------------------------------

def init_params(key, c_in=4, width=16, num_classes=13, n=64):
    keys = iter(jax.random.split(key, 32))

    def lin(cin, cout):
        w = jax.random.normal(next(keys), (cin, cout), jnp.float32) * jnp.sqrt(2.0 / cin)
        return w.astype(jnp.bfloat16), jnp.zeros((1, cout), jnp.float32)

    def split_lin(cin_a, cin_b, cout):
        cin = cin_a + cin_b
        w = jax.random.normal(next(keys), (cin, cout), jnp.float32) * jnp.sqrt(2.0 / cin)
        w = w.astype(jnp.bfloat16)
        return w[:cin_a], w[cin_a:], jnp.zeros((1, cout), jnp.float32)

    params = {}
    params['stem'] = lin(c_in, width)

    sa_cfg = ((n // 4, 8), (n // 16, 8))                       # (npoint, nsample) per stage
    sa_chans = [(width, 32), (32, 64)]
    params['sa'] = []
    for cin, cout in sa_chans:
        wf, wx, b1 = split_lin(cin, 3, cout)                   # pre-MLP, split [feat | rel-xyz]
        wp, bp = lin(cout, cout)                               # post-MLP
        params['sa'].append(dict(wf=wf, wx=wx, b1=b1, wp=wp, bp=bp))

    # fp_mlps = [[32, 32], [64, 64]] (index 0 = shallowest; head in_channels = fp_mlps[0][0] = 32)
    params['fp'] = []
    wi, ws, b1 = split_lin(64, 32, 64)                         # level 2 -> 1, split [interp | skip]
    w2, b2 = lin(64, 64)
    params['fp'].append(dict(wi=wi, ws=ws, b1=b1, w2=w2, b2=b2))
    wi, ws, b1 = split_lin(64, 16, 32)                         # level 1 -> 0
    w2, b2 = lin(32, 32)
    params['fp'].append(dict(wi=wi, ws=ws, b1=b1, w2=w2, b2=b2))

    w1, bh1 = lin(32, 32)
    w2, bh2 = lin(32, num_classes)
    params['head'] = dict(w1=w1, b1=bh1, w2=w2, b2=bh2)
    return params, sa_cfg


if __name__ == "__main__":
    key = jax.random.PRNGKey(0)
    kx, kf, kp = jax.random.split(key, 3)

    B, N, C_in, num_classes = 2, 64, 4, 13
    xyz = jax.random.uniform(kx, (B, N, 3), dtype=jnp.float32)          # point coordinates
    features = jax.random.normal(kf, (B, C_in, N), dtype=jnp.float32)   # PyTorch NCW features

    params, sa_cfg = init_params(kp, c_in=C_in, width=16, num_classes=num_classes, n=N)

    fwd = jax.jit(assanet_seg_forward, static_argnames=("sa_cfg",))
    logits = fwd(params, xyz, features, sa_cfg=sa_cfg)
    logits = jax.block_until_ready(logits)

    assert logits.shape == (B, num_classes, N), logits.shape
    assert bool(jnp.all(jnp.isfinite(logits)))
    print("KERNEL_OK")
</pallas_src>

<mosaic_0001>
module attributes {stable_mosaic.version = 11 : i64} {
  func.func @_knn_kernel(%arg0: i32, %arg1: i32, %arg2: memref<1x8x3xf32, #tpu.memory_space<vmem>>, %arg3: memref<1x3x64xf32, #tpu.memory_space<vmem>>, %arg4: memref<1x1x64xf32, #tpu.memory_space<vmem>>, %arg5: memref<1x8x8xi32, #tpu.memory_space<vmem>>, %arg6: memref<1x8x8xf32, #tpu.memory_space<vmem>>) attributes {dimension_semantics = [#tpu.dimension_semantics<parallel>, #tpu.dimension_semantics<parallel>], iteration_bounds = array<i64: 2, 2>, scalar_prefetch = 0 : i64, scratch_operands = 0 : i64, tpu.core_type = #tpu.core_type<tc>, window_params = [{transform_indices = @transform_0, window_bounds = array<i64: 1, 8, 3>}, {transform_indices = @transform_1, window_bounds = array<i64: 1, 3, 64>}, {transform_indices = @transform_2, window_bounds = array<i64: 1, 1, 64>}, {transform_indices = @transform_3, window_bounds = array<i64: 1, 8, 8>}, {transform_indices = @transform_4, window_bounds = array<i64: 1, 8, 8>}]} {
    %c0 = arith.constant 0 : index
    %c0_0 = arith.constant 0 : index
    %c0_1 = arith.constant 0 : index
    %0 = vector.load %arg2[%c0, %c0_0, %c0_1] : memref<1x8x3xf32, #tpu.memory_space<vmem>>, vector<1x8x3xf32>
    %1 = vector.shape_cast %0 : vector<1x8x3xf32> to vector<8x3xf32>
    %c0_2 = arith.constant 0 : index
    %c0_3 = arith.constant 0 : index
    %c0_4 = arith.constant 0 : index
    %2 = vector.load %arg3[%c0_2, %c0_3, %c0_4] : memref<1x3x64xf32, #tpu.memory_space<vmem>>, vector<1x3x64xf32>
    %3 = vector.shape_cast %2 : vector<1x3x64xf32> to vector<3x64xf32>
    %c0_5 = arith.constant 0 : index
    %c0_6 = arith.constant 0 : index
    %c0_7 = arith.constant 0 : index
    %4 = vector.load %arg4[%c0_5, %c0_6, %c0_7] : memref<1x1x64xf32, #tpu.memory_space<vmem>>, vector<1x1x64xf32>
    %5 = vector.shape_cast %4 : vector<1x1x64xf32> to vector<1x64xf32>
    %6 = arith.mulf %1, %1 : vector<8x3xf32>
    %cst = arith.constant dense<0.000000e+00> : vector<8xf32>
    %7 = vector.multi_reduction <add>, %6, %cst [1] : vector<8x3xf32> to vector<8xf32>
    %8 = vector.shape_cast %7 : vector<8xf32> to vector<8x1xf32>
    %9 = vector.broadcast %8 : vector<8x1xf32> to vector<8x64xf32>
    %10 = vector.broadcast %5 : vector<1x64xf32> to vector<8x64xf32>
    %11 = arith.addf %9, %10 : vector<8x64xf32>
    %cst_8 = arith.constant dense<0.000000e+00> : vector<8x64xf32>
    %12 = tpu.matmul %1, %3, %cst_8 {dimension_numbers = #tpu.dot_dimension_numbers<[1], [0], [0], [1], [0, 0, 1, 1], [], []>} : vector<8x3xf32>, vector<3x64xf32>, vector<8x64xf32> -> vector<8x64xf32>
    %cst_9 = arith.constant 2.000000e+00 : f32
    %13 = vector.broadcast %cst_9 : f32 to vector<8x64xf32>
    %14 = arith.mulf %13, %12 : vector<8x64xf32>
    %15 = arith.subf %11, %14 : vector<8x64xf32>
    %16 = tpu.iota {dimensions = array<i32: 1>} : vector<8x64xi32>
    %17 = arith.sitofp %16 : vector<8x64xi32> to vector<8x64xf32>
    %cst_10 = arith.constant dense<0x7F800000> : vector<8xf32>
    %18 = vector.multi_reduction <minimumf>, %15, %cst_10 [1] : vector<8x64xf32> to vector<8xf32>
    %19 = vector.shape_cast %18 : vector<8xf32> to vector<8x1xf32>
    %20 = vector.broadcast %19 : vector<8x1xf32> to vector<8x64xf32>
    %21 = arith.cmpf ole, %15, %20 : vector<8x64xf32>
    %cst_11 = arith.constant 6.400000e+01 : f32
    %22 = vector.broadcast %cst_11 : f32 to vector<8x64xf32>
    %23 = arith.select %21, %17, %22 : vector<8x64xi1>, vector<8x64xf32>
    %cst_12 = arith.constant dense<0x7F800000> : vector<8xf32>
    %24 = vector.multi_reduction <minimumf>, %23, %cst_12 [1] : vector<8x64xf32> to vector<8xf32>
    %25 = vector.shape_cast %24 : vector<8xf32> to vector<8x1xf32>
    %26 = vector.broadcast %25 : vector<8x1xf32> to vector<8x64xf32>
    %27 = arith.cmpf oeq, %17, %26 : vector<8x64xf32>
    %cst_13 = arith.constant 1.000000e+30 : f32
    %28 = vector.broadcast %cst_13 : f32 to vector<8x64xf32>
    %29 = arith.select %27, %28, %15 : vector<8x64xi1>, vector<8x64xf32>
    %cst_14 = arith.constant dense<0x7F800000> : vector<8xf32>
    %30 = vector.multi_reduction <minimumf>, %29, %cst_14 [1] : vector<8x64xf32> to vector<8xf32>
    %31 = vector.shape_cast %30 : vector<8xf32> to vector<8x1xf32>
    %32 = vector.broadcast %31 : vector<8x1xf32> to vector<8x64xf32>
    %33 = arith.cmpf ole, %29, %32 : vector<8x64xf32>
    %cst_15 = arith.constant 6.400000e+01 : f32
    %34 = vector.broadcast %cst_15 : f32 to vector<8x64xf32>
    %35 = arith.select %33, %17, %34 : vector<8x64xi1>, vector<8x64xf32>
    %cst_16 = arith.constant dense<0x7F800000> : vector<8xf32>
    %36 = vector.multi_reduction <minimumf>, %35, %cst_16 [1] : vector<8x64xf32> to vector<8xf32>
    %37 = vector.shape_cast %36 : vector<8xf32> to vector<8x1xf32>
    %38 = vector.broadcast %37 : vector<8x1xf32> to vector<8x64xf32>
    %39 = arith.cmpf oeq, %17, %38 : vector<8x64xf32>
    %cst_17 = arith.constant 1.000000e+30 : f32
    %40 = vector.broadcast %cst_17 : f32 to vector<8x64xf32>
    %41 = arith.select %39, %40, %29 : vector<8x64xi1>, vector<8x64xf32>
    %cst_18 = arith.constant dense<0x7F800000> : vector<8xf32>
    %42 = vector.multi_reduction <minimumf>, %41, %cst_18 [1] : vector<8x64xf32> to vector<8xf32>
    %43 = vector.shape_cast %42 : vector<8xf32> to vector<8x1xf32>
    %44 = vector.broadcast %43 : vector<8x1xf32> to vector<8x64xf32>
    %45 = arith.cmpf ole, %41, %44 : vector<8x64xf32>
    %cst_19 = arith.constant 6.400000e+01 : f32
    %46 = vector.broadcast %cst_19 : f32 to vector<8x64xf32>
    %47 = arith.select %45, %17, %46 : vector<8x64xi1>, vector<8x64xf32>
    %cst_20 = arith.constant dense<0x7F800000> : vector<8xf32>
    %48 = vector.multi_reduction <minimumf>, %47, %cst_20 [1] : vector<8x64xf32> to vector<8xf32>
    %49 = vector.shape_cast %48 : vector<8xf32> to vector<8x1xf32>
    %50 = vector.broadcast %49 : vector<8x1xf32> to vector<8x64xf32>
    %51 = arith.cmpf oeq, %17, %50 : vector<8x64xf32>
    %cst_21 = arith.constant 1.000000e+30 : f32
    %52 = vector.broadcast %cst_21 : f32 to vector<8x64xf32>
    %53 = arith.select %51, %52, %41 : vector<8x64xi1>, vector<8x64xf32>
    %cst_22 = arith.constant dense<0x7F800000> : vector<8xf32>
    %54 = vector.multi_reduction <minimumf>, %53, %cst_22 [1] : vector<8x64xf32> to vector<8xf32>
    %55 = vector.shape_cast %54 : vector<8xf32> to vector<8x1xf32>
    %56 = vector.broadcast %55 : vector<8x1xf32> to vector<8x64xf32>
    %57 = arith.cmpf ole, %53, %56 : vector<8x64xf32>
    %cst_23 = arith.constant 6.400000e+01 : f32
    %58 = vector.broadcast %cst_23 : f32 to vector<8x64xf32>
    %59 = arith.select %57, %17, %58 : vector<8x64xi1>, vector<8x64xf32>
    %cst_24 = arith.constant dense<0x7F800000> : vector<8xf32>
    %60 = vector.multi_reduction <minimumf>, %59, %cst_24 [1] : vector<8x64xf32> to vector<8xf32>
    %61 = vector.shape_cast %60 : vector<8xf32> to vector<8x1xf32>
    %62 = vector.broadcast %61 : vector<8x1xf32> to vector<8x64xf32>
    %63 = arith.cmpf oeq, %17, %62 : vector<8x64xf32>
    %cst_25 = arith.constant 1.000000e+30 : f32
    %64 = vector.broadcast %cst_25 : f32 to vector<8x64xf32>
    %65 = arith.select %63, %64, %53 : vector<8x64xi1>, vector<8x64xf32>
    %cst_26 = arith.constant dense<0x7F800000> : vector<8xf32>
    %66 = vector.multi_reduction <minimumf>, %65, %cst_26 [1] : vector<8x64xf32> to vector<8xf32>
    %67 = vector.shape_cast %66 : vector<8xf32> to vector<8x1xf32>
    %68 = vector.broadcast %67 : vector<8x1xf32> to vector<8x64xf32>
    %69 = arith.cmpf ole, %65, %68 : vector<8x64xf32>
    %cst_27 = arith.constant 6.400000e+01 : f32
    %70 = vector.broadcast %cst_27 : f32 to vector<8x64xf32>
    %71 = arith.select %69, %17, %70 : vector<8x64xi1>, vector<8x64xf32>
    %cst_28 = arith.constant dense<0x7F800000> : vector<8xf32>
    %72 = vector.multi_reduction <minimumf>, %71, %cst_28 [1] : vector<8x64xf32> to vector<8xf32>
    %73 = vector.shape_cast %72 : vector<8xf32> to vector<8x1xf32>
    %74 = vector.broadcast %73 : vector<8x1xf32> to vector<8x64xf32>
    %75 = arith.cmpf oeq, %17, %74 : vector<8x64xf32>
    %cst_29 = arith.constant 1.000000e+30 : f32
    %76 = vector.broadcast %cst_29 : f32 to vector<8x64xf32>
    %77 = arith.select %75, %76, %65 : vector<8x64xi1>, vector<8x64xf32>
    %cst_30 = arith.constant dense<0x7F800000> : vector<8xf32>
    %78 = vector.multi_reduction <minimumf>, %77, %cst_30 [1] : vector<8x64xf32> to vector<8xf32>
    %79 = vector.shape_cast %78 : vector<8xf32> to vector<8x1xf32>
    %80 = vector.broadcast %79 : vector<8x1xf32> to vector<8x64xf32>
    %81 = arith.cmpf ole, %77, %80 : vector<8x64xf32>
    %cst_31 = arith.constant 6.400000e+01 : f32
    %82 = vector.broadcast %cst_31 : f32 to vector<8x64xf32>
    %83 = arith.select %81, %17, %82 : vector<8x64xi1>, vector<8x64xf32>
    %cst_32 = arith.constant dense<0x7F800000> : vector<8xf32>
    %84 = vector.multi_reduction <minimumf>, %83, %cst_32 [1] : vector<8x64xf32> to vector<8xf32>
    %85 = vector.shape_cast %84 : vector<8xf32> to vector<8x1xf32>
    %86 = vector.broadcast %85 : vector<8x1xf32> to vector<8x64xf32>
    %87 = arith.cmpf oeq, %17, %86 : vector<8x64xf32>
    %cst_33 = arith.constant 1.000000e+30 : f32
    %88 = vector.broadcast %cst_33 : f32 to vector<8x64xf32>
    %89 = arith.select %87, %88, %77 : vector<8x64xi1>, vector<8x64xf32>
    %cst_34 = arith.constant dense<0x7F800000> : vector<8xf32>
    %90 = vector.multi_reduction <minimumf>, %89, %cst_34 [1] : vector<8x64xf32> to vector<8xf32>
    %91 = vector.shape_cast %90 : vector<8xf32> to vector<8x1xf32>
    %92 = vector.broadcast %91 : vector<8x1xf32> to vector<8x64xf32>
    %93 = arith.cmpf ole, %89, %92 : vector<8x64xf32>
    %cst_35 = arith.constant 6.400000e+01 : f32
    %94 = vector.broadcast %cst_35 : f32 to vector<8x64xf32>
    %95 = arith.select %93, %17, %94 : vector<8x64xi1>, vector<8x64xf32>
    %cst_36 = arith.constant dense<0x7F800000> : vector<8xf32>
    %96 = vector.multi_reduction <minimumf>, %95, %cst_36 [1] : vector<8x64xf32> to vector<8xf32>
    %97 = vector.shape_cast %96 : vector<8xf32> to vector<8x1xf32>
    %98 = vector.broadcast %97 : vector<8x1xf32> to vector<8x64xf32>
    %99 = arith.cmpf oeq, %17, %98 : vector<8x64xf32>
    %cst_37 = arith.constant 1.000000e+30 : f32
    %100 = vector.broadcast %cst_37 : f32 to vector<8x64xf32>
    %101 = arith.select %99, %100, %89 : vector<8x64xi1>, vector<8x64xf32>
    %cst_38 = arith.constant dense<0x7F800000> : vector<8xf32>
    %102 = vector.multi_reduction <minimumf>, %101, %cst_38 [1] : vector<8x64xf32> to vector<8xf32>
    %103 = vector.shape_cast %102 : vector<8xf32> to vector<8x1xf32>
    %104 = vector.broadcast %103 : vector<8x1xf32> to vector<8x64xf32>
    %105 = arith.cmpf ole, %101, %104 : vector<8x64xf32>
    %cst_39 = arith.constant 6.400000e+01 : f32
    %106 = vector.broadcast %cst_39 : f32 to vector<8x64xf32>
    %107 = arith.select %105, %17, %106 : vector<8x64xi1>, vector<8x64xf32>
    %cst_40 = arith.constant dense<0x7F800000> : vector<8xf32>
    %108 = vector.multi_reduction <minimumf>, %107, %cst_40 [1] : vector<8x64xf32> to vector<8xf32>
    %109 = vector.shape_cast %108 : vector<8xf32> to vector<8x1xf32>
    %110 = tpu.concatenate %25, %37, %49, %61, %73, %85, %97, %109 in 1 : vector<8x1xf32>, vector<8x1xf32>, vector<8x1xf32>, vector<8x1xf32>, vector<8x1xf32>, vector<8x1xf32>, vector<8x1xf32>, vector<8x1xf32> -> vector<8x8xf32>
    %111 = arith.fptosi %110 : vector<8x8xf32> to vector<8x8xi32>
    %c0_41 = arith.constant 0 : index
    %c0_42 = arith.constant 0 : index
    %c0_43 = arith.constant 0 : index
    %112 = vector.load %arg5[%c0_41, %c0_42, %c0_43] : memref<1x8x8xi32, #tpu.memory_space<vmem>>, vector<1x8x8xi32>
    %113 = vector.shape_cast %112 : vector<1x8x8xi32> to vector<8x8xi32>
    %114 = vector.shape_cast %111 : vector<8x8xi32> to vector<1x8x8xi32>
    tpu.vector_store %arg5[%c0_41, %c0_42, %c0_43], %114 {strides = array<i32>} : memref<1x8x8xi32, #tpu.memory_space<vmem>>, vector<1x8x8xi32>,
    %115 = tpu.concatenate %19, %31, %43, %55, %67, %79, %91, %103 in 1 : vector<8x1xf32>, vector<8x1xf32>, vector<8x1xf32>, vector<8x1xf32>, vector<8x1xf32>, vector<8x1xf32>, vector<8x1xf32>, vector<8x1xf32> -> vector<8x8xf32>
    %c0_44 = arith.constant 0 : index
    %c0_45 = arith.constant 0 : index
    %c0_46 = arith.constant 0 : index
    %116 = vector.load %arg6[%c0_44, %c0_45, %c0_46] : memref<1x8x8xf32, #tpu.memory_space<vmem>>, vector<1x8x8xf32>
    %117 = vector.shape_cast %116 : vector<1x8x8xf32> to vector<8x8xf32>
    %118 = vector.shape_cast %115 : vector<8x8xf32> to vector<1x8x8xf32>
    tpu.vector_store %arg6[%c0_44, %c0_45, %c0_46], %118 {strides = array<i32>} : memref<1x8x8xf32, #tpu.memory_space<vmem>>, vector<1x8x8xf32>,
    return
  }
  func.func @transform_0(%arg0: i32, %arg1: i32) -> (i32, i32, i32) {
    %c0_i32 = arith.constant 0 : i32
    %c0_i32_0 = arith.constant 0 : i32
    return %arg0, %arg1, %c0_i32 : i32, i32, i32
  }
  func.func @transform_1(%arg0: i32, %arg1: i32) -> (i32, i32, i32) {
    %c0_i32 = arith.constant 0 : i32
    %c0_i32_0 = arith.constant 0 : i32
    %c0_i32_1 = arith.constant 0 : i32
    return %arg0, %c0_i32, %c0_i32_0 : i32, i32, i32
  }
  func.func @transform_2(%arg0: i32, %arg1: i32) -> (i32, i32, i32) {
    %c0_i32 = arith.constant 0 : i32
    %c0_i32_0 = arith.constant 0 : i32
    %c0_i32_1 = arith.constant 0 : i32
    return %arg0, %c0_i32, %c0_i32_0 : i32, i32, i32
  }
  func.func @transform_3(%arg0: i32, %arg1: i32) -> (i32, i32, i32) {
    %c0_i32 = arith.constant 0 : i32
    %c0_i32_0 = arith.constant 0 : i32
    return %arg0, %arg1, %c0_i32 : i32, i32, i32
  }
  func.func @transform_4(%arg0: i32, %arg1: i32) -> (i32, i32, i32) {
    %c0_i32 = arith.constant 0 : i32
    %c0_i32_0 = arith.constant 0 : i32
    return %arg0, %arg1, %c0_i32 : i32, i32, i32
  }
}

module attributes {stable_mosaic.version = 11 : i64} {
  func.func @_linear_kernel(%arg0: i32, %arg1: memref<64x4xf32, #tpu.memory_space<vmem>>, %arg2: memref<4x16xbf16, #tpu.memory_space<vmem>>, %arg3: memref<1x16xf32, #tpu.memory_space<vmem>>, %arg4: memref<64x16xbf16, #tpu.memory_space<vmem>>) attributes {dimension_semantics = [#tpu.dimension_semantics<parallel>], iteration_bounds = array<i64: 2>, scalar_prefetch = 0 : i64, scratch_operands = 0 : i64, tpu.core_type = #tpu.core_type<tc>, window_params = [{transform_indices = @transform_0, window_bounds = array<i64: 64, 4>}, {pipeline_mode = #tpu.pipeline_mode<synchronous>, transform_indices = @transform_1, window_bounds = array<i64: 4, 16>}, {pipeline_mode = #tpu.pipeline_mode<synchronous>, transform_indices = @transform_2, window_bounds = array<i64: 1, 16>}, {transform_indices = @transform_3, window_bounds = array<i64: 64, 16>}]} {
    %c0 = arith.constant 0 : index
    %c0_0 = arith.constant 0 : index
    %0 = vector.load %arg1[%c0, %c0_0] : memref<64x4xf32, #tpu.memory_space<vmem>>, vector<64x4xf32>
    %1 = arith.truncf %0 : vector<64x4xf32> to vector<64x4xbf16>
    %c0_1 = arith.constant 0 : index
    %c0_2 = arith.constant 0 : index
    %2 = vector.load %arg2[%c0_1, %c0_2] : memref<4x16xbf16, #tpu.memory_space<vmem>>, vector<4x16xbf16>
    %cst = arith.constant dense<0.000000e+00> : vector<64x16xf32>
    %3 = tpu.matmul %1, %2, %cst {dimension_numbers = #tpu.dot_dimension_numbers<[1], [0], [0], [1], [0, 0, 1, 1], [], []>} : vector<64x4xbf16>, vector<4x16xbf16>, vector<64x16xf32> -> vector<64x16xf32>
    %c0_3 = arith.constant 0 : index
    %c0_4 = arith.constant 0 : index
    %4 = vector.load %arg3[%c0_3, %c0_4] : memref<1x16xf32, #tpu.memory_space<vmem>>, vector<1x16xf32>
    %5 = vector.broadcast %4 : vector<1x16xf32> to vector<64x16xf32>
    %6 = arith.addf %3, %5 : vector<64x16xf32>
    %cst_5 = arith.constant 0.000000e+00 : f32
    %7 = vector.broadcast %cst_5 : f32 to vector<64x16xf32>
    %8 = arith.maximumf %6, %7 : vector<64x16xf32>
    %9 = arith.truncf %8 : vector<64x16xf32> to vector<64x16xbf16>
    %c0_6 = arith.constant 0 : index
    %c0_7 = arith.constant 0 : index
    %10 = vector.load %arg4[%c0_6, %c0_7] : memref<64x16xbf16, #tpu.memory_space<vmem>>, vector<64x16xbf16>
    tpu.vector_store %arg4[%c0_6, %c0_7], %9 {strides = array<i32>} : memref<64x16xbf16, #tpu.memory_space<vmem>>, vector<64x16xbf16>,
    return
  }
  func.func @transform_0(%arg0: i32) -> (i32, i32) {
    %c0_i32 = arith.constant 0 : i32
    %c0_i32_0 = arith.constant 0 : i32
    return %arg0, %c0_i32 : i32, i32
  }
  func.func @transform_1(%arg0: i32) -> (i32, i32) {
    %c0_i32 = arith.constant 0 : i32
    %c0_i32_0 = arith.constant 0 : i32
    %c0_i32_1 = arith.constant 0 : i32
    return %c0_i32, %c0_i32_0 : i32, i32
  }
  func.func @transform_2(%arg0: i32) -> (i32, i32) {
    %c0_i32 = arith.constant 0 : i32
    %c0_i32_0 = arith.constant 0 : i32
    %c0_i32_1 = arith.constant 0 : i32
    return %c0_i32, %c0_i32_0 : i32, i32
  }
  func.func @transform_3(%arg0: i32) -> (i32, i32) {
    %c0_i32 = arith.constant 0 : i32
    %c0_i32_0 = arith.constant 0 : i32
    return %arg0, %c0_i32 : i32, i32
  }
}

module attributes {stable_mosaic.version = 11 : i64} {
  func.func @_sa_fused_kernel(%arg0: i32, %arg1: memref<128x16xbf16, #tpu.memory_space<vmem>>, %arg2: memref<128x3xf32, #tpu.memory_space<vmem>>, %arg3: memref<16x32xbf16, #tpu.memory_space<vmem>>, %arg4: memref<3x32xbf16, #tpu.memory_space<vmem>>, %arg5: memref<1x32xf32, #tpu.memory_space<vmem>>, %arg6: memref<32x32xbf16, #tpu.memory_space<vmem>>, %arg7: memref<1x32xf32, #tpu.memory_space<vmem>>, %arg8: memref<16x32xbf16, #tpu.memory_space<vmem>>) attributes {dimension_semantics = [#tpu.dimension_semantics<parallel>], iteration_bounds = array<i64: 2>, scalar_prefetch = 0 : i64, scratch_operands = 0 : i64, tpu.core_type = #tpu.core_type<tc>, window_params = [{transform_indices = @transform_0, window_bounds = array<i64: 128, 16>}, {transform_indices = @transform_1, window_bounds = array<i64: 128, 3>}, {pipeline_mode = #tpu.pipeline_mode<synchronous>, transform_indices = @transform_2, window_bounds = array<i64: 16, 32>}, {pipeline_mode = #tpu.pipeline_mode<synchronous>, transform_indices = @transform_3, window_bounds = array<i64: 3, 32>}, {pipeline_mode = #tpu.pipeline_mode<synchronous>, transform_indices = @transform_4, window_bounds = array<i64: 1, 32>}, {pipeline_mode = #tpu.pipeline_mode<synchronous>, transform_indices = @transform_5, window_bounds = array<i64: 32, 32>}, {pipeline_mode = #tpu.pipeline_mode<synchronous>, transform_indices = @transform_6, window_bounds = array<i64: 1, 32>}, {transform_indices = @transform_7, window_bounds = array<i64: 16, 32>}]} {
    %c0 = arith.constant 0 : index
    %c0_0 = arith.constant 0 : index
    %0 = vector.load %arg1[%c0, %c0_0] : memref<128x16xbf16, #tpu.memory_space<vmem>>, vector<128x16xbf16>
    %c0_1 = arith.constant 0 : index
    %c0_2 = arith.constant 0 : index
    %1 = vector.load %arg2[%c0_1, %c0_2] : memref<128x3xf32, #tpu.memory_space<vmem>>, vector<128x3xf32>
    %2 = arith.truncf %1 : vector<128x3xf32> to vector<128x3xbf16>
    %c0_3 = arith.constant 0 : index
    %c0_4 = arith.constant 0 : index
    %3 = vector.load %arg3[%c0_3, %c0_4] : memref<16x32xbf16, #tpu.memory_space<vmem>>, vector<16x32xbf16>
    %cst = arith.constant dense<0.000000e+00> : vector<128x32xf32>
    %4 = tpu.matmul %0, %3, %cst {dimension_numbers = #tpu.dot_dimension_numbers<[1], [0], [0], [1], [0, 0, 1, 1], [], []>} : vector<128x16xbf16>, vector<16x32xbf16>, vector<128x32xf32> -> vector<128x32xf32>
    %c0_5 = arith.constant 0 : index
    %c0_6 = arith.constant 0 : index
    %5 = vector.load %arg4[%c0_5, %c0_6] : memref<3x32xbf16, #tpu.memory_space<vmem>>, vector<3x32xbf16>
    %cst_7 = arith.constant dense<0.000000e+00> : vector<128x32xf32>
    %6 = tpu.matmul %2, %5, %cst_7 {dimension_numbers = #tpu.dot_dimension_numbers<[1], [0], [0], [1], [0, 0, 1, 1], [], []>} : vector<128x3xbf16>, vector<3x32xbf16>, vector<128x32xf32> -> vector<128x32xf32>
    %7 = arith.addf %4, %6 : vector<128x32xf32>
    %c0_8 = arith.constant 0 : index
    %c0_9 = arith.constant 0 : index
    %8 = vector.load %arg5[%c0_8, %c0_9] : memref<1x32xf32, #tpu.memory_space<vmem>>, vector<1x32xf32>
    %9 = vector.broadcast %8 : vector<1x32xf32> to vector<128x32xf32>
    %10 = arith.addf %7, %9 : vector<128x32xf32>
    %cst_10 = arith.constant 0.000000e+00 : f32
    %11 = vector.broadcast %cst_10 : f32 to vector<128x32xf32>
    %12 = arith.maximumf %10, %11 : vector<128x32xf32>
    %13 = vector.shape_cast %12 : vector<128x32xf32> to vector<16x8x32xf32>
    %cst_11 = arith.constant dense<0xFF800000> : vector<16x32xf32>
    %14 = vector.multi_reduction <maximumf>, %13, %cst_11 [1] : vector<16x8x32xf32> to vector<16x32xf32>
    %15 = arith.truncf %14 : vector<16x32xf32> to vector<16x32xbf16>
    %c0_12 = arith.constant 0 : index
    %c0_13 = arith.constant 0 : index
    %16 = vector.load %arg6[%c0_12, %c0_13] : memref<32x32xbf16, #tpu.memory_space<vmem>>, vector<32x32xbf16>
    %cst_14 = arith.constant dense<0.000000e+00> : vector<16x32xf32>
    %17 = tpu.matmul %15, %16, %cst_14 {dimension_numbers = #tpu.dot_dimension_numbers<[1], [0], [0], [1], [0, 0, 1, 1], [], []>} : vector<16x32xbf16>, vector<32x32xbf16>, vector<16x32xf32> -> vector<16x32xf32>
    %c0_15 = arith.constant 0 : index
    %c0_16 = arith.constant 0 : index
    %18 = vector.load %arg7[%c0_15, %c0_16] : memref<1x32xf32, #tpu.memory_space<vmem>>, vector<1x32xf32>
    %19 = vector.broadcast %18 : vector<1x32xf32> to vector<16x32xf32>
    %20 = arith.addf %17, %19 : vector<16x32xf32>
    %cst_17 = arith.constant 0.000000e+00 : f32
    %21 = vector.broadcast %cst_17 : f32 to vector<16x32xf32>
    %22 = arith.maximumf %20, %21 : vector<16x32xf32>
    %23 = arith.truncf %22 : vector<16x32xf32> to vector<16x32xbf16>
    %c0_18 = arith.constant 0 : index
    %c0_19 = arith.constant 0 : index
    %24 = vector.load %arg8[%c0_18, %c0_19] : memref<16x32xbf16, #tpu.memory_space<vmem>>, vector<16x32xbf16>
    tpu.vector_store %arg8[%c0_18, %c0_19], %23 {strides = array<i32>} : memref<16x32xbf16, #tpu.memory_space<vmem>>, vector<16x32xbf16>,
    return
  }
  func.func @transform_0(%arg0: i32) -> (i32, i32) {
    %c0_i32 = arith.constant 0 : i32
    %c0_i32_0 = arith.constant 0 : i32
    return %arg0, %c0_i32 : i32, i32
  }
  func.func @transform_1(%arg0: i32) -> (i32, i32) {
    %c0_i32 = arith.constant 0 : i32
    %c0_i32_0 = arith.constant 0 : i32
    return %arg0, %c0_i32 : i32, i32
  }
  func.func @transform_2(%arg0: i32) -> (i32, i32) {
    %c0_i32 = arith.constant 0 : i32
    %c0_i32_0 = arith.constant 0 : i32
    %c0_i32_1 = arith.constant 0 : i32
    return %c0_i32, %c0_i32_0 : i32, i32
  }
  func.func @transform_3(%arg0: i32) -> (i32, i32) {
    %c0_i32 = arith.constant 0 : i32
    %c0_i32_0 = arith.constant 0 : i32
    %c0_i32_1 = arith.constant 0 : i32
    return %c0_i32, %c0_i32_0 : i32, i32
  }
  func.func @transform_4(%arg0: i32) -> (i32, i32) {
    %c0_i32 = arith.constant 0 : i32
    %c0_i32_0 = arith.constant 0 : i32
    %c0_i32_1 = arith.constant 0 : i32
    return %c0_i32, %c0_i32_0 : i32, i32
  }
  func.func @transform_5(%arg0: i32) -> (i32, i32) {
    %c0_i32 = arith.constant 0 : i32
    %c0_i32_0 = arith.constant 0 : i32
    %c0_i32_1 = arith.constant 0 : i32
    return %c0_i32, %c0_i32_0 : i32, i32
  }
  func.func @transform_6(%arg0: i32) -> (i32, i32) {
    %c0_i32 = arith.constant 0 : i32
    %c0_i32_0 = arith.constant 0 : i32
    %c0_i32_1 = arith.constant 0 : i32
    return %c0_i32, %c0_i32_0 : i32, i32
  }
  func.func @transform_7(%arg0: i32) -> (i32, i32) {
    %c0_i32 = arith.constant 0 : i32
    %c0_i32_0 = arith.constant 0 : i32
    return %arg0, %c0_i32 : i32, i32
  }
}

module attributes {stable_mosaic.version = 11 : i64} {
  func.func @_knn_kernel(%arg0: i32, %arg1: i32, %arg2: memref<1x4x3xf32, #tpu.memory_space<vmem>>, %arg3: memref<1x3x16xf32, #tpu.memory_space<vmem>>, %arg4: memref<1x1x16xf32, #tpu.memory_space<vmem>>, %arg5: memref<1x4x8xi32, #tpu.memory_space<vmem>>, %arg6: memref<1x4x8xf32, #tpu.memory_space<vmem>>) attributes {dimension_semantics = [#tpu.dimension_semantics<parallel>, #tpu.dimension_semantics<parallel>], iteration_bounds = array<i64: 2, 1>, scalar_prefetch = 0 : i64, scratch_operands = 0 : i64, tpu.core_type = #tpu.core_type<tc>, window_params = [{transform_indices = @transform_0, window_bounds = array<i64: 1, 4, 3>}, {transform_indices = @transform_1, window_bounds = array<i64: 1, 3, 16>}, {transform_indices = @transform_2, window_bounds = array<i64: 1, 1, 16>}, {transform_indices = @transform_3, window_bounds = array<i64: 1, 4, 8>}, {transform_indices = @transform_4, window_bounds = array<i64: 1, 4, 8>}]} {
    %c0 = arith.constant 0 : index
    %c0_0 = arith.constant 0 : index
    %c0_1 = arith.constant 0 : index
    %0 = vector.load %arg2[%c0, %c0_0, %c0_1] : memref<1x4x3xf32, #tpu.memory_space<vmem>>, vector<1x4x3xf32>
    %1 = vector.shape_cast %0 : vector<1x4x3xf32> to vector<4x3xf32>
    %c0_2 = arith.constant 0 : index
    %c0_3 = arith.constant 0 : index
    %c0_4 = arith.constant 0 : index
    %2 = vector.load %arg3[%c0_2, %c0_3, %c0_4] : memref<1x3x16xf32, #tpu.memory_space<vmem>>, vector<1x3x16xf32>
    %3 = vector.shape_cast %2 : vector<1x3x16xf32> to vector<3x16xf32>
    %c0_5 = arith.constant 0 : index
    %c0_6 = arith.constant 0 : index
    %c0_7 = arith.constant 0 : index
    %4 = vector.load %arg4[%c0_5, %c0_6, %c0_7] : memref<1x1x16xf32, #tpu.memory_space<vmem>>, vector<1x1x16xf32>
    %5 = vector.shape_cast %4 : vector<1x1x16xf32> to vector<1x16xf32>
    %6 = arith.mulf %1, %1 : vector<4x3xf32>
    %cst = arith.constant dense<0.000000e+00> : vector<4xf32>
    %7 = vector.multi_reduction <add>, %6, %cst [1] : vector<4x3xf32> to vector<4xf32>
    %8 = vector.shape_cast %7 : vector<4xf32> to vector<4x1xf32>
    %9 = vector.broadcast %8 : vector<4x1xf32> to vector<4x16xf32>
    %10 = vector.broadcast %5 : vector<1x16xf32> to vector<4x16xf32>
    %11 = arith.addf %9, %10 : vector<4x16xf32>
    %cst_8 = arith.constant dense<0.000000e+00> : vector<4x16xf32>
    %12 = tpu.matmul %1, %3, %cst_8 {dimension_numbers = #tpu.dot_dimension_numbers<[1], [0], [0], [1], [0, 0, 1, 1], [], []>} : vector<4x3xf32>, vector<3x16xf32>, vector<4x16xf32> -> vector<4x16xf32>
    %cst_9 = arith.constant 2.000000e+00 : f32
    %13 = vector.broadcast %cst_9 : f32 to vector<4x16xf32>
    %14 = arith.mulf %13, %12 : vector<4x16xf32>
    %15 = arith.subf %11, %14 : vector<4x16xf32>
    %16 = tpu.iota {dimensions = array<i32: 1>} : vector<4x16xi32>
    %17 = arith.sitofp %16 : vector<4x16xi32> to vector<4x16xf32>
    %cst_10 = arith.constant dense<0x7F800000> : vector<4xf32>
    %18 = vector.multi_reduction <minimumf>, %15, %cst_10 [1] : vector<4x16xf32> to vector<4xf32>
    %19 = vector.shape_cast %18 : vector<4xf32> to vector<4x1xf32>
    %20 = vector.broadcast %19 : vector<4x1xf32> to vector<4x16xf32>
    %21 = arith.cmpf ole, %15, %20 : vector<4x16xf32>
    %cst_11 = arith.constant 1.600000e+01 : f32
    %22 = vector.broadcast %cst_11 : f32 to vector<4x16xf32>
    %23 = arith.select %21, %17, %22 : vector<4x16xi1>, vector<4x16xf32>
    %cst_12 = arith.constant dense<0x7F800000> : vector<4xf32>
    %24 = vector.multi_reduction <minimumf>, %23, %cst_12 [1] : vector<4x16xf32> to vector<4xf32>
    %25 = vector.shape_cast %24 : vector<4xf32> to vector<4x1xf32>
    %26 = vector.broadcast %25 : vector<4x1xf32> to vector<4x16xf32>
    %27 = arith.cmpf oeq, %17, %26 : vector<4x16xf32>
    %cst_13 = arith.constant 1.000000e+30 : f32
    %28 = vector.broadcast %cst_13 : f32 to vector<4x16xf32>
    %29 = arith.select %27, %28, %15 : vector<4x16xi1>, vector<4x16xf32>
    %cst_14 = arith.constant dense<0x7F800000> : vector<4xf32>
    %30 = vector.multi_reduction <minimumf>, %29, %cst_14 [1] : vector<4x16xf32> to vector<4xf32>
    %31 = vector.shape_cast %30 : vector<4xf32> to vector<4x1xf32>
    %32 = vector.broadcast %31 : vector<4x1xf32> to vector<4x16xf32>
    %33 = arith.cmpf ole, %29, %32 : vector<4x16xf32>
    %cst_15 = arith.constant 1.600000e+01 : f32
    %34 = vector.broadcast %cst_15 : f32 to vector<4x16xf32>
    %35 = arith.select %33, %17, %34 : vector<4x16xi1>, vector<4x16xf32>
    %cst_16 = arith.constant dense<0x7F800000> : vector<4xf32>
    %36 = vector.multi_reduction <minimumf>, %35, %cst_16 [1] : vector<4x16xf32> to vector<4xf32>
    %37 = vector.shape_cast %36 : vector<4xf32> to vector<4x1xf32>
    %38 = vector.broadcast %37 : vector<4x1xf32> to vector<4x16xf32>
    %39 = arith.cmpf oeq, %17, %38 : vector<4x16xf32>
    %cst_17 = arith.constant 1.000000e+30 : f32
    %40 = vector.broadcast %cst_17 : f32 to vector<4x16xf32>
    %41 = arith.select %39, %40, %29 : vector<4x16xi1>, vector<4x16xf32>
    %cst_18 = arith.constant dense<0x7F800000> : vector<4xf32>
    %42 = vector.multi_reduction <minimumf>, %41, %cst_18 [1] : vector<4x16xf32> to vector<4xf32>
    %43 = vector.shape_cast %42 : vector<4xf32> to vector<4x1xf32>
    %44 = vector.broadcast %43 : vector<4x1xf32> to vector<4x16xf32>
    %45 = arith.cmpf ole, %41, %44 : vector<4x16xf32>
    %cst_19 = arith.constant 1.600000e+01 : f32
    %46 = vector.broadcast %cst_19 : f32 to vector<4x16xf32>
    %47 = arith.select %45, %17, %46 : vector<4x16xi1>, vector<4x16xf32>
    %cst_20 = arith.constant dense<0x7F800000> : vector<4xf32>
    %48 = vector.multi_reduction <minimumf>, %47, %cst_20 [1] : vector<4x16xf32> to vector<4xf32>
    %49 = vector.shape_cast %48 : vector<4xf32> to vector<4x1xf32>
    %50 = vector.broadcast %49 : vector<4x1xf32> to vector<4x16xf32>
    %51 = arith.cmpf oeq, %17, %50 : vector<4x16xf32>
    %cst_21 = arith.constant 1.000000e+30 : f32
    %52 = vector.broadcast %cst_21 : f32 to vector<4x16xf32>
    %53 = arith.select %51, %52, %41 : vector<4x16xi1>, vector<4x16xf32>
    %cst_22 = arith.constant dense<0x7F800000> : vector<4xf32>
    %54 = vector.multi_reduction <minimumf>, %53, %cst_22 [1] : vector<4x16xf32> to vector<4xf32>
    %55 = vector.shape_cast %54 : vector<4xf32> to vector<4x1xf32>
    %56 = vector.broadcast %55 : vector<4x1xf32> to vector<4x16xf32>
    %57 = arith.cmpf ole, %53, %56 : vector<4x16xf32>
    %cst_23 = arith.constant 1.600000e+01 : f32
    %58 = vector.broadcast %cst_23 : f32 to vector<4x16xf32>
    %59 = arith.select %57, %17, %58 : vector<4x16xi1>, vector<4x16xf32>
    %cst_24 = arith.constant dense<0x7F800000> : vector<4xf32>
    %60 = vector.multi_reduction <minimumf>, %59, %cst_24 [1] : vector<4x16xf32> to vector<4xf32>
    %61 = vector.shape_cast %60 : vector<4xf32> to vector<4x1xf32>
    %62 = vector.broadcast %61 : vector<4x1xf32> to vector<4x16xf32>
    %63 = arith.cmpf oeq, %17, %62 : vector<4x16xf32>
    %cst_25 = arith.constant 1.000000e+30 : f32
    %64 = vector.broadcast %cst_25 : f32 to vector<4x16xf32>
    %65 = arith.select %63, %64, %53 : vector<4x16xi1>, vector<4x16xf32>
    %cst_26 = arith.constant dense<0x7F800000> : vector<4xf32>
    %66 = vector.multi_reduction <minimumf>, %65, %cst_26 [1] : vector<4x16xf32> to vector<4xf32>
    %67 = vector.shape_cast %66 : vector<4xf32> to vector<4x1xf32>
    %68 = vector.broadcast %67 : vector<4x1xf32> to vector<4x16xf32>
    %69 = arith.cmpf ole, %65, %68 : vector<4x16xf32>
    %cst_27 = arith.constant 1.600000e+01 : f32
    %70 = vector.broadcast %cst_27 : f32 to vector<4x16xf32>
    %71 = arith.select %69, %17, %70 : vector<4x16xi1>, vector<4x16xf32>
    %cst_28 = arith.constant dense<0x7F800000> : vector<4xf32>
    %72 = vector.multi_reduction <minimumf>, %71, %cst_28 [1] : vector<4x16xf32> to vector<4xf32>
    %73 = vector.shape_cast %72 : vector<4xf32> to vector<4x1xf32>
    %74 = vector.broadcast %73 : vector<4x1xf32> to vector<4x16xf32>
    %75 = arith.cmpf oeq, %17, %74 : vector<4x16xf32>
    %cst_29 = arith.constant 1.000000e+30 : f32
    %76 = vector.broadcast %cst_29 : f32 to vector<4x16xf32>
    %77 = arith.select %75, %76, %65 : vector<4x16xi1>, vector<4x16xf32>
    %cst_30 = arith.constant dense<0x7F800000> : vector<4xf32>
    %78 = vector.multi_reduction <minimumf>, %77, %cst_30 [1] : vector<4x16xf32> to vector<4xf32>
    %79 = vector.shape_cast %78 : vector<4xf32> to vector<4x1xf32>
    %80 = vector.broadcast %79 : vector<4x1xf32> to vector<4x16xf32>
    %81 = arith.cmpf ole, %77, %80 : vector<4x16xf32>
    %cst_31 = arith.constant 1.600000e+01 : f32
    %82 = vector.broadcast %cst_31 : f32 to vector<4x16xf32>
    %83 = arith.select %81, %17, %82 : vector<4x16xi1>, vector<4x16xf32>
    %cst_32 = arith.constant dense<0x7F800000> : vector<4xf32>
    %84 = vector.multi_reduction <minimumf>, %83, %cst_32 [1] : vector<4x16xf32> to vector<4xf32>
    %85 = vector.shape_cast %84 : vector<4xf32> to vector<4x1xf32>
    %86 = vector.broadcast %85 : vector<4x1xf32> to vector<4x16xf32>
    %87 = arith.cmpf oeq, %17, %86 : vector<4x16xf32>
    %cst_33 = arith.constant 1.000000e+30 : f32
    %88 = vector.broadcast %cst_33 : f32 to vector<4x16xf32>
    %89 = arith.select %87, %88, %77 : vector<4x16xi1>, vector<4x16xf32>
    %cst_34 = arith.constant dense<0x7F800000> : vector<4xf32>
    %90 = vector.multi_reduction <minimumf>, %89, %cst_34 [1] : vector<4x16xf32> to vector<4xf32>
    %91 = vector.shape_cast %90 : vector<4xf32> to vector<4x1xf32>
    %92 = vector.broadcast %91 : vector<4x1xf32> to vector<4x16xf32>
    %93 = arith.cmpf ole, %89, %92 : vector<4x16xf32>
    %cst_35 = arith.constant 1.600000e+01 : f32
    %94 = vector.broadcast %cst_35 : f32 to vector<4x16xf32>
    %95 = arith.select %93, %17, %94 : vector<4x16xi1>, vector<4x16xf32>
    %cst_36 = arith.constant dense<0x7F800000> : vector<4xf32>
    %96 = vector.multi_reduction <minimumf>, %95, %cst_36 [1] : vector<4x16xf32> to vector<4xf32>
    %97 = vector.shape_cast %96 : vector<4xf32> to vector<4x1xf32>
    %98 = vector.broadcast %97 : vector<4x1xf32> to vector<4x16xf32>
    %99 = arith.cmpf oeq, %17, %98 : vector<4x16xf32>
    %cst_37 = arith.constant 1.000000e+30 : f32
    %100 = vector.broadcast %cst_37 : f32 to vector<4x16xf32>
    %101 = arith.select %99, %100, %89 : vector<4x16xi1>, vector<4x16xf32>
    %cst_38 = arith.constant dense<0x7F800000> : vector<4xf32>
    %102 = vector.multi_reduction <minimumf>, %101, %cst_38 [1] : vector<4x16xf32> to vector<4xf32>
    %103 = vector.shape_cast %102 : vector<4xf32> to vector<4x1xf32>
    %104 = vector.broadcast %103 : vector<4x1xf32> to vector<4x16xf32>
    %105 = arith.cmpf ole, %101, %104 : vector<4x16xf32>
    %cst_39 = arith.constant 1.600000e+01 : f32
    %106 = vector.broadcast %cst_39 : f32 to vector<4x16xf32>
    %107 = arith.select %105, %17, %106 : vector<4x16xi1>, vector<4x16xf32>
    %cst_40 = arith.constant dense<0x7F800000> : vector<4xf32>
    %108 = vector.multi_reduction <minimumf>, %107, %cst_40 [1] : vector<4x16xf32> to vector<4xf32>
    %109 = vector.shape_cast %108 : vector<4xf32> to vector<4x1xf32>
    %110 = tpu.concatenate %25, %37, %49, %61, %73, %85, %97, %109 in 1 : vector<4x1xf32>, vector<4x1xf32>, vector<4x1xf32>, vector<4x1xf32>, vector<4x1xf32>, vector<4x1xf32>, vector<4x1xf32>, vector<4x1xf32> -> vector<4x8xf32>
    %111 = arith.fptosi %110 : vector<4x8xf32> to vector<4x8xi32>
    %c0_41 = arith.constant 0 : index
    %c0_42 = arith.constant 0 : index
    %c0_43 = arith.constant 0 : index
    %112 = vector.load %arg5[%c0_41, %c0_42, %c0_43] : memref<1x4x8xi32, #tpu.memory_space<vmem>>, vector<1x4x8xi32>
    %113 = vector.shape_cast %112 : vector<1x4x8xi32> to vector<4x8xi32>
    %114 = vector.shape_cast %111 : vector<4x8xi32> to vector<1x4x8xi32>
    tpu.vector_store %arg5[%c0_41, %c0_42, %c0_43], %114 {strides = array<i32>} : memref<1x4x8xi32, #tpu.memory_space<vmem>>, vector<1x4x8xi32>,
    %115 = tpu.concatenate %19, %31, %43, %55, %67, %79, %91, %103 in 1 : vector<4x1xf32>, vector<4x1xf32>, vector<4x1xf32>, vector<4x1xf32>, vector<4x1xf32>, vector<4x1xf32>, vector<4x1xf32>, vector<4x1xf32> -> vector<4x8xf32>
    %c0_44 = arith.constant 0 : index
    %c0_45 = arith.constant 0 : index
    %c0_46 = arith.constant 0 : index
    %116 = vector.load %arg6[%c0_44, %c0_45, %c0_46] : memref<1x4x8xf32, #tpu.memory_space<vmem>>, vector<1x4x8xf32>
    %117 = vector.shape_cast %116 : vector<1x4x8xf32> to vector<4x8xf32>
    %118 = vector.shape_cast %115 : vector<4x8xf32> to vector<1x4x8xf32>
    tpu.vector_store %arg6[%c0_44, %c0_45, %c0_46], %118 {strides = array<i32>} : memref<1x4x8xf32, #tpu.memory_space<vmem>>, vector<1x4x8xf32>,
    return
  }
  func.func @transform_0(%arg0: i32, %arg1: i32) -> (i32, i32, i32) {
    %c0_i32 = arith.constant 0 : i32
    %c0_i32_0 = arith.constant 0 : i32
    return %arg0, %arg1, %c0_i32 : i32, i32, i32
  }
  func.func @transform_1(%arg0: i32, %arg1: i32) -> (i32, i32, i32) {
    %c0_i32 = arith.constant 0 : i32
    %c0_i32_0 = arith.constant 0 : i32
    %c0_i32_1 = arith.constant 0 : i32
    return %arg0, %c0_i32, %c0_i32_0 : i32, i32, i32
  }
  func.func @transform_2(%arg0: i32, %arg1: i32) -> (i32, i32, i32) {
    %c0_i32 = arith.constant 0 : i32
    %c0_i32_0 = arith.constant 0 : i32
    %c0_i32_1 = arith.constant 0 : i32
    return %arg0, %c0_i32, %c0_i32_0 : i32, i32, i32
  }
  func.func @transform_3(%arg0: i32, %arg1: i32) -> (i32, i32, i32) {
    %c0_i32 = arith.constant 0 : i32
    %c0_i32_0 = arith.constant 0 : i32
    return %arg0, %arg1, %c0_i32 : i32, i32, i32
  }
  func.func @transform_4(%arg0: i32, %arg1: i32) -> (i32, i32, i32) {
    %c0_i32 = arith.constant 0 : i32
    %c0_i32_0 = arith.constant 0 : i32
    return %arg0, %arg1, %c0_i32 : i32, i32, i32
  }
}

module attributes {stable_mosaic.version = 11 : i64} {
  func.func @_sa_fused_kernel(%arg0: i32, %arg1: memref<64x32xbf16, #tpu.memory_space<vmem>>, %arg2: memref<64x3xf32, #tpu.memory_space<vmem>>, %arg3: memref<32x64xbf16, #tpu.memory_space<vmem>>, %arg4: memref<3x64xbf16, #tpu.memory_space<vmem>>, %arg5: memref<1x64xf32, #tpu.memory_space<vmem>>, %arg6: memref<64x64xbf16, #tpu.memory_space<vmem>>, %arg7: memref<1x64xf32, #tpu.memory_space<vmem>>, %arg8: memref<8x64xbf16, #tpu.memory_space<vmem>>) attributes {dimension_semantics = [#tpu.dimension_semantics<parallel>], iteration_bounds = array<i64: 1>, scalar_prefetch = 0 : i64, scratch_operands = 0 : i64, tpu.core_type = #tpu.core_type<tc>, window_params = [{transform_indices = @transform_0, window_bounds = array<i64: 64, 32>}, {transform_indices = @transform_1, window_bounds = array<i64: 64, 3>}, {pipeline_mode = #tpu.pipeline_mode<synchronous>, transform_indices = @transform_2, window_bounds = array<i64: 32, 64>}, {pipeline_mode = #tpu.pipeline_mode<synchronous>, transform_indices = @transform_3, window_bounds = array<i64: 3, 64>}, {pipeline_mode = #tpu.pipeline_mode<synchronous>, transform_indices = @transform_4, window_bounds = array<i64: 1, 64>}, {pipeline_mode = #tpu.pipeline_mode<synchronous>, transform_indices = @transform_5, window_bounds = array<i64: 64, 64>}, {pipeline_mode = #tpu.pipeline_mode<synchronous>, transform_indices = @transform_6, window_bounds = array<i64: 1, 64>}, {transform_indices = @transform_7, window_bounds = array<i64: 8, 64>}]} {
    %c0 = arith.constant 0 : index
    %c0_0 = arith.constant 0 : index
    %0 = vector.load %arg1[%c0, %c0_0] : memref<64x32xbf16, #tpu.memory_space<vmem>>, vector<64x32xbf16>
    %c0_1 = arith.constant 0 : index
    %c0_2 = arith.constant 0 : index
    %1 = vector.load %arg2[%c0_1, %c0_2] : memref<64x3xf32, #tpu.memory_space<vmem>>, vector<64x3xf32>
    %2 = arith.truncf %1 : vector<64x3xf32> to vector<64x3xbf16>
    %c0_3 = arith.constant 0 : index
    %c0_4 = arith.constant 0 : index
    %3 = vector.load %arg3[%c0_3, %c0_4] : memref<32x64xbf16, #tpu.memory_space<vmem>>, vector<32x64xbf16>
    %cst = arith.constant dense<0.000000e+00> : vector<64x64xf32>
    %4 = tpu.matmul %0, %3, %cst {dimension_numbers = #tpu.dot_dimension_numbers<[1], [0], [0], [1], [0, 0, 1, 1], [], []>} : vector<64x32xbf16>, vector<32x64xbf16>, vector<64x64xf32> -> vector<64x64xf32>
    %c0_5 = arith.constant 0 : index
    %c0_6 = arith.constant 0 : index
    %5 = vector.load %arg4[%c0_5, %c0_6] : memref<3x64xbf16, #tpu.memory_space<vmem>>, vector<3x64xbf16>
    %cst_7 = arith.constant dense<0.000000e+00> : vector<64x64xf32>
    %6 = tpu.matmul %2, %5, %cst_7 {dimension_numbers = #tpu.dot_dimension_numbers<[1], [0], [0], [1], [0, 0, 1, 1], [], []>} : vector<64x3xbf16>, vector<3x64xbf16>, vector<64x64xf32> -> vector<64x64xf32>
    %7 = arith.addf %4, %6 : vector<64x64xf32>
    %c0_8 = arith.constant 0 : index
    %c0_9 = arith.constant 0 : index
    %8 = vector.load %arg5[%c0_8, %c0_9] : memref<1x64xf32, #tpu.memory_space<vmem>>, vector<1x64xf32>
    %9 = vector.broadcast %8 : vector<1x64xf32> to vector<64x64xf32>
    %10 = arith.addf %7, %9 : vector<64x64xf32>
    %cst_10 = arith.constant 0.000000e+00 : f32
    %11 = vector.broadcast %cst_10 : f32 to vector<64x64xf32>
    %12 = arith.maximumf %10, %11 : vector<64x64xf32>
    %13 = vector.shape_cast %12 : vector<64x64xf32> to vector<8x8x64xf32>
    %cst_11 = arith.constant dense<0xFF800000> : vector<8x64xf32>
    %14 = vector.multi_reduction <maximumf>, %13, %cst_11 [1] : vector<8x8x64xf32> to vector<8x64xf32>
    %15 = arith.truncf %14 : vector<8x64xf32> to vector<8x64xbf16>
    %c0_12 = arith.constant 0 : index
    %c0_13 = arith.constant 0 : index
    %16 = vector.load %arg6[%c0_12, %c0_13] : memref<64x64xbf16, #tpu.memory_space<vmem>>, vector<64x64xbf16>
    %cst_14 = arith.constant dense<0.000000e+00> : vector<8x64xf32>
    %17 = tpu.matmul %15, %16, %cst_14 {dimension_numbers = #tpu.dot_dimension_numbers<[1], [0], [0], [1], [0, 0, 1, 1], [], []>} : vector<8x64xbf16>, vector<64x64xbf16>, vector<8x64xf32> -> vector<8x64xf32>
    %c0_15 = arith.constant 0 : index
    %c0_16 = arith.constant 0 : index
    %18 = vector.load %arg7[%c0_15, %c0_16] : memref<1x64xf32, #tpu.memory_space<vmem>>, vector<1x64xf32>
    %19 = vector.broadcast %18 : vector<1x64xf32> to vector<8x64xf32>
    %20 = arith.addf %17, %19 : vector<8x64xf32>
    %cst_17 = arith.constant 0.000000e+00 : f32
    %21 = vector.broadcast %cst_17 : f32 to vector<8x64xf32>
    %22 = arith.maximumf %20, %21 : vector<8x64xf32>
    %23 = arith.truncf %22 : vector<8x64xf32> to vector<8x64xbf16>
    %c0_18 = arith.constant 0 : index
    %c0_19 = arith.constant 0 : index
    %24 = vector.load %arg8[%c0_18, %c0_19] : memref<8x64xbf16, #tpu.memory_space<vmem>>, vector<8x64xbf16>
    tpu.vector_store %arg8[%c0_18, %c0_19], %23 {strides = array<i32>} : memref<8x64xbf16, #tpu.memory_space<vmem>>, vector<8x64xbf16>,
    return
  }
  func.func @transform_0(%arg0: i32) -> (i32, i32) {
    %c0_i32 = arith.constant 0 : i32
    %c0_i32_0 = arith.constant 0 : i32
    return %arg0, %c0_i32 : i32, i32
  }
  func.func @transform_1(%arg0: i32) -> (i32, i32) {
    %c0_i32 = arith.constant 0 : i32
    %c0_i32_0 = arith.constant 0 : i32
    return %arg0, %c0_i32 : i32, i32
  }
  func.func @transform_2(%arg0: i32) -> (i32, i32) {
    %c0_i32 = arith.constant 0 : i32
    %c0_i32_0 = arith.constant 0 : i32
    %c0_i32_1 = arith.constant 0 : i32
    return %c0_i32, %c0_i32_0 : i32, i32
  }
  func.func @transform_3(%arg0: i32) -> (i32, i32) {
    %c0_i32 = arith.constant 0 : i32
    %c0_i32_0 = arith.constant 0 : i32
    %c0_i32_1 = arith.constant 0 : i32
    return %c0_i32, %c0_i32_0 : i32, i32
  }
  func.func @transform_4(%arg0: i32) -> (i32, i32) {
    %c0_i32 = arith.constant 0 : i32
    %c0_i32_0 = arith.constant 0 : i32
    %c0_i32_1 = arith.constant 0 : i32
    return %c0_i32, %c0_i32_0 : i32, i32
  }
  func.func @transform_5(%arg0: i32) -> (i32, i32) {
    %c0_i32 = arith.constant 0 : i32
    %c0_i32_0 = arith.constant 0 : i32
    %c0_i32_1 = arith.constant 0 : i32
    return %c0_i32, %c0_i32_0 : i32, i32
  }
  func.func @transform_6(%arg0: i32) -> (i32, i32) {
    %c0_i32 = arith.constant 0 : i32
    %c0_i32_0 = arith.constant 0 : i32
    %c0_i32_1 = arith.constant 0 : i32
    return %c0_i32, %c0_i32_0 : i32, i32
  }
  func.func @transform_7(%arg0: i32) -> (i32, i32) {
    %c0_i32 = arith.constant 0 : i32
    %c0_i32_0 = arith.constant 0 : i32
    return %arg0, %c0_i32 : i32, i32
  }
}

module attributes {stable_mosaic.version = 11 : i64} {
  func.func @_knn_kernel(%arg0: i32, %arg1: i32, %arg2: memref<1x8x3xf32, #tpu.memory_space<vmem>>, %arg3: memref<1x3x4xf32, #tpu.memory_space<vmem>>, %arg4: memref<1x1x4xf32, #tpu.memory_space<vmem>>, %arg5: memref<1x8x3xi32, #tpu.memory_space<vmem>>, %arg6: memref<1x8x3xf32, #tpu.memory_space<vmem>>) attributes {dimension_semantics = [#tpu.dimension_semantics<parallel>, #tpu.dimension_semantics<parallel>], iteration_bounds = array<i64: 2, 2>, scalar_prefetch = 0 : i64, scratch_operands = 0 : i64, tpu.core_type = #tpu.core_type<tc>, window_params = [{transform_indices = @transform_0, window_bounds = array<i64: 1, 8, 3>}, {transform_indices = @transform_1, window_bounds = array<i64: 1, 3, 4>}, {transform_indices = @transform_2, window_bounds = array<i64: 1, 1, 4>}, {transform_indices = @transform_3, window_bounds = array<i64: 1, 8, 3>}, {transform_indices = @transform_4, window_bounds = array<i64: 1, 8, 3>}]} {
    %c0 = arith.constant 0 : index
    %c0_0 = arith.constant 0 : index
    %c0_1 = arith.constant 0 : index
    %0 = vector.load %arg2[%c0, %c0_0, %c0_1] : memref<1x8x3xf32, #tpu.memory_space<vmem>>, vector<1x8x3xf32>
    %1 = vector.shape_cast %0 : vector<1x8x3xf32> to vector<8x3xf32>
    %c0_2 = arith.constant 0 : index
    %c0_3 = arith.constant 0 : index
    %c0_4 = arith.constant 0 : index
    %2 = vector.load %arg3[%c0_2, %c0_3, %c0_4] : memref<1x3x4xf32, #tpu.memory_space<vmem>>, vector<1x3x4xf32>
    %3 = vector.shape_cast %2 : vector<1x3x4xf32> to vector<3x4xf32>
    %c0_5 = arith.constant 0 : index
    %c0_6 = arith.constant 0 : index
    %c0_7 = arith.constant 0 : index
    %4 = vector.load %arg4[%c0_5, %c0_6, %c0_7] : memref<1x1x4xf32, #tpu.memory_space<vmem>>, vector<1x1x4xf32>
    %5 = vector.shape_cast %4 : vector<1x1x4xf32> to vector<1x4xf32>
    %6 = arith.mulf %1, %1 : vector<8x3xf32>
    %cst = arith.constant dense<0.000000e+00> : vector<8xf32>
    %7 = vector.multi_reduction <add>, %6, %cst [1] : vector<8x3xf32> to vector<8xf32>
    %8 = vector.shape_cast %7 : vector<8xf32> to vector<8x1xf32>
    %9 = vector.broadcast %8 : vector<8x1xf32> to vector<8x4xf32>
    %10 = vector.broadcast %5 : vector<1x4xf32> to vector<8x4xf32>
    %11 = arith.addf %9, %10 : vector<8x4xf32>
    %cst_8 = arith.constant dense<0.000000e+00> : vector<8x4xf32>
    %12 = tpu.matmul %1, %3, %cst_8 {dimension_numbers = #tpu.dot_dimension_numbers<[1], [0], [0], [1], [0, 0, 1, 1], [], []>} : vector<8x3xf32>, vector<3x4xf32>, vector<8x4xf32> -> vector<8x4xf32>
    %cst_9 = arith.constant 2.000000e+00 : f32
    %13 = vector.broadcast %cst_9 : f32 to vector<8x4xf32>
    %14 = arith.mulf %13, %12 : vector<8x4xf32>
    %15 = arith.subf %11, %14 : vector<8x4xf32>
    %16 = tpu.iota {dimensions = array<i32: 1>} : vector<8x4xi32>
    %17 = arith.sitofp %16 : vector<8x4xi32> to vector<8x4xf32>
    %cst_10 = arith.constant dense<0x7F800000> : vector<8xf32>
    %18 = vector.multi_reduction <minimumf>, %15, %cst_10 [1] : vector<8x4xf32> to vector<8xf32>
    %19 = vector.shape_cast %18 : vector<8xf32> to vector<8x1xf32>
    %20 = vector.broadcast %19 : vector<8x1xf32> to vector<8x4xf32>
    %21 = arith.cmpf ole, %15, %20 : vector<8x4xf32>
    %cst_11 = arith.constant 4.000000e+00 : f32
    %22 = vector.broadcast %cst_11 : f32 to vector<8x4xf32>
    %23 = arith.select %21, %17, %22 : vector<8x4xi1>, vector<8x4xf32>
    %cst_12 = arith.constant dense<0x7F800000> : vector<8xf32>
    %24 = vector.multi_reduction <minimumf>, %23, %cst_12 [1] : vector<8x4xf32> to vector<8xf32>
    %25 = vector.shape_cast %24 : vector<8xf32> to vector<8x1xf32>
    %26 = vector.broadcast %25 : vector<8x1xf32> to vector<8x4xf32>
    %27 = arith.cmpf oeq, %17, %26 : vector<8x4xf32>
    %cst_13 = arith.constant 1.000000e+30 : f32
    %28 = vector.broadcast %cst_13 : f32 to vector<8x4xf32>
    %29 = arith.select %27, %28, %15 : vector<8x4xi1>, vector<8x4xf32>
    %cst_14 = arith.constant dense<0x7F800000> : vector<8xf32>
    %30 = vector.multi_reduction <minimumf>, %29, %cst_14 [1] : vector<8x4xf32> to vector<8xf32>
    %31 = vector.shape_cast %30 : vector<8xf32> to vector<8x1xf32>
    %32 = vector.broadcast %31 : vector<8x1xf32> to vector<8x4xf32>
    %33 = arith.cmpf ole, %29, %32 : vector<8x4xf32>
    %cst_15 = arith.constant 4.000000e+00 : f32
    %34 = vector.broadcast %cst_15 : f32 to vector<8x4xf32>
    %35 = arith.select %33, %17, %34 : vector<8x4xi1>, vector<8x4xf32>
    %cst_16 = arith.constant dense<0x7F800000> : vector<8xf32>
    %36 = vector.multi_reduction <minimumf>, %35, %cst_16 [1] : vector<8x4xf32> to vector<8xf32>
    %37 = vector.shape_cast %36 : vector<8xf32> to vector<8x1xf32>
    %38 = vector.broadcast %37 : vector<8x1xf32> to vector<8x4xf32>
    %39 = arith.cmpf oeq, %17, %38 : vector<8x4xf32>
    %cst_17 = arith.constant 1.000000e+30 : f32
    %40 = vector.broadcast %cst_17 : f32 to vector<8x4xf32>
    %41 = arith.select %39, %40, %29 : vector<8x4xi1>, vector<8x4xf32>
    %cst_18 = arith.constant dense<0x7F800000> : vector<8xf32>
    %42 = vector.multi_reduction <minimumf>, %41, %cst_18 [1] : vector<8x4xf32> to vector<8xf32>
    %43 = vector.shape_cast %42 : vector<8xf32> to vector<8x1xf32>
    %44 = vector.broadcast %43 : vector<8x1xf32> to vector<8x4xf32>
    %45 = arith.cmpf ole, %41, %44 : vector<8x4xf32>
    %cst_19 = arith.constant 4.000000e+00 : f32
    %46 = vector.broadcast %cst_19 : f32 to vector<8x4xf32>
    %47 = arith.select %45, %17, %46 : vector<8x4xi1>, vector<8x4xf32>
    %cst_20 = arith.constant dense<0x7F800000> : vector<8xf32>
    %48 = vector.multi_reduction <minimumf>, %47, %cst_20 [1] : vector<8x4xf32> to vector<8xf32>
    %49 = vector.shape_cast %48 : vector<8xf32> to vector<8x1xf32>
    %50 = tpu.concatenate %25, %37, %49 in 1 : vector<8x1xf32>, vector<8x1xf32>, vector<8x1xf32> -> vector<8x3xf32>
    %51 = arith.fptosi %50 : vector<8x3xf32> to vector<8x3xi32>
    %c0_21 = arith.constant 0 : index
    %c0_22 = arith.constant 0 : index
    %c0_23 = arith.constant 0 : index
    %52 = vector.load %arg5[%c0_21, %c0_22, %c0_23] : memref<1x8x3xi32, #tpu.memory_space<vmem>>, vector<1x8x3xi32>
    %53 = vector.shape_cast %52 : vector<1x8x3xi32> to vector<8x3xi32>
    %54 = vector.shape_cast %51 : vector<8x3xi32> to vector<1x8x3xi32>
    tpu.vector_store %arg5[%c0_21, %c0_22, %c0_23], %54 {strides = array<i32>} : memref<1x8x3xi32, #tpu.memory_space<vmem>>, vector<1x8x3xi32>,
    %55 = tpu.concatenate %19, %31, %43 in 1 : vector<8x1xf32>, vector<8x1xf32>, vector<8x1xf32> -> vector<8x3xf32>
    %c0_24 = arith.constant 0 : index
    %c0_25 = arith.constant 0 : index
    %c0_26 = arith.constant 0 : index
    %56 = vector.load %arg6[%c0_24, %c0_25, %c0_26] : memref<1x8x3xf32, #tpu.memory_space<vmem>>, vector<1x8x3xf32>
    %57 = vector.shape_cast %56 : vector<1x8x3xf32> to vector<8x3xf32>
    %58 = vector.shape_cast %55 : vector<8x3xf32> to vector<1x8x3xf32>
    tpu.vector_store %arg6[%c0_24, %c0_25, %c0_26], %58 {strides = array<i32>} : memref<1x8x3xf32, #tpu.memory_space<vmem>>, vector<1x8x3xf32>,
    return
  }
  func.func @transform_0(%arg0: i32, %arg1: i32) -> (i32, i32, i32) {
    %c0_i32 = arith.constant 0 : i32
    %c0_i32_0 = arith.constant 0 : i32
    return %arg0, %arg1, %c0_i32 : i32, i32, i32
  }
  func.func @transform_1(%arg0: i32, %arg1: i32) -> (i32, i32, i32) {
    %c0_i32 = arith.constant 0 : i32
    %c0_i32_0 = arith.constant 0 : i32
    %c0_i32_1 = arith.constant 0 : i32
    return %arg0, %c0_i32, %c0_i32_0 : i32, i32, i32
  }
  func.func @transform_2(%arg0: i32, %arg1: i32) -> (i32, i32, i32) {
    %c0_i32 = arith.constant 0 : i32
    %c0_i32_0 = arith.constant 0 : i32
    %c0_i32_1 = arith.constant 0 : i32
    return %arg0, %c0_i32, %c0_i32_0 : i32, i32, i32
  }
  func.func @transform_3(%arg0: i32, %arg1: i32) -> (i32, i32, i32) {
    %c0_i32 = arith.constant 0 : i32
    %c0_i32_0 = arith.constant 0 : i32
    return %arg0, %arg1, %c0_i32 : i32, i32, i32
  }
  func.func @transform_4(%arg0: i32, %arg1: i32) -> (i32, i32, i32) {
    %c0_i32 = arith.constant 0 : i32
    %c0_i32_0 = arith.constant 0 : i32
    return %arg0, %arg1, %c0_i32 : i32, i32, i32
  }
}

module attributes {stable_mosaic.version = 11 : i64} {
  func.func @_fp_fused_kernel(%arg0: i32, %arg1: memref<16x3x64xbf16, #tpu.memory_space<vmem>>, %arg2: memref<16x3xf32, #tpu.memory_space<vmem>>, %arg3: memref<16x32xbf16, #tpu.memory_space<vmem>>, %arg4: memref<64x64xbf16, #tpu.memory_space<vmem>>, %arg5: memref<32x64xbf16, #tpu.memory_space<vmem>>, %arg6: memref<1x64xf32, #tpu.memory_space<vmem>>, %arg7: memref<64x64xbf16, #tpu.memory_space<vmem>>, %arg8: memref<1x64xf32, #tpu.memory_space<vmem>>, %arg9: memref<16x64xbf16, #tpu.memory_space<vmem>>) attributes {dimension_semantics = [#tpu.dimension_semantics<parallel>], iteration_bounds = array<i64: 2>, scalar_prefetch = 0 : i64, scratch_operands = 0 : i64, tpu.core_type = #tpu.core_type<tc>, window_params = [{transform_indices = @transform_0, window_bounds = array<i64: 16, 3, 64>}, {transform_indices = @transform_1, window_bounds = array<i64: 16, 3>}, {transform_indices = @transform_2, window_bounds = array<i64: 16, 32>}, {pipeline_mode = #tpu.pipeline_mode<synchronous>, transform_indices = @transform_3, window_bounds = array<i64: 64, 64>}, {pipeline_mode = #tpu.pipeline_mode<synchronous>, transform_indices = @transform_4, window_bounds = array<i64: 32, 64>}, {pipeline_mode = #tpu.pipeline_mode<synchronous>, transform_indices = @transform_5, window_bounds = array<i64: 1, 64>}, {pipeline_mode = #tpu.pipeline_mode<synchronous>, transform_indices = @transform_6, window_bounds = array<i64: 64, 64>}, {pipeline_mode = #tpu.pipeline_mode<synchronous>, transform_indices = @transform_7, window_bounds = array<i64: 1, 64>}, {transform_indices = @transform_8, window_bounds = array<i64: 16, 64>}]} {
    %c0 = arith.constant 0 : index
    %c0_0 = arith.constant 0 : index
    %c0_1 = arith.constant 0 : index
    %0 = vector.load %arg1[%c0, %c0_0, %c0_1] : memref<16x3x64xbf16, #tpu.memory_space<vmem>>, vector<16x3x64xbf16>
    %1 = arith.extf %0 : vector<16x3x64xbf16> to vector<16x3x64xf32>
    %c0_2 = arith.constant 0 : index
    %c0_3 = arith.constant 0 : index
    %2 = vector.load %arg2[%c0_2, %c0_3] : memref<16x3xf32, #tpu.memory_space<vmem>>, vector<16x3xf32>
    %3 = vector.shape_cast %2 : vector<16x3xf32> to vector<16x3x1xf32>
    %4 = vector.broadcast %3 : vector<16x3x1xf32> to vector<16x3x64xf32>
    %5 = arith.mulf %1, %4 : vector<16x3x64xf32>
    %cst = arith.constant dense<0.000000e+00> : vector<16x64xf32>
    %6 = vector.multi_reduction <add>, %5, %cst [1] : vector<16x3x64xf32> to vector<16x64xf32>
    %7 = arith.truncf %6 : vector<16x64xf32> to vector<16x64xbf16>
    %c0_4 = arith.constant 0 : index
    %c0_5 = arith.constant 0 : index
    %8 = vector.load %arg4[%c0_4, %c0_5] : memref<64x64xbf16, #tpu.memory_space<vmem>>, vector<64x64xbf16>
    %cst_6 = arith.constant dense<0.000000e+00> : vector<16x64xf32>
    %9 = tpu.matmul %7, %8, %cst_6 {dimension_numbers = #tpu.dot_dimension_numbers<[1], [0], [0], [1], [0, 0, 1, 1], [], []>} : vector<16x64xbf16>, vector<64x64xbf16>, vector<16x64xf32> -> vector<16x64xf32>
    %c0_7 = arith.constant 0 : index
    %c0_8 = arith.constant 0 : index
    %10 = vector.load %arg3[%c0_7, %c0_8] : memref<16x32xbf16, #tpu.memory_space<vmem>>, vector<16x32xbf16>
    %c0_9 = arith.constant 0 : index
    %c0_10 = arith.constant 0 : index
    %11 = vector.load %arg5[%c0_9, %c0_10] : memref<32x64xbf16, #tpu.memory_space<vmem>>, vector<32x64xbf16>
    %cst_11 = arith.constant dense<0.000000e+00> : vector<16x64xf32>
    %12 = tpu.matmul %10, %11, %cst_11 {dimension_numbers = #tpu.dot_dimension_numbers<[1], [0], [0], [1], [0, 0, 1, 1], [], []>} : vector<16x32xbf16>, vector<32x64xbf16>, vector<16x64xf32> -> vector<16x64xf32>
    %13 = arith.addf %9, %12 : vector<16x64xf32>
    %c0_12 = arith.constant 0 : index
    %c0_13 = arith.constant 0 : index
    %14 = vector.load %arg6[%c0_12, %c0_13] : memref<1x64xf32, #tpu.memory_space<vmem>>, vector<1x64xf32>
    %15 = vector.broadcast %14 : vector<1x64xf32> to vector<16x64xf32>
    %16 = arith.addf %13, %15 : vector<16x64xf32>
    %cst_14 = arith.constant 0.000000e+00 : f32
    %17 = vector.broadcast %cst_14 : f32 to vector<16x64xf32>
    %18 = arith.maximumf %16, %17 : vector<16x64xf32>
    %19 = arith.truncf %18 : vector<16x64xf32> to vector<16x64xbf16>
    %c0_15 = arith.constant 0 : index
    %c0_16 = arith.constant 0 : index
    %20 = vector.load %arg7[%c0_15, %c0_16] : memref<64x64xbf16, #tpu.memory_space<vmem>>, vector<64x64xbf16>
    %cst_17 = arith.constant dense<0.000000e+00> : vector<16x64xf32>
    %21 = tpu.matmul %19, %20, %cst_17 {dimension_numbers = #tpu.dot_dimension_numbers<[1], [0], [0], [1], [0, 0, 1, 1], [], []>} : vector<16x64xbf16>, vector<64x64xbf16>, vector<16x64xf32> -> vector<16x64xf32>
    %c0_18 = arith.constant 0 : index
    %c0_19 = arith.constant 0 : index
    %22 = vector.load %arg8[%c0_18, %c0_19] : memref<1x64xf32, #tpu.memory_space<vmem>>, vector<1x64xf32>
    %23 = vector.broadcast %22 : vector<1x64xf32> to vector<16x64xf32>
    %24 = arith.addf %21, %23 : vector<16x64xf32>
    %cst_20 = arith.constant 0.000000e+00 : f32
    %25 = vector.broadcast %cst_20 : f32 to vector<16x64xf32>
    %26 = arith.maximumf %24, %25 : vector<16x64xf32>
    %27 = arith.truncf %26 : vector<16x64xf32> to vector<16x64xbf16>
    %c0_21 = arith.constant 0 : index
    %c0_22 = arith.constant 0 : index
    %28 = vector.load %arg9[%c0_21, %c0_22] : memref<16x64xbf16, #tpu.memory_space<vmem>>, vector<16x64xbf16>
    tpu.vector_store %arg9[%c0_21, %c0_22], %27 {strides = array<i32>} : memref<16x64xbf16, #tpu.memory_space<vmem>>, vector<16x64xbf16>,
    return
  }
  func.func @transform_0(%arg0: i32) -> (i32, i32, i32) {
    %c0_i32 = arith.constant 0 : i32
    %c0_i32_0 = arith.constant 0 : i32
    %c0_i32_1 = arith.constant 0 : i32
    return %arg0, %c0_i32, %c0_i32_0 : i32, i32, i32
  }
  func.func @transform_1(%arg0: i32) -> (i32, i32) {
    %c0_i32 = arith.constant 0 : i32
    %c0_i32_0 = arith.constant 0 : i32
    return %arg0, %c0_i32 : i32, i32
  }
  func.func @transform_2(%arg0: i32) -> (i32, i32) {
    %c0_i32 = arith.constant 0 : i32
    %c0_i32_0 = arith.constant 0 : i32
    return %arg0, %c0_i32 : i32, i32
  }
  func.func @transform_3(%arg0: i32) -> (i32, i32) {
    %c0_i32 = arith.constant 0 : i32
    %c0_i32_0 = arith.constant 0 : i32
    %c0_i32_1 = arith.constant 0 : i32
    return %c0_i32, %c0_i32_0 : i32, i32
  }
  func.func @transform_4(%arg0: i32) -> (i32, i32) {
    %c0_i32 = arith.constant 0 : i32
    %c0_i32_0 = arith.constant 0 : i32
    %c0_i32_1 = arith.constant 0 : i32
    return %c0_i32, %c0_i32_0 : i32, i32
  }
  func.func @transform_5(%arg0: i32) -> (i32, i32) {
    %c0_i32 = arith.constant 0 : i32
    %c0_i32_0 = arith.constant 0 : i32
    %c0_i32_1 = arith.constant 0 : i32
    return %c0_i32, %c0_i32_0 : i32, i32
  }
  func.func @transform_6(%arg0: i32) -> (i32, i32) {
    %c0_i32 = arith.constant 0 : i32
    %c0_i32_0 = arith.constant 0 : i32
    %c0_i32_1 = arith.constant 0 : i32
    return %c0_i32, %c0_i32_0 : i32, i32
  }
  func.func @transform_7(%arg0: i32) -> (i32, i32) {
    %c0_i32 = arith.constant 0 : i32
    %c0_i32_0 = arith.constant 0 : i32
    %c0_i32_1 = arith.constant 0 : i32
    return %c0_i32, %c0_i32_0 : i32, i32
  }
  func.func @transform_8(%arg0: i32) -> (i32, i32) {
    %c0_i32 = arith.constant 0 : i32
    %c0_i32_0 = arith.constant 0 : i32
    return %arg0, %c0_i32 : i32, i32
  }
}

module attributes {stable_mosaic.version = 11 : i64} {
  func.func @_knn_kernel(%arg0: i32, %arg1: i32, %arg2: memref<1x32x3xf32, #tpu.memory_space<vmem>>, %arg3: memref<1x3x16xf32, #tpu.memory_space<vmem>>, %arg4: memref<1x1x16xf32, #tpu.memory_space<vmem>>, %arg5: memref<1x32x3xi32, #tpu.memory_space<vmem>>, %arg6: memref<1x32x3xf32, #tpu.memory_space<vmem>>) attributes {dimension_semantics = [#tpu.dimension_semantics<parallel>, #tpu.dimension_semantics<parallel>], iteration_bounds = array<i64: 2, 2>, scalar_prefetch = 0 : i64, scratch_operands = 0 : i64, tpu.core_type = #tpu.core_type<tc>, window_params = [{transform_indices = @transform_0, window_bounds = array<i64: 1, 32, 3>}, {transform_indices = @transform_1, window_bounds = array<i64: 1, 3, 16>}, {transform_indices = @transform_2, window_bounds = array<i64: 1, 1, 16>}, {transform_indices = @transform_3, window_bounds = array<i64: 1, 32, 3>}, {transform_indices = @transform_4, window_bounds = array<i64: 1, 32, 3>}]} {
    %c0 = arith.constant 0 : index
    %c0_0 = arith.constant 0 : index
    %c0_1 = arith.constant 0 : index
    %0 = vector.load %arg2[%c0, %c0_0, %c0_1] : memref<1x32x3xf32, #tpu.memory_space<vmem>>, vector<1x32x3xf32>
    %1 = vector.shape_cast %0 : vector<1x32x3xf32> to vector<32x3xf32>
    %c0_2 = arith.constant 0 : index
    %c0_3 = arith.constant 0 : index
    %c0_4 = arith.constant 0 : index
    %2 = vector.load %arg3[%c0_2, %c0_3, %c0_4] : memref<1x3x16xf32, #tpu.memory_space<vmem>>, vector<1x3x16xf32>
    %3 = vector.shape_cast %2 : vector<1x3x16xf32> to vector<3x16xf32>
    %c0_5 = arith.constant 0 : index
    %c0_6 = arith.constant 0 : index
    %c0_7 = arith.constant 0 : index
    %4 = vector.load %arg4[%c0_5, %c0_6, %c0_7] : memref<1x1x16xf32, #tpu.memory_space<vmem>>, vector<1x1x16xf32>
    %5 = vector.shape_cast %4 : vector<1x1x16xf32> to vector<1x16xf32>
    %6 = arith.mulf %1, %1 : vector<32x3xf32>
    %cst = arith.constant dense<0.000000e+00> : vector<32xf32>
    %7 = vector.multi_reduction <add>, %6, %cst [1] : vector<32x3xf32> to vector<32xf32>
    %8 = vector.shape_cast %7 : vector<32xf32> to vector<32x1xf32>
    %9 = vector.broadcast %8 : vector<32x1xf32> to vector<32x16xf32>
    %10 = vector.broadcast %5 : vector<1x16xf32> to vector<32x16xf32>
    %11 = arith.addf %9, %10 : vector<32x16xf32>
    %cst_8 = arith.constant dense<0.000000e+00> : vector<32x16xf32>
    %12 = tpu.matmul %1, %3, %cst_8 {dimension_numbers = #tpu.dot_dimension_numbers<[1], [0], [0], [1], [0, 0, 1, 1], [], []>} : vector<32x3xf32>, vector<3x16xf32>, vector<32x16xf32> -> vector<32x16xf32>
    %cst_9 = arith.constant 2.000000e+00 : f32
    %13 = vector.broadcast %cst_9 : f32 to vector<32x16xf32>
    %14 = arith.mulf %13, %12 : vector<32x16xf32>
    %15 = arith.subf %11, %14 : vector<32x16xf32>
    %16 = tpu.iota {dimensions = array<i32: 1>} : vector<32x16xi32>
    %17 = arith.sitofp %16 : vector<32x16xi32> to vector<32x16xf32>
    %cst_10 = arith.constant dense<0x7F800000> : vector<32xf32>
    %18 = vector.multi_reduction <minimumf>, %15, %cst_10 [1] : vector<32x16xf32> to vector<32xf32>
    %19 = vector.shape_cast %18 : vector<32xf32> to vector<32x1xf32>
    %20 = vector.broadcast %19 : vector<32x1xf32> to vector<32x16xf32>
    %21 = arith.cmpf ole, %15, %20 : vector<32x16xf32>
    %cst_11 = arith.constant 1.600000e+01 : f32
    %22 = vector.broadcast %cst_11 : f32 to vector<32x16xf32>
    %23 = arith.select %21, %17, %22 : vector<32x16xi1>, vector<32x16xf32>
    %cst_12 = arith.constant dense<0x7F800000> : vector<32xf32>
    %24 = vector.multi_reduction <minimumf>, %23, %cst_12 [1] : vector<32x16xf32> to vector<32xf32>
    %25 = vector.shape_cast %24 : vector<32xf32> to vector<32x1xf32>
    %26 = vector.broadcast %25 : vector<32x1xf32> to vector<32x16xf32>
    %27 = arith.cmpf oeq, %17, %26 : vector<32x16xf32>
    %cst_13 = arith.constant 1.000000e+30 : f32
    %28 = vector.broadcast %cst_13 : f32 to vector<32x16xf32>
    %29 = arith.select %27, %28, %15 : vector<32x16xi1>, vector<32x16xf32>
    %cst_14 = arith.constant dense<0x7F800000> : vector<32xf32>
    %30 = vector.multi_reduction <minimumf>, %29, %cst_14 [1] : vector<32x16xf32> to vector<32xf32>
    %31 = vector.shape_cast %30 : vector<32xf32> to vector<32x1xf32>
    %32 = vector.broadcast %31 : vector<32x1xf32> to vector<32x16xf32>
    %33 = arith.cmpf ole, %29, %32 : vector<32x16xf32>
    %cst_15 = arith.constant 1.600000e+01 : f32
    %34 = vector.broadcast %cst_15 : f32 to vector<32x16xf32>
    %35 = arith.select %33, %17, %34 : vector<32x16xi1>, vector<32x16xf32>
    %cst_16 = arith.constant dense<0x7F800000> : vector<32xf32>
    %36 = vector.multi_reduction <minimumf>, %35, %cst_16 [1] : vector<32x16xf32> to vector<32xf32>
    %37 = vector.shape_cast %36 : vector<32xf32> to vector<32x1xf32>
    %38 = vector.broadcast %37 : vector<32x1xf32> to vector<32x16xf32>
    %39 = arith.cmpf oeq, %17, %38 : vector<32x16xf32>
    %cst_17 = arith.constant 1.000000e+30 : f32
    %40 = vector.broadcast %cst_17 : f32 to vector<32x16xf32>
    %41 = arith.select %39, %40, %29 : vector<32x16xi1>, vector<32x16xf32>
    %cst_18 = arith.constant dense<0x7F800000> : vector<32xf32>
    %42 = vector.multi_reduction <minimumf>, %41, %cst_18 [1] : vector<32x16xf32> to vector<32xf32>
    %43 = vector.shape_cast %42 : vector<32xf32> to vector<32x1xf32>
    %44 = vector.broadcast %43 : vector<32x1xf32> to vector<32x16xf32>
    %45 = arith.cmpf ole, %41, %44 : vector<32x16xf32>
    %cst_19 = arith.constant 1.600000e+01 : f32
    %46 = vector.broadcast %cst_19 : f32 to vector<32x16xf32>
    %47 = arith.select %45, %17, %46 : vector<32x16xi1>, vector<32x16xf32>
    %cst_20 = arith.constant dense<0x7F800000> : vector<32xf32>
    %48 = vector.multi_reduction <minimumf>, %47, %cst_20 [1] : vector<32x16xf32> to vector<32xf32>
    %49 = vector.shape_cast %48 : vector<32xf32> to vector<32x1xf32>
    %50 = tpu.concatenate %25, %37, %49 in 1 : vector<32x1xf32>, vector<32x1xf32>, vector<32x1xf32> -> vector<32x3xf32>
    %51 = arith.fptosi %50 : vector<32x3xf32> to vector<32x3xi32>
    %c0_21 = arith.constant 0 : index
    %c0_22 = arith.constant 0 : index
    %c0_23 = arith.constant 0 : index
    %52 = vector.load %arg5[%c0_21, %c0_22, %c0_23] : memref<1x32x3xi32, #tpu.memory_space<vmem>>, vector<1x32x3xi32>
    %53 = vector.shape_cast %52 : vector<1x32x3xi32> to vector<32x3xi32>
    %54 = vector.shape_cast %51 : vector<32x3xi32> to vector<1x32x3xi32>
    tpu.vector_store %arg5[%c0_21, %c0_22, %c0_23], %54 {strides = array<i32>} : memref<1x32x3xi32, #tpu.memory_space<vmem>>, vector<1x32x3xi32>,
    %55 = tpu.concatenate %19, %31, %43 in 1 : vector<32x1xf32>, vector<32x1xf32>, vector<32x1xf32> -> vector<32x3xf32>
    %c0_24 = arith.constant 0 : index
    %c0_25 = arith.constant 0 : index
    %c0_26 = arith.constant 0 : index
    %56 = vector.load %arg6[%c0_24, %c0_25, %c0_26] : memref<1x32x3xf32, #tpu.memory_space<vmem>>, vector<1x32x3xf32>
    %57 = vector.shape_cast %56 : vector<1x32x3xf32> to vector<32x3xf32>
    %58 = vector.shape_cast %55 : vector<32x3xf32> to vector<1x32x3xf32>
    tpu.vector_store %arg6[%c0_24, %c0_25, %c0_26], %58 {strides = array<i32>} : memref<1x32x3xf32, #tpu.memory_space<vmem>>, vector<1x32x3xf32>,
    return
  }
  func.func @transform_0(%arg0: i32, %arg1: i32) -> (i32, i32, i32) {
    %c0_i32 = arith.constant 0 : i32
    %c0_i32_0 = arith.constant 0 : i32
    return %arg0, %arg1, %c0_i32 : i32, i32, i32
  }
  func.func @transform_1(%arg0: i32, %arg1: i32) -> (i32, i32, i32) {
    %c0_i32 = arith.constant 0 : i32
    %c0_i32_0 = arith.constant 0 : i32
    %c0_i32_1 = arith.constant 0 : i32
    return %arg0, %c0_i32, %c0_i32_0 : i32, i32, i32
  }
  func.func @transform_2(%arg0: i32, %arg1: i32) -> (i32, i32, i32) {
    %c0_i32 = arith.constant 0 : i32
    %c0_i32_0 = arith.constant 0 : i32
    %c0_i32_1 = arith.constant 0 : i32
    return %arg0, %c0_i32, %c0_i32_0 : i32, i32, i32
  }
  func.func @transform_3(%arg0: i32, %arg1: i32) -> (i32, i32, i32) {
    %c0_i32 = arith.constant 0 : i32
    %c0_i32_0 = arith.constant 0 : i32
    return %arg0, %arg1, %c0_i32 : i32, i32, i32
  }
  func.func @transform_4(%arg0: i32, %arg1: i32) -> (i32, i32, i32) {
    %c0_i32 = arith.constant 0 : i32
    %c0_i32_0 = arith.constant 0 : i32
    return %arg0, %arg1, %c0_i32 : i32, i32, i32
  }
}

module attributes {stable_mosaic.version = 11 : i64} {
  func.func @_head_fused_kernel(%arg0: i32, %arg1: memref<64x32xbf16, #tpu.memory_space<vmem>>, %arg2: memref<32x32xbf16, #tpu.memory_space<vmem>>, %arg3: memref<1x32xf32, #tpu.memory_space<vmem>>, %arg4: memref<32x13xbf16, #tpu.memory_space<vmem>>, %arg5: memref<1x13xf32, #tpu.memory_space<vmem>>, %arg6: memref<64x13xf32, #tpu.memory_space<vmem>>) attributes {dimension_semantics = [#tpu.dimension_semantics<parallel>], iteration_bounds = array<i64: 2>, scalar_prefetch = 0 : i64, scratch_operands = 0 : i64, tpu.core_type = #tpu.core_type<tc>, window_params = [{transform_indices = @transform_0, window_bounds = array<i64: 64, 32>}, {pipeline_mode = #tpu.pipeline_mode<synchronous>, transform_indices = @transform_1, window_bounds = array<i64: 32, 32>}, {pipeline_mode = #tpu.pipeline_mode<synchronous>, transform_indices = @transform_2, window_bounds = array<i64: 1, 32>}, {pipeline_mode = #tpu.pipeline_mode<synchronous>, transform_indices = @transform_3, window_bounds = array<i64: 32, 13>}, {pipeline_mode = #tpu.pipeline_mode<synchronous>, transform_indices = @transform_4, window_bounds = array<i64: 1, 13>}, {transform_indices = @transform_5, window_bounds = array<i64: 64, 13>}]} {
    %c0 = arith.constant 0 : index
    %c0_0 = arith.constant 0 : index
    %0 = vector.load %arg1[%c0, %c0_0] : memref<64x32xbf16, #tpu.memory_space<vmem>>, vector<64x32xbf16>
    %c0_1 = arith.constant 0 : index
    %c0_2 = arith.constant 0 : index
    %1 = vector.load %arg2[%c0_1, %c0_2] : memref<32x32xbf16, #tpu.memory_space<vmem>>, vector<32x32xbf16>
    %cst = arith.constant dense<0.000000e+00> : vector<64x32xf32>
    %2 = tpu.matmul %0, %1, %cst {dimension_numbers = #tpu.dot_dimension_numbers<[1], [0], [0], [1], [0, 0, 1, 1], [], []>} : vector<64x32xbf16>, vector<32x32xbf16>, vector<64x32xf32> -> vector<64x32xf32>
    %c0_3 = arith.constant 0 : index
    %c0_4 = arith.constant 0 : index
    %3 = vector.load %arg3[%c0_3, %c0_4] : memref<1x32xf32, #tpu.memory_space<vmem>>, vector<1x32xf32>
    %4 = vector.broadcast %3 : vector<1x32xf32> to vector<64x32xf32>
    %5 = arith.addf %2, %4 : vector<64x32xf32>
    %cst_5 = arith.constant 0.000000e+00 : f32
    %6 = vector.broadcast %cst_5 : f32 to vector<64x32xf32>
    %7 = arith.maximumf %5, %6 : vector<64x32xf32>
    %8 = arith.truncf %7 : vector<64x32xf32> to vector<64x32xbf16>
    %c0_6 = arith.constant 0 : index
    %c0_7 = arith.constant 0 : index
    %9 = vector.load %arg4[%c0_6, %c0_7] : memref<32x13xbf16, #tpu.memory_space<vmem>>, vector<32x13xbf16>
    %cst_8 = arith.constant dense<0.000000e+00> : vector<64x13xf32>
    %10 = tpu.matmul %8, %9, %cst_8 {dimension_numbers = #tpu.dot_dimension_numbers<[1], [0], [0], [1], [0, 0, 1, 1], [], []>} : vector<64x32xbf16>, vector<32x13xbf16>, vector<64x13xf32> -> vector<64x13xf32>
    %c0_9 = arith.constant 0 : index
    %c0_10 = arith.constant 0 : index
    %11 = vector.load %arg5[%c0_9, %c0_10] : memref<1x13xf32, #tpu.memory_space<vmem>>, vector<1x13xf32>
    %12 = vector.broadcast %11 : vector<1x13xf32> to vector<64x13xf32>
    %13 = arith.addf %10, %12 : vector<64x13xf32>
    %c0_11 = arith.constant 0 : index
    %c0_12 = arith.constant 0 : index
    %14 = vector.load %arg6[%c0_11, %c0_12] : memref<64x13xf32, #tpu.memory_space<vmem>>, vector<64x13xf32>
    tpu.vector_store %arg6[%c0_11, %c0_12], %13 {strides = array<i32>} : memref<64x13xf32, #tpu.memory_space<vmem>>, vector<64x13xf32>,
    return
  }
  func.func @transform_0(%arg0: i32) -> (i32, i32) {
    %c0_i32 = arith.constant 0 : i32
    %c0_i32_0 = arith.constant 0 : i32
    return %arg0, %c0_i32 : i32, i32
  }
  func.func @transform_1(%arg0: i32) -> (i32, i32) {
    %c0_i32 = arith.constant 0 : i32
    %c0_i32_0 = arith.constant 0 : i32
    %c0_i32_1 = arith.constant 0 : i32
    return %c0_i32, %c0_i32_0 : i32, i32
  }
  func.func @transform_2(%arg0: i32) -> (i32, i32) {
    %c0_i32 = arith.constant 0 : i32
    %c0_i32_0 = arith.constant 0 : i32
    %c0_i32_1 = arith.constant 0 : i32
    return %c0_i32, %c0_i32_0 : i32, i32
  }
  func.func @transform_3(%arg0: i32) -> (i32, i32) {
    %c0_i32 = arith.constant 0 : i32
    %c0_i32_0 = arith.constant 0 : i32
    %c0_i32_1 = arith.constant 0 : i32
    return %c0_i32, %c0_i32_0 : i32, i32
  }
  func.func @transform_4(%arg0: i32) -> (i32, i32) {
    %c0_i32 = arith.constant 0 : i32
    %c0_i32_0 = arith.constant 0 : i32
    %c0_i32_1 = arith.constant 0 : i32
    return %c0_i32, %c0_i32_0 : i32, i32
  }
  func.func @transform_5(%arg0: i32) -> (i32, i32) {
    %c0_i32 = arith.constant 0 : i32
    %c0_i32_0 = arith.constant 0 : i32
    return %arg0, %c0_i32 : i32, i32
  }
}

module attributes {stable_mosaic.version = 11 : i64} {
  func.func @_fp_fused_kernel(%arg0: i32, %arg1: memref<64x3x64xbf16, #tpu.memory_space<vmem>>, %arg2: memref<64x3xf32, #tpu.memory_space<vmem>>, %arg3: memref<64x16xbf16, #tpu.memory_space<vmem>>, %arg4: memref<64x32xbf16, #tpu.memory_space<vmem>>, %arg5: memref<16x32xbf16, #tpu.memory_space<vmem>>, %arg6: memref<1x32xf32, #tpu.memory_space<vmem>>, %arg7: memref<32x32xbf16, #tpu.memory_space<vmem>>, %arg8: memref<1x32xf32, #tpu.memory_space<vmem>>, %arg9: memref<64x32xbf16, #tpu.memory_space<vmem>>) attributes {dimension_semantics = [#tpu.dimension_semantics<parallel>], iteration_bounds = array<i64: 2>, scalar_prefetch = 0 : i64, scratch_operands = 0 : i64, tpu.core_type = #tpu.core_type<tc>, window_params = [{transform_indices = @transform_0, window_bounds = array<i64: 64, 3, 64>}, {transform_indices = @transform_1, window_bounds = array<i64: 64, 3>}, {transform_indices = @transform_2, window_bounds = array<i64: 64, 16>}, {pipeline_mode = #tpu.pipeline_mode<synchronous>, transform_indices = @transform_3, window_bounds = array<i64: 64, 32>}, {pipeline_mode = #tpu.pipeline_mode<synchronous>, transform_indices = @transform_4, window_bounds = array<i64: 16, 32>}, {pipeline_mode = #tpu.pipeline_mode<synchronous>, transform_indices = @transform_5, window_bounds = array<i64: 1, 32>}, {pipeline_mode = #tpu.pipeline_mode<synchronous>, transform_indices = @transform_6, window_bounds = array<i64: 32, 32>}, {pipeline_mode = #tpu.pipeline_mode<synchronous>, transform_indices = @transform_7, window_bounds = array<i64: 1, 32>}, {transform_indices = @transform_8, window_bounds = array<i64: 64, 32>}]} {
    %c0 = arith.constant 0 : index
    %c0_0 = arith.constant 0 : index
    %c0_1 = arith.constant 0 : index
    %0 = vector.load %arg1[%c0, %c0_0, %c0_1] : memref<64x3x64xbf16, #tpu.memory_space<vmem>>, vector<64x3x64xbf16>
    %1 = arith.extf %0 : vector<64x3x64xbf16> to vector<64x3x64xf32>
    %c0_2 = arith.constant 0 : index
    %c0_3 = arith.constant 0 : index
    %2 = vector.load %arg2[%c0_2, %c0_3] : memref<64x3xf32, #tpu.memory_space<vmem>>, vector<64x3xf32>
    %3 = vector.shape_cast %2 : vector<64x3xf32> to vector<64x3x1xf32>
    %4 = vector.broadcast %3 : vector<64x3x1xf32> to vector<64x3x64xf32>
    %5 = arith.mulf %1, %4 : vector<64x3x64xf32>
    %cst = arith.constant dense<0.000000e+00> : vector<64x64xf32>
    %6 = vector.multi_reduction <add>, %5, %cst [1] : vector<64x3x64xf32> to vector<64x64xf32>
    %7 = arith.truncf %6 : vector<64x64xf32> to vector<64x64xbf16>
    %c0_4 = arith.constant 0 : index
    %c0_5 = arith.constant 0 : index
    %8 = vector.load %arg4[%c0_4, %c0_5] : memref<64x32xbf16, #tpu.memory_space<vmem>>, vector<64x32xbf16>
    %cst_6 = arith.constant dense<0.000000e+00> : vector<64x32xf32>
    %9 = tpu.matmul %7, %8, %cst_6 {dimension_numbers = #tpu.dot_dimension_numbers<[1], [0], [0], [1], [0, 0, 1, 1], [], []>} : vector<64x64xbf16>, vector<64x32xbf16>, vector<64x32xf32> -> vector<64x32xf32>
    %c0_7 = arith.constant 0 : index
    %c0_8 = arith.constant 0 : index
    %10 = vector.load %arg3[%c0_7, %c0_8] : memref<64x16xbf16, #tpu.memory_space<vmem>>, vector<64x16xbf16>
    %c0_9 = arith.constant 0 : index
    %c0_10 = arith.constant 0 : index
    %11 = vector.load %arg5[%c0_9, %c0_10] : memref<16x32xbf16, #tpu.memory_space<vmem>>, vector<16x32xbf16>
    %cst_11 = arith.constant dense<0.000000e+00> : vector<64x32xf32>
    %12 = tpu.matmul %10, %11, %cst_11 {dimension_numbers = #tpu.dot_dimension_numbers<[1], [0], [0], [1], [0, 0, 1, 1], [], []>} : vector<64x16xbf16>, vector<16x32xbf16>, vector<64x32xf32> -> vector<64x32xf32>
    %13 = arith.addf %9, %12 : vector<64x32xf32>
    %c0_12 = arith.constant 0 : index
    %c0_13 = arith.constant 0 : index
    %14 = vector.load %arg6[%c0_12, %c0_13] : memref<1x32xf32, #tpu.memory_space<vmem>>, vector<1x32xf32>
    %15 = vector.broadcast %14 : vector<1x32xf32> to vector<64x32xf32>
    %16 = arith.addf %13, %15 : vector<64x32xf32>
    %cst_14 = arith.constant 0.000000e+00 : f32
    %17 = vector.broadcast %cst_14 : f32 to vector<64x32xf32>
    %18 = arith.maximumf %16, %17 : vector<64x32xf32>
    %19 = arith.truncf %18 : vector<64x32xf32> to vector<64x32xbf16>
    %c0_15 = arith.constant 0 : index
    %c0_16 = arith.constant 0 : index
    %20 = vector.load %arg7[%c0_15, %c0_16] : memref<32x32xbf16, #tpu.memory_space<vmem>>, vector<32x32xbf16>
    %cst_17 = arith.constant dense<0.000000e+00> : vector<64x32xf32>
    %21 = tpu.matmul %19, %20, %cst_17 {dimension_numbers = #tpu.dot_dimension_numbers<[1], [0], [0], [1], [0, 0, 1, 1], [], []>} : vector<64x32xbf16>, vector<32x32xbf16>, vector<64x32xf32> -> vector<64x32xf32>
    %c0_18 = arith.constant 0 : index
    %c0_19 = arith.constant 0 : index
    %22 = vector.load %arg8[%c0_18, %c0_19] : memref<1x32xf32, #tpu.memory_space<vmem>>, vector<1x32xf32>
    %23 = vector.broadcast %22 : vector<1x32xf32> to vector<64x32xf32>
    %24 = arith.addf %21, %23 : vector<64x32xf32>
    %cst_20 = arith.constant 0.000000e+00 : f32
    %25 = vector.broadcast %cst_20 : f32 to vector<64x32xf32>
    %26 = arith.maximumf %24, %25 : vector<64x32xf32>
    %27 = arith.truncf %26 : vector<64x32xf32> to vector<64x32xbf16>
    %c0_21 = arith.constant 0 : index
    %c0_22 = arith.constant 0 : index
    %28 = vector.load %arg9[%c0_21, %c0_22] : memref<64x32xbf16, #tpu.memory_space<vmem>>, vector<64x32xbf16>
    tpu.vector_store %arg9[%c0_21, %c0_22], %27 {strides = array<i32>} : memref<64x32xbf16, #tpu.memory_space<vmem>>, vector<64x32xbf16>,
    return
  }
  func.func @transform_0(%arg0: i32) -> (i32, i32, i32) {
    %c0_i32 = arith.constant 0 : i32
    %c0_i32_0 = arith.constant 0 : i32
    %c0_i32_1 = arith.constant 0 : i32
    return %arg0, %c0_i32, %c0_i32_0 : i32, i32, i32
  }
  func.func @transform_1(%arg0: i32) -> (i32, i32) {
    %c0_i32 = arith.constant 0 : i32
    %c0_i32_0 = arith.constant 0 : i32
    return %arg0, %c0_i32 : i32, i32
  }
  func.func @transform_2(%arg0: i32) -> (i32, i32) {
    %c0_i32 = arith.constant 0 : i32
    %c0_i32_0 = arith.constant 0 : i32
    return %arg0, %c0_i32 : i32, i32
  }
  func.func @transform_3(%arg0: i32) -> (i32, i32) {
    %c0_i32 = arith.constant 0 : i32
    %c0_i32_0 = arith.constant 0 : i32
    %c0_i32_1 = arith.constant 0 : i32
    return %c0_i32, %c0_i32_0 : i32, i32
  }
  func.func @transform_4(%arg0: i32) -> (i32, i32) {
    %c0_i32 = arith.constant 0 : i32
    %c0_i32_0 = arith.constant 0 : i32
    %c0_i32_1 = arith.constant 0 : i32
    return %c0_i32, %c0_i32_0 : i32, i32
  }
  func.func @transform_5(%arg0: i32) -> (i32, i32) {
    %c0_i32 = arith.constant 0 : i32
    %c0_i32_0 = arith.constant 0 : i32
    %c0_i32_1 = arith.constant 0 : i32
    return %c0_i32, %c0_i32_0 : i32, i32
  }
  func.func @transform_6(%arg0: i32) -> (i32, i32) {
    %c0_i32 = arith.constant 0 : i32
    %c0_i32_0 = arith.constant 0 : i32
    %c0_i32_1 = arith.constant 0 : i32
    return %c0_i32, %c0_i32_0 : i32, i32
  }
  func.func @transform_7(%arg0: i32) -> (i32, i32) {
    %c0_i32 = arith.constant 0 : i32
    %c0_i32_0 = arith.constant 0 : i32
    %c0_i32_1 = arith.constant 0 : i32
    return %c0_i32, %c0_i32_0 : i32, i32
  }
  func.func @transform_8(%arg0: i32) -> (i32, i32) {
    %c0_i32 = arith.constant 0 : i32
    %c0_i32_0 = arith.constant 0 : i32
    return %arg0, %c0_i32 : i32, i32
  }
}

</mosaic_0001>

<bundles_post_ra>
// kernel: assanet_seg_forward.11
= control target key start
LH: loop header
LB: loop body
LE: loop exit
PB: predicated region body
PF: predicated region fallthrough
CT: control target
= control target key end

     0   :  { %10 = vsyncpa [#allocation3], 0  ;;  %s1024_s0 = inlined_call_operand.vmem [shape: f32[2,16,3], index: 0, kind: input, shape index: {}]   ;;  %s1025_s1 = inlined_call_operand.vmem [shape: f32[2,3,64], index: 1, kind: input, shape index: {}]   ;;  %s1026_s2 = inlined_call_operand.vmem [shape: f32[2,1,64], index: 2, kind: input, shape index: {}]   ;;  %s1027_s3 = inlined_call_operand.vmem [shape: s32[2,16,8], index: 3, kind: output, shape index: {0}]   ;;  %s1028_s4 = inlined_call_operand.hbm [shape: f32[2,16,8], index: 4, kind: output, shape index: {1}]  }
   0x1   :  { %12 = vsyncpa [#allocation3 + $0x1], 0  ;;  %s800_s15 = smov 0   ;;  %s802_s16 = smov 0  }
   0x2   :  { %s804_s17 = smov 0   ;;  %s806_s18 = smov 0  }
   0x3   :  { %s808_s19 = smov 0   ;;  %s810_s20 = smov 0  }
   0x4   :  { %s812_s21 = smov 0   ;;  %s814_s22 = smov 0  }
   0x5 LB: > { %s584_s23 = sadd.s32 4294967295, %s773_s22   ;;  %s585_s24 = sadd.s32 4294967294, %s773_s22   ;;  %s773_s22 = sphi %s814_s22, %s18_s22   ;;  %s769_s21 = sphi %s812_s21, %s1043_s21   ;;  %s765_s20 = sphi %s810_s20, %s1042_s20   ;;  %s761_s19 = sphi %s808_s19, %s1041_s19   ;;  %s757_s18 = sphi %s806_s18, %s1040_s18   ;;  %s753_s17 = sphi %s804_s17, %s1039_s17   ;;  %s749_s16 = sphi %s802_s16, %s1038_s16   ;;  %s745_s15 = sphi %s800_s15, %s1037_s15  }
   0x6   : > { %s27_s25 = sadd.s32 1, %s765_s20  ;;  %s30_s26 = sadd.s32 1, %s769_s21 }
   0x7   : > { %p28_p0 = scmp.ge.s32.totalorder %s27_s25, 2  ;;  %p157_p1 = scmp.ne.s32.totalorder %s753_s17, %s749_s16 }
   0x8   : > { %p158_p2 = scmp.eq.s32.totalorder %s584_s23, 3  ;;  %p163_p5 = scmp.ne.s32.totalorder %s749_s16, %s745_s15 }
   0x9   : > { %s1045_s25 = smov (%p28_p0, %s27_s25), 0  ;;  %s1047_s26 = smov (!%p28_p0, %s30_s26), %s769_s21 }
   0xa   : > { %1031 = sst [smem:[#allocation5_spill]] %s1045_s25  ;;  %s143_s27 = ssub.s32 %s765_s20, %s1045_s25 }
   0xb   : > { %p851_p3 = por %p158_p2, %p157_p1  ;;  %p32_p4 = scmp.ge.s32.totalorder %s1047_s26, 2 }
   0xc   : > { %p164_p6 = scmp.eq.s32.totalorder %s585_s24, 3  ;;  %p588_p7 = scmp.ge.s32.totalorder %s773_s22, 1 }
   0xd   : > { %s1049_s26 = smov (%p32_p4, %s1047_s26), 0  ;;  %p206_p9 = scmp.lt.s32.totalorder %s773_s22, 5 }
   0xe   : > { %1033 = sst [smem:[#allocation6_spill]] %s1049_s26  ;;  %p860_p8 = por %p164_p6, %p163_p5 }
   0xf   : > { %s142_s30 = ssub.s32 %s769_s21, %s1049_s26  ;;  %s147_s5 = sadd.s32 1, %s753_s17 }
  0x10   : > { %s144_s6 = sor.u32 %s143_s27, %s142_s30  ;;  %p207_p10 = pnand %p588_p7, %p206_p9 }
  0x11   : > { %p145_p11 = scmp.eq.s32.totalorder %s144_s6, 0  ;;  %p250_p12 = scmp.lt.s32.totalorder (!%p207_p10), %s761_s19, 1 }
  0x12   : > { %210 = sbr.rel (%p207_p10) target bundleno = 2070 (0x816), region = 32  ;;  %p252_p13 = scmp.lt.s32.totalorder (!%p207_p10), %s757_s18, 1 }
  0x13   : > { %s869_s7 = scalar_select %p145_p11, %s753_s17, %s147_s5  }
  0x14   : > { %s598_s26 = sshll.u32 (!%p207_p10), %s761_s19, 1 }
  0x17   : > { %s251_s8 = scalar_select %p250_p12, %s761_s19, 1  ;;  %vm288_vm0 = vcmask 1042432   ;;  %vm277_vm1 = vcmask 23552   ;;  %vm317_vm2 = vcmask 523264   ;;  %v314_v11 = vlaneseq }
  0x18   : > { %s253_s9 = scalar_select %p252_p13, %s757_s18, 1 }
  0x19   : > { %s592_s10 = sshll.u32 %s251_s8, 2  ;;  %s590_s11 = sshll.u32 %s251_s8, 1  ;;  %v315_v12 = vand.u32 127, %v314_v11 }
  0x1a   : > { %s261_s14 = scalar_lea.vmem %s1025_s1, %s592_s10  ;;  %s878_s23 = sadd.s32 %s590_s11, %s253_s9 }
  0x1b   : > { %v274_v0 = vld [vmem:[%s261_s14] sm:$0x7]  ;;  %s591_s24 = sshll.u32 %s878_s23, 3  ;;  %s264_s5 = scalar_lea.vmem %s1026_s2, %s251_s8  ;;  %v892_v13 = vcvt.s32.f32 %v315_v12 }
  0x1c   : > { %595 = vmatpush.msk.msra.mxu0 %vm288_vm0, %v274_v0  ;;  %s257_s25 = scalar_lea.vmem %s1024_s0, %s591_s24  ;;  %v678_v4 = vld [vmem:[%s264_s5] ss:$0 sm:$0xff]  ;;  %s442_s9 = sadd.s32 %s757_s18, %s598_s26 }
  0x1d   : > { %v273_v1 = vld [vmem:[%s257_s25] sm:$0xff]  ;;  %s247_s25 = sand.u32 1, %s749_s16   ;;  %s599_s10 = sshll.u32 %s442_s9, 3 }
  0x1e   : > { %596 = vmatmul.msk.f32.vlgmr.msra.gmra.mxu0 %vm277_vm1, %v273_v1  ;;  %v276_v2 = vmul.f32 %v273_v1, %v273_v1  ;;  %s589_s8 = sshll.u32 %s247_s25, 3  ;;  %s444_s13 = scalar_lea.hbm %s1028_s4, %s599_s10 }
  0x1f   : > { %s249_s19 = scalar_lea.vmem [#allocation2], %s589_s8  ;;  %s448_s18 = sshll.u32 %s444_s13, 4  ;;  %s449_s18 = int_to_ptr.hbm [resolvable:$true] %s448_s18 }
  0x20   : > { %v278_v3 = vsel %vm277_vm1, %v276_v2, 0.0  ;;  %s957_s14 = sshll.u32 %s249_s19, 4  ;;  %s429_s27 = scalar_lea.sflag [#allocation3], %s247_s25  ;;  %s447_s14 = int_to_ptr.vmem [resolvable:$true] %s957_s14 }
  0x21   : > { %279 = vadd.xlane.f32.xlu0 %v278_v3  ;;  %s693_s30 = sshra.s32 %s449_s18, 4  ;;  %s699_s8 = scalar_lea.hbm %s1028_s4, 32  ;;  %s694_s30 = int_to_ptr.hbm [resolvable:$true] %s693_s30 }
  0x22   : > { %s695_s5 = scalar_lea.hbm %s694_s30, 8  ;;  %p700_p4 = scmp.lt.s32.totalorder %s694_s30, %s1028_s4 }
  0x23   : > { %p696_p0 = scmp.ne.s32.totalorder %s694_s30, %s695_s5  ;;  %p701_p5 = scmp.lt.s32.totalorder %s699_s8, %s695_s5 }
  0x25   : > { %p697_p1 = pnand %p696_p0, %p851_p3  ;;  %p702_p6 = por %p701_p5, %p700_p4 }
  0x27   : > { %p698_p2 = pneg %p697_p1 }
  0x29   : > { %p703_p7 = pnand %p702_p6, %p698_p2 }
  0x94   : > { %v280_v5 = vpop.xlane.xlu0 %279 }
  0x95   : > { %v284_v6 = vadd.f32 %v678_v4, %v280_v5 }
  0x9b   : > { %v309_v7 = vpop.f32.mrf.mxu0 }
  0x9c   : > { %v312_v8 = vmul.f32 2.0, %v309_v7 }
  0x9e   : > { %v313_v9 = vsub.f32 %v284_v6, %v312_v8 }
  0xa0   : > { %v318_v10 = vsel %vm317_vm2, %v313_v9, inf }
  0xa1   : > { %319 = vmin.xlane.f32.xlu0 %v318_v10 }
 0x114   : > { %v894_v14 = vpop.xlane.xlu0 %319 }
 0x115   : > { %vm321_vm3 = vcmp.le.f32.partialorder %v313_v9, %v894_v14 }
 0x116   : > { %v322_v15 = vsel %vm321_vm3, %v892_v13, 64.0  ;;  %vm396_vm3 = vcmask 7168  }
 0x117   : > { %v323_v16 = vsel %vm317_vm2, %v322_v15, inf }
 0x118   : > { %324 = vmin.xlane.f32.xlu1 %v323_v16 }
 0x18b   : > { %v899_v17 = vpop.xlane.xlu1 %324 }
 0x18c   : > { %vm326_vm4 = vcmp.eq.f32.partialorder %v892_v13, %v899_v17 }
 0x18d   : > { %v327_v18 = vsel %vm326_vm4, 1e+30, %v313_v9  ;;  %vm398_vm4 = vcmask 15360  }
 0x18e   : > { %v328_v19 = vsel %vm317_vm2, %v327_v18, inf }
 0x18f   : > { %329 = vmin.xlane.f32.xlu1 %v328_v19 }
 0x202   : > { %v904_v20 = vpop.xlane.xlu1 %329 }
 0x203   : > { %vm331_vm5 = vcmp.le.f32.partialorder %v327_v18, %v904_v20  ;;  %v412_v56 = vsel %vm396_vm3, %v894_v14, %v904_v20 }
 0x204   : > { %v332_v21 = vsel %vm331_vm5, %v892_v13, 64.0  ;;  %vm401_vm5 = vcmask 31744  }
 0x205   : > { %v333_v22 = vsel %vm317_vm2, %v332_v21, inf }
 0x206   : > { %334 = vmin.xlane.f32.xlu2 %v333_v22 }
 0x279   : > { %v909_v23 = vpop.xlane.xlu2 %334 }
 0x27a   : > { %vm336_vm6 = vcmp.eq.f32.partialorder %v892_v13, %v909_v23 }
 0x27b   : > { %v337_v24 = vsel %vm336_vm6, 1e+30, %v327_v18  ;;  %vm403_vm6 = vcmask 39936  }
 0x27c   : > { %v338_v25 = vsel %vm317_vm2, %v337_v24, inf }
 0x27d   : > { %339 = vmin.xlane.f32.xlu2 %v338_v25 }
 0x2f0   : > { %v340_v26 = vpop.xlane.xlu2 %339 }
 0x2f1   : > { %vm341_vm7 = vcmp.le.f32.partialorder %v337_v24, %v340_v26  ;;  %v413_v57 = vsel %vm398_vm4, %v412_v56, %v340_v26 }
 0x2f2   : > { %v342_v27 = vsel %vm341_vm7, %v892_v13, 64.0  ;;  %vm405_vm7 = vcmask 48128  }
 0x2f3   : > { %v343_v28 = vsel %vm317_vm2, %v342_v27, inf }
 0x2f4   : > { %344 = vmin.xlane.f32.xlu0 %v343_v28 }
 0x367   : > { %v916_v29 = vpop.xlane.xlu0 %344 }
 0x368   : > { %vm346_vm8 = vcmp.eq.f32.partialorder %v892_v13, %v916_v29 }
 0x369   : > { %v347_v30 = vsel %vm346_vm8, 1e+30, %v337_v24  ;;  %vm407_vm8 = vcmask 56320  }
 0x36a   : > { %v348_v31 = vsel %vm317_vm2, %v347_v30, inf }
 0x36b   : > { %349 = vmin.xlane.f32.xlu1 %v348_v31 }
 0x3de   : > { %v350_v32 = vpop.xlane.xlu1 %349 }
 0x3df   : > { %vm351_vm9 = vcmp.le.f32.partialorder %v347_v30, %v350_v32  ;;  %v414_v58 = vsel %vm277_vm1, %v413_v57, %v350_v32 }
 0x3e0   : > { %v352_v33 = vsel %vm351_vm9, %v892_v13, 64.0  ;;  %vm410_vm9 = vcmask 64512  }
 0x3e1   : > { %v353_v34 = vsel %vm317_vm2, %v352_v33, inf }
 0x3e2   : > { %354 = vmin.xlane.f32.xlu2 %v353_v34 }
 0x455   : > { %v923_v35 = vpop.xlane.xlu2 %354 }
 0x456   : > { %vm356_vm10 = vcmp.eq.f32.partialorder %v892_v13, %v923_v35 }
 0x457   : > { %v357_v36 = vsel %vm356_vm10, 1e+30, %v347_v30 }
 0x458   : > { %v358_v37 = vsel %vm317_vm2, %v357_v36, inf }
 0x459   : > { %359 = vmin.xlane.f32.xlu0 %v358_v37 }
 0x4cc   : > { %v360_v38 = vpop.xlane.xlu0 %359 }
 0x4cd   : > { %vm361_vm11 = vcmp.le.f32.partialorder %v357_v36, %v360_v38  ;;  %v415_v59 = vsel %vm401_vm5, %v414_v58, %v360_v38 }
 0x4ce   : > { %v362_v39 = vsel %vm361_vm11, %v892_v13, 64.0 }
 0x4cf   : > { %v363_v40 = vsel %vm317_vm2, %v362_v39, inf }
 0x4d0   : > { %364 = vmin.xlane.f32.xlu1 %v363_v40 }
 0x543   : > { %v930_v41 = vpop.xlane.xlu1 %364 }
 0x544   : > { %vm366_vm12 = vcmp.eq.f32.partialorder %v892_v13, %v930_v41 }
 0x545   : > { %v367_v42 = vsel %vm366_vm12, 1e+30, %v357_v36 }
 0x546   : > { %v368_v43 = vsel %vm317_vm2, %v367_v42, inf }
 0x547   : > { %369 = vmin.xlane.f32.xlu2 %v368_v43 }
 0x5ba   : > { %v370_v44 = vpop.xlane.xlu2 %369 }
 0x5bb   : > { %vm371_vm13 = vcmp.le.f32.partialorder %v367_v42, %v370_v44  ;;  %v416_v60 = vsel %vm403_vm6, %v415_v59, %v370_v44 }
 0x5bc   : > { %v372_v45 = vsel %vm371_vm13, %v892_v13, 64.0 }
 0x5bd   : > { %v373_v46 = vsel %vm317_vm2, %v372_v45, inf }
 0x5be   : > { %374 = vmin.xlane.f32.xlu0 %v373_v46 }
 0x631   : > { %v937_v47 = vpop.xlane.xlu0 %374 }
 0x632   : > { %vm376_vm14 = vcmp.eq.f32.partialorder %v892_v13, %v937_v47 }
 0x633   : > { %v377_v48 = vsel %vm376_vm14, 1e+30, %v367_v42 }
 0x634   : > { %v378_v49 = vsel %vm317_vm2, %v377_v48, inf }
 0x635   : > { %379 = vmin.xlane.f32.xlu1 %v378_v49 }
 0x6a8   : > { %v380_v50 = vpop.xlane.xlu1 %379 }
 0x6a9   : > { %vm381_vm15 = vcmp.le.f32.partialorder %v377_v48, %v380_v50  ;;  %v417_v61 = vsel %vm405_vm7, %v416_v60, %v380_v50 }
 0x6aa   : > { %v382_v51 = vsel %vm381_vm15, %v892_v13, 64.0 }
 0x6ab   : > { %v383_v52 = vsel %vm317_vm2, %v382_v51, inf }
 0x6ac   : > { %384 = vmin.xlane.f32.xlu2 %v383_v52 }
 0x71f   : > { %v385_v53 = vpop.xlane.xlu2 %384 }
 0x720   : > { %vm386_vm0 = vcmp.eq.f32.partialorder %v892_v13, %v385_v53 }
 0x721   : > { %v387_v54 = vsel %vm386_vm0, 1e+30, %v377_v48 }
 0x722   : > { %v388_v55 = vsel %vm317_vm2, %v387_v54, inf }
 0x723   : > { %389 = vmin.xlane.f32.xlu0 %v388_v55 }
 0x796   : > { %v390_v62 = vpop.xlane.xlu0 %389 }
 0x797   : > { %vm391_vm10 = vcmp.le.f32.partialorder %v387_v54, %v390_v62  ;;  %v418_v63 = vsel %vm407_vm8, %v417_v61, %v390_v62 }
 0x798   : > { %v392_v0 = vsel %vm391_vm10, %v892_v13, 64.0  ;;  %419 = vst.msk [vmem:[%s249_s19] sm:$0xff] %vm410_vm9, %v418_v63 }
 0x799   : > { %v393_v1 = vsel %vm317_vm2, %v392_v0, inf }
 0x79a   : > { %706 = shalt.err (!%p703_p7)
}
 0x79b   : > { %607 = dma.vmem_to_hbm [thread:$0]  (%p851_p3), %s447_s14, 128, %s449_s18, %s429_s27   ;;  %394 = vmin.xlane.f32.xlu1 %v393_v1  ;;  %v397_v2 = vsel %vm396_vm3, %v899_v17, %v909_v23 }
 0x79c   : > { %v399_v3 = vsel %vm398_vm4, %v397_v2, %v916_v29  ;;  %s272_s11 = scalar_lea.vmem %s1027_s3, %s591_s24 }
 0x79d   : > { %v400_v4 = vsel %vm277_vm1, %v399_v3, %v923_v35 }
 0x79e   : > { %v402_v5 = vsel %vm401_vm5, %v400_v4, %v930_v41 }
 0x79f   : > { %v404_v6 = vsel %vm403_vm6, %v402_v5, %v937_v47 }
 0x7a0   : > { %v406_v7 = vsel %vm405_vm7, %v404_v6, %v385_v53 }
 0x80e   : > { %v395_v8 = vpop.xlane.xlu1 %394 }
 0x80f   : > { %v408_v9 = vsel %vm407_vm8, %v406_v7, %v395_v8 }
 0x810   : > { %vm602_vm2 = vcmp.lt.s32.totalorder %v408_v9, 0  ;;  %v603_v10 = vceil.f32 %v408_v9  ;;  %v604_v11 = vfloor.f32 %v408_v9 }
 0x812   : > { %v605_v12 = vsel %vm602_vm2, %v603_v10, %v604_v11 }
 0x813   : > { %v606_v13 = vcvt.f32.s32 %v605_v12 }
 0x815   : > { %411 = vst.msk [vmem:[%s272_s11] sm:$0xff] %vm410_vm9, %v606_v13 }
 0x816 PF: > { %p613_p3 = scmp.ge.s32.totalorder %s773_s22, 2  ;;  %s471_s12 = sand.u32 1, %s745_s15  }
 0x817   : > { %s472_s13 = scalar_lea.sflag [#allocation3], %s471_s12 }
 0x818   : > { %p610_p9 = pnand %p613_p3, %p860_p8 }
 0x81a   : > { %p611_p10 = pneg %p610_p9 }
 0x81c   : > { %740 = dma.done.wait (%p611_p10), %s472_s13, 128  }
 0x81d   : > { %742 = vsyncadd (%p611_p10), %s472_s13, 4294967168  ;;  %s18_s22 = sadd.s32 1, %s773_s22   ;;  %s1035_s23 = sld [smem:[#allocation5_spill]] }
 0x81e   : > { %p15_p11 = scmp.ge.s32.totalorder %s18_s22, 6   ;;  %s1036_s24 = sld [smem:[#allocation6_spill]] }
 0x81f   : > { %s1037_s15 = smov %s749_s16  ;;  %s1038_s16 = smov %s753_s17 }
 0x820   : > { %s1039_s17 = smov %s869_s7  ;;  %s1040_s18 = smov %s765_s20 }
 0x821   : > { %s1041_s19 = smov %s769_s21  ;;  %17 = sbr.rel (!%p15_p11) target bundleno = 5 (0x5), region = 85 }
 0x823   : > { %s1042_s20 = smov %s1035_s23 }
 0x824   : > { %s1043_s21 = smov %s1036_s24 }
 0x826   :  { %478 = vsyncpa [#allocation3], 1 }
 0x827   :  { %480 = vsyncpa [#allocation3 + $0x1], 1 }

// kernel: assanet_seg_forward.10
= control target key start
LH: loop header
LB: loop body
LE: loop exit
PB: predicated region body
PF: predicated region fallthrough
CT: control target
= control target key end

     0   :  { %s374_s12 = smov 0   ;;  %s415_s0 = inlined_call_operand.vmem [shape: f32[128,4], index: 0, kind: input, shape index: {}]   ;;  %s416_s1 = inlined_call_operand.vmem [shape: bf16[4,16], index: 1, kind: input, shape index: {}]   ;;  %s417_s2 = inlined_call_operand.vmem [shape: f32[1,16], index: 2, kind: input, shape index: {}]   ;;  %s418_s3 = inlined_call_operand.vmem [shape: bf16[128,16], index: 3, kind: output, shape index: {}]  }
   0x1 LB: > { %s319_s13 = sadd.s32 4294967295, %s352_s12   ;;  %p323_p0 = scmp.ge.s32.totalorder %s352_s12, 1  ;;  %s352_s12 = sphi %s374_s12, %s13_s12  }
   0x2   : > { %p138_p1 = scmp.lt.s32.totalorder %s352_s12, 3 }
   0x4   : > { %p139_p2 = pnand %p323_p0, %p138_p1 }
   0x5   : > { %s324_s16 = sshll.u32 (!%p139_p2), %s319_s13, 3 }
   0x6   : > { %142 = sbr.rel (%p139_p2) target bundleno = 166 (0xa6), region = 32  ;;  %p163_p3 = scmp.lt.s32.totalorder (!%p139_p2), %s324_s16, 15 }
   0xb   : > { %v187_v0 = vld [vmem:[%s416_s1] sm:$0x3]  ;;  %vm205_vm0 = vcmask 1041408   ;;  %s420_s16 = smov (!%p163_p3, %s324_s16), 15  ;;  %vm192_vm1 = vcmask 31744   ;;  %vm254_vm2 = vcmask 125952  }
   0xc   : > { %v207_v1 = vsel %vm205_vm0, %v187_v0, 0  ;;  %s325_s17 = sshll.u32 %s420_s16, 3  ;;  %v345_v14 = vld [vmem:[%s417_s2] ss:$0 sm:$0xff]  ;;  %s327_s23 = sshll.u32 %s420_s16, 2 }
   0xd   : > { %216 = vmatpush.bf16.msra.mxu0 %v207_v1  ;;  %334 = vmatpush.bf16.msra.mxu1 %v207_v1  ;;  %s166_s20 = scalar_lea.vmem %s415_s0, %s325_s17  ;;  %s394_s26 = scalar_lea.vmem %s418_s3, %s327_s23 }
   0xe   : > { %335 = vmatpush.bf16.msra.mxu2 %v207_v1  ;;  %336 = vmatpush.bf16.msra.mxu3 %v207_v1  ;;  %v175_v2 = vld [vmem:[%s166_s20] sm:$0xff]  ;;  %v176_v3 = vld [vmem:[%s166_s20 + $0x8] sm:$0xff]  ;;  %v177_v4 = vld [vmem:[%s166_s20 + $0x10] sm:$0xff] }
   0xf   : > { %v183_v5 = vpack.c.bf16 %v176_v3, %v175_v2  ;;  %v178_v6 = vld [vmem:[%s166_s20 + $0x18] sm:$0xff]  ;;  %v179_v7 = vld [vmem:[%s166_s20 + $0x20] sm:$0xff]  ;;  %v180_v8 = vld [vmem:[%s166_s20 + $0x28] sm:$0xff] }
  0x10   : > { %v184_v9 = vpack.c.bf16 %v178_v6, %v177_v4  ;;  %v185_v10 = vpack.c.bf16 %v180_v8, %v179_v7  ;;  %v181_v11 = vld [vmem:[%s166_s20 + $0x30] sm:$0xff]  ;;  %v182_v12 = vld [vmem:[%s166_s20 + $0x38] sm:$0xff] }
  0x11   : > { %328 = vmatmul.msk.bf16.vlgmr.msra.gmra.mxu0 %vm192_vm1, %v183_v5  ;;  %v186_v13 = vpack.c.bf16 %v182_v12, %v181_v11 }
  0x12   : > { %329 = vmatmul.msk.bf16.vlgmr.msra.gmra.mxu1 %vm192_vm1, %v184_v9  ;;  %330 = vmatmul.msk.bf16.vlgmr.msra.gmra.mxu2 %vm192_vm1, %v185_v10 }
  0x13   : > { %331 = vmatmul.msk.bf16.vlgmr.msra.gmra.mxu3 %vm192_vm1, %v186_v13 }
  0x8e   : > { %v218_v15 = vpop.f32.mrf.mxu0 }
  0x8f   : > { %v219_v16 = vadd.f32 %v345_v14, %v218_v15  ;;  %v223_v17 = vpop.f32.mrf.mxu1 }
  0x90   : > { %v224_v18 = vadd.f32 %v345_v14, %v223_v17 }
  0x91   : > { %v238_v19 = vmax.f32 %v219_v16, 0.0 }
  0x92   : > { %v240_v20 = vmax.f32 %v224_v18, 0.0 }
  0x93   : > { %v246_v21 = vpack.c.bf16 %v238_v19, %v238_v19 }
  0x94   : > { %v248_v22 = vpack.c.bf16 %v240_v20, %v240_v20 }
  0x95   : > { %255 = vst.msk [vmem:[%s394_s26] sm:$0xf] %vm254_vm2, %v246_v21  ;;  %v228_v23 = vpop.f32.mrf.mxu2 }
  0x96   : > { %257 = vst.msk [vmem:[%s394_s26 + $0x8] sm:$0xf] %vm254_vm2, %v248_v22  ;;  %v229_v24 = vadd.f32 %v345_v14, %v228_v23  ;;  %v233_v25 = vpop.f32.mrf.mxu3  ;;  %v220_v26 = vpop.f32.mrf.mxu0 }
  0x97   : > { %v234_v27 = vadd.f32 %v345_v14, %v233_v25  ;;  %v221_v28 = vadd.f32 %v345_v14, %v220_v26  ;;  %v225_v29 = vpop.f32.mrf.mxu1 }
  0x98   : > { %v242_v30 = vmax.f32 %v229_v24, 0.0  ;;  %v226_v31 = vadd.f32 %v345_v14, %v225_v29 }
  0x99   : > { %v244_v32 = vmax.f32 %v234_v27, 0.0  ;;  %v239_v33 = vmax.f32 %v221_v28, 0.0 }
  0x9a   : > { %v250_v34 = vpack.c.bf16 %v242_v30, %v242_v30  ;;  %v241_v35 = vmax.f32 %v226_v31, 0.0 }
  0x9b   : > { %v252_v36 = vpack.c.bf16 %v244_v32, %v244_v32  ;;  %v247_v37 = vpack.c.bf16 %v239_v33, %v239_v33 }
  0x9c   : > { %259 = vst.msk [vmem:[%s394_s26 + $0x10] sm:$0xf] %vm254_vm2, %v250_v34  ;;  %v249_v38 = vpack.c.bf16 %v241_v35, %v241_v35 }
  0x9d   : > { %261 = vst.msk [vmem:[%s394_s26 + $0x18] sm:$0xf] %vm254_vm2, %v252_v36  ;;  %v230_v39 = vpop.f32.mrf.mxu2 }
  0x9e   : > { %256 = vst.msk [vmem:[%s394_s26 + $0x4] sm:$0xf] %vm254_vm2, %v247_v37  ;;  %v231_v40 = vadd.f32 %v345_v14, %v230_v39  ;;  %v235_v41 = vpop.f32.mrf.mxu3 }
  0x9f   : > { %258 = vst.msk [vmem:[%s394_s26 + $0xc] sm:$0xf] %vm254_vm2, %v249_v38  ;;  %v236_v42 = vadd.f32 %v345_v14, %v235_v41 }
  0xa0   : > { %v243_v43 = vmax.f32 %v231_v40, 0.0 }
  0xa1   : > { %v245_v44 = vmax.f32 %v236_v42, 0.0 }
  0xa2   : > { %v251_v45 = vpack.c.bf16 %v243_v43, %v243_v43 }
  0xa3   : > { %v253_v46 = vpack.c.bf16 %v245_v44, %v245_v44 }
  0xa4   : > { %260 = vst.msk [vmem:[%s394_s26 + $0x14] sm:$0xf] %vm254_vm2, %v251_v45 }
  0xa5   : > { %262 = vst.msk [vmem:[%s394_s26 + $0x1c] sm:$0xf] %vm254_vm2, %v253_v46 }
  0xa6 PF: > { %s13_s12 = sadd.s32 1, %s352_s12  }
  0xa7   : > { %p10_p4 = scmp.ge.s32.totalorder %s13_s12, 4  }
  0xa9   :  { %12 = sbr.rel (!%p10_p4) target bundleno = 1 (0x1), region = 62 }

// kernel: assanet_seg_forward.12
= control target key start
LH: loop header
LB: loop body
LE: loop exit
PB: predicated region body
PF: predicated region fallthrough
CT: control target
= control target key end

     0   :  { %s1027_s24 = smov 0   ;;  %s1163_s0 = inlined_call_operand.vmem [shape: bf16[256,16], index: 0, kind: input, shape index: {}]   ;;  %s1164_s1 = inlined_call_operand.vmem [shape: f32[256,3], index: 1, kind: input, shape index: {}]   ;;  %s1165_s2 = inlined_call_operand.vmem [shape: bf16[16,32], index: 2, kind: input, shape index: {}]   ;;  %s1166_s3 = inlined_call_operand.vmem [shape: bf16[3,32], index: 3, kind: input, shape index: {}]   ;;  %s1167_s4 = inlined_call_operand.vmem [shape: f32[1,32], index: 4, kind: input, shape index: {}]   ;;  %s1168_s5 = inlined_call_operand.vmem [shape: bf16[32,32], index: 5, kind: input, shape index: {}]   ;;  %s1169_s6 = inlined_call_operand.vmem [shape: f32[1,32], index: 6, kind: input, shape index: {}]   ;;  %s1170_s7 = inlined_call_operand.vmem [shape: bf16[32,32], index: 7, kind: output, shape index: {}]  }
   0x1 LB: > { %s880_s25 = sadd.s32 4294967295, %s984_s24   ;;  %p884_p0 = scmp.ge.s32.totalorder %s984_s24, 1  ;;  %s984_s24 = sphi %s1027_s24, %s17_s24  }
   0x2   : > { %p249_p1 = scmp.lt.s32.totalorder %s984_s24, 3 }
   0x4   : > { %p250_p2 = pnand %p884_p0, %p249_p1 }
   0x5   : > { %s885_s30 = sshll.u32 (!%p250_p2), %s880_s25, 4  ;;  %s889_s22 = sshll.u32 (!%p250_p2), %s880_s25, 1 }
   0x6   : > { %253 = sbr.rel (%p250_p2) target bundleno = 396 (0x18c), region = 48  ;;  %p287_p3 = scmp.lt.s32.totalorder (!%p250_p2), %s885_s30, 31 }
   0x7   : > { %p299_p4 = scmp.lt.s32.totalorder (!%p250_p2), %s889_s22, 3 }
   0xb   : > { %v347_v0 = vld [vmem:[%s1166_s3] sm:$0x3]  ;;  %vm373_vm0 = vcmask 1040384   ;;  %vm374_vm1 = vcmask 1041408   ;;  %v986_v2 = vmov 65535   ;;  %s1172_s30 = smov (!%p287_p3, %s885_s30), 31 }
   0xc   : > { %v962_v1 = vld [vmem:[%s1165_s2] sm:$0xff]  ;;  %v375_v3 = vsel %vm373_vm0, 4294967295, %v986_v2  ;;  %s888_s8 = sshll.u32 %s1172_s30, 3  ;;  %s886_s9 = sshll.u32 %s1172_s30, 2  ;;  %vm475_vm2 = vcmask 130048   ;;  %vm348_vm3 = vcmask 23552  }
   0xd   : > { %v376_v4 = vsel %vm374_vm1, %v375_v3, 0  ;;  %507 = vmatpush.bf16.msra.mxu1 %v962_v1  ;;  %966 = vmatpush.bf16.msra.mxu2 %v962_v1  ;;  %s1046_s12 = scalar_lea.vmem %s1164_s1, %s888_s8  ;;  %s1051_s15 = scalar_lea.vmem %s1163_s0, %s886_s9  ;;  %v1096_v39 = vld [vmem:[%s1167_s4] ss:$0 sm:$0xff]  ;;  %vm585_vm4 = vcmask 261120   ;;  %vm754_vm5 = vcmask 1041409   ;;  %vm756_vm6 = vcmask 1042434  }
   0xe   : > { %v378_v5 = vand.u32 %v376_v4, %v347_v0  ;;  %v321_v6 = vld [vmem:[%s1046_s12] sm:$0xff]  ;;  %v322_v7 = vld [vmem:[%s1046_s12 + $0x8] sm:$0xff]  ;;  %v331_v10 = vld [vmem:[%s1046_s12 + $0x50] sm:$0xff]  ;;  %vm758_vm7 = vcmask 1043459   ;;  %vm760_vm8 = vcmask 1044484   ;;  %vm762_vm9 = vcmask 1045509  }
   0xf   : > { %v954_v8 = vld [vmem:[%s1051_s15] sm:$0xff]  ;;  %v337_v9 = vpack.c.bf16 %v322_v7, %v321_v6  ;;  %v332_v11 = vld [vmem:[%s1046_s12 + $0x58] sm:$0xff]  ;;  %v959_v12 = vld [vmem:[%s1051_s15 + $0x28] sm:$0xff]  ;;  %vm764_vm10 = vcmask 1046534   ;;  %vm766_vm11 = vcmask 1047559   ;;  %s1174_s22 = smov (!%p299_p4, %s889_s22), 3 }
  0x10   : > { %387 = vmatpush.bf16.msra.mxu0 %v378_v5  ;;  %965 = vmatpush.bf16.msra.mxu3 %v378_v5  ;;  %v342_v13 = vpack.c.bf16 %v332_v11, %v331_v10  ;;  %v323_v14 = vld [vmem:[%s1046_s12 + $0x10] sm:$0xff]  ;;  %v324_v15 = vld [vmem:[%s1046_s12 + $0x18] sm:$0xff]  ;;  %v955_v16 = vld [vmem:[%s1051_s15 + $0x8] sm:$0xff]  ;;  %s890_s27 = sshll.u32 %s1174_s22, 2  ;;  %vm809_vm12 = vcmask 257024  }
  0x11   : > { %935 = vmatmul.msk.bf16.vlgmr.msra.gmra.mxu1 %vm475_vm2, %v954_v8  ;;  %940 = vmatmul.msk.bf16.vlgmr.msra.gmra.mxu2 %vm475_vm2, %v959_v12  ;;  %v333_v17 = vld [vmem:[%s1046_s12 + $0x60] sm:$0xff]  ;;  %v334_v18 = vld [vmem:[%s1046_s12 + $0x68] sm:$0xff]  ;;  %v338_v19 = vpack.c.bf16 %v324_v15, %v323_v14  ;;  %v960_v20 = vld [vmem:[%s1051_s15 + $0x30] sm:$0xff]  ;;  %s302_s30 = scalar_lea.vmem %s1170_s7, %s890_s27 }
  0x12   : > { %v343_v21 = vpack.c.bf16 %v334_v18, %v333_v17  ;;  %v325_v22 = vld [vmem:[%s1046_s12 + $0x20] sm:$0xff]  ;;  %v326_v23 = vld [vmem:[%s1046_s12 + $0x28] sm:$0xff]  ;;  %v956_v24 = vld [vmem:[%s1051_s15 + $0x10] sm:$0xff] }
  0x13   : > { %891 = vmatmul.msk.bf16.vlgmr.msra.gmra.mxu0 %vm348_vm3, %v337_v9  ;;  %896 = vmatmul.msk.bf16.vlgmr.msra.gmra.mxu3 %vm348_vm3, %v342_v13  ;;  %v335_v25 = vld [vmem:[%s1046_s12 + $0x70] sm:$0xff]  ;;  %v336_v26 = vld [vmem:[%s1046_s12 + $0x78] sm:$0xff]  ;;  %v339_v27 = vpack.c.bf16 %v326_v23, %v325_v22  ;;  %v329_v34 = vld [vmem:[%s1046_s12 + $0x40] sm:$0xff] }
  0x14   : > { %v961_v28 = vld [vmem:[%s1051_s15 + $0x38] sm:$0xff]  ;;  %v344_v29 = vpack.c.bf16 %v336_v26, %v335_v25  ;;  %v327_v30 = vld [vmem:[%s1046_s12 + $0x30] sm:$0xff]  ;;  %v330_v35 = vld [vmem:[%s1046_s12 + $0x48] sm:$0xff] }
  0x15   : > { %v328_v31 = vld [vmem:[%s1046_s12 + $0x38] sm:$0xff]  ;;  %v958_v36 = vld [vmem:[%s1051_s15 + $0x20] sm:$0xff]  ;;  %v341_v37 = vpack.c.bf16 %v330_v35, %v329_v34  ;;  %v964_v22 = vld [vmem:[%s1168_s5 + $0x8] sm:$0xff] }
  0x16   : > { %v957_v32 = vld [vmem:[%s1051_s15 + $0x18] sm:$0xff]  ;;  %v340_v33 = vpack.c.bf16 %v328_v31, %v327_v30  ;;  %797 = vmatpush.bf16.msrb.mxu2 %v964_v22 }
  0x21   : > { %936 = vmatmul.msk.bf16.gmra.mxu1 %vm475_vm2, %v955_v16  ;;  %941 = vmatmul.msk.bf16.gmra.mxu2 %vm475_vm2, %v960_v20 }
  0x23   : > { %892 = vmatmul.msk.bf16.gmra.mxu0 %vm348_vm3, %v338_v19  ;;  %897 = vmatmul.msk.bf16.gmra.mxu3 %vm348_vm3, %v343_v21 }
  0x31   : > { %937 = vmatmul.msk.bf16.gmra.mxu1 %vm475_vm2, %v956_v24  ;;  %942 = vmatmul.msk.bf16.gmra.mxu2 %vm475_vm2, %v961_v28 }
  0x33   : > { %893 = vmatmul.msk.bf16.gmra.mxu0 %vm348_vm3, %v339_v27  ;;  %898 = vmatmul.msk.bf16.gmra.mxu3 %vm348_vm3, %v344_v29 }
  0x41   : > { %938 = vmatmul.msk.bf16.gmra.mxu1 %vm475_vm2, %v957_v32 }
  0x43   : > { %894 = vmatmul.msk.bf16.gmra.mxu0 %vm348_vm3, %v340_v33 }
  0x51   : > { %939 = vmatmul.msk.bf16.gmra.mxu1 %vm475_vm2, %v958_v36 }
  0x53   : > { %895 = vmatmul.msk.bf16.gmra.mxu0 %vm348_vm3, %v341_v37 }
  0x8e   : > { %v509_v38 = vpop.f32.mrf.mxu1 }
  0x90   : > { %v389_v40 = vpop.f32.mrf.mxu0 }
  0x91   : > { %v510_v41 = vadd.f32 %v509_v38, %v389_v40 }
  0x93   : > { %v553_v42 = vadd.f32 %v1096_v39, %v510_v41 }
  0x94   : > { %v534_v46 = vpop.f32.mrf.mxu2 }
  0x95   : > { %v569_v43 = vmax.f32 %v553_v42, 0.0 }
  0x96   : > { %v511_v45 = vpop.f32.mrf.mxu1  ;;  %v414_v49 = vpop.f32.mrf.mxu3 }
  0x97   : > { %v586_v44 = vsel %vm585_vm4, %v569_v43, -inf  ;;  %v535_v23 = vadd.f32 %v534_v46, %v414_v49 }
  0x98   : > { %v587_v47 = vrot.slane %v586_v44, 4  ;;  %v391_v48 = vpop.f32.mrf.mxu0 }
  0x99   : > { %v512_v50 = vadd.f32 %v511_v45, %v391_v48  ;;  %v563_v28 = vadd.f32 %v1096_v39, %v535_v23 }
  0x9a   : > { %v588_v51 = vmax.f32 %v586_v44, %v587_v47 }
  0x9b   : > { %v554_v52 = vadd.f32 %v1096_v39, %v512_v50  ;;  %v579_v38 = vmax.f32 %v563_v28, 0.0 }
  0x9c   : > { %v589_v53 = vrot.slane %v588_v51, 2  ;;  %v536_v58 = vpop.f32.mrf.mxu2 }
  0x9d   : > { %v570_v54 = vmax.f32 %v554_v52, 0.0 }
  0x9e   : > { %v590_v55 = vmax.f32 %v588_v51, %v589_v53  ;;  %v514_v57 = vpop.f32.mrf.mxu1  ;;  %v416_v61 = vpop.f32.mrf.mxu3  ;;  %v656_v53 = vsel %vm585_vm4, %v579_v38, -inf }
  0x9f   : > { %v593_v56 = vsel %vm585_vm4, %v570_v54, -inf  ;;  %v537_v29 = vadd.f32 %v536_v58, %v416_v61 }
  0xa0   : > { %v594_v59 = vrot.slane %v593_v56, 4  ;;  %v394_v60 = vpop.f32.mrf.mxu0  ;;  %v591_v62 = vrot.slane %v590_v55, 1 }
  0xa1   : > { %v515_v26 = vadd.f32 %v514_v57, %v394_v60  ;;  %v564_v40 = vadd.f32 %v1096_v39, %v537_v29 }
  0xa2   : > { %v595_v63 = vmax.f32 %v593_v56, %v594_v59  ;;  %v592_v1 = vmax.f32 %v590_v55, %v591_v62 }
  0xa3   : > { %v555_v32 = vadd.f32 %v1096_v39, %v515_v26  ;;  %v580_v54 = vmax.f32 %v564_v40, 0.0 }
  0xa4   : > { %v596_v0 = vrot.slane %v595_v63, 2  ;;  %v539_v4 = vpop.f32.mrf.mxu2  ;;  %v698_v8 = vpack.c.bf16 %v592_v1, %v592_v1 }
  0xa5   : > { %v571_v47 = vmax.f32 %v555_v32, 0.0 }
  0xa6   : > { %v597_v2 = vmax.f32 %v595_v63, %v596_v0  ;;  %v516_v3 = vpop.f32.mrf.mxu1  ;;  %v419_v7 = vpop.f32.mrf.mxu3  ;;  %v738_v11 = vunpack.c.l.b16 %v698_v8  ;;  %v657_v0 = vrot.slane %v656_v53, 4 }
  0xa7   : > { %v540_v31 = vadd.f32 %v539_v4, %v419_v7  ;;  %v600_v60 = vsel %vm585_vm4, %v571_v47, -inf }
  0xa8   : > { %v598_v5 = vrot.slane %v597_v2, 1  ;;  %v396_v6 = vpop.f32.mrf.mxu0 }
  0xa9   : > { %v517_v27 = vadd.f32 %v516_v3, %v396_v6  ;;  %v565_v44 = vadd.f32 %v1096_v39, %v540_v31  ;;  %v601_v6 = vrot.slane %v600_v60, 4 }
  0xaa   : > { %v599_v9 = vmax.f32 %v597_v2, %v598_v5  ;;  %v663_v2 = vsel %vm585_vm4, %v580_v54, -inf }
  0xab   : > { %v556_v34 = vadd.f32 %v1096_v39, %v517_v27  ;;  %v581_v58 = vmax.f32 %v565_v44, 0.0 }
  0xac   : > { %v699_v10 = vpack.c.bf16 %v599_v9, %v599_v9  ;;  %v541_v17 = vpop.f32.mrf.mxu2 }
  0xad   : > { %v572_v51 = vmax.f32 %v556_v34, 0.0  ;;  %v670_v8 = vsel %vm585_vm4, %v581_v58, -inf }
  0xae   : > { %v739_v12 = vunpack.c.l.b16 %v699_v10  ;;  %v519_v13 = vpop.f32.mrf.mxu1  ;;  %v421_v16 = vpop.f32.mrf.mxu3  ;;  %v671_v26 = vrot.slane %v670_v8, 4 }
  0xaf   : > { %v542_v41 = vadd.f32 %v541_v17, %v421_v16  ;;  %v607_v63 = vsel %vm585_vm4, %v572_v51, -inf  ;;  %v963_v16 = vld [vmem:[%s1168_s5] sm:$0xff]  ;;  %v658_v17 = vmax.f32 %v656_v53, %v657_v0 }
  0xb0   : > { %v1103_v14 = vsel %vm754_vm5, %v739_v12, %v738_v11  ;;  %v399_v15 = vpop.f32.mrf.mxu0  ;;  %v608_v11 = vrot.slane %v607_v63, 4  ;;  %798 = vmatpush.bf16.msrb.mxu2 %v963_v16  ;;  %v672_v47 = vmax.f32 %v670_v8, %v671_v26 }
  0xb1   : > { %v520_v30 = vadd.f32 %v519_v13, %v399_v15  ;;  %v566_v55 = vadd.f32 %v1096_v39, %v542_v41  ;;  %v659_v32 = vrot.slane %v658_v17, 2 }
  0xb2   : > { %v609_v28 = vmax.f32 %v607_v63, %v608_v11  ;;  %v673_v63 = vrot.slane %v672_v47, 2 }
  0xb3   : > { %v557_v43 = vadd.f32 %v1096_v39, %v520_v30  ;;  %v582_v3 = vmax.f32 %v566_v55, 0.0 }
  0xb4   : > { %v544_v21 = vpop.f32.mrf.mxu2 }
  0xb5   : > { %v573_v57 = vmax.f32 %v557_v43, 0.0 }
  0xb6   : > { %v521_v18 = vpop.f32.mrf.mxu1  ;;  %v424_v20 = vpop.f32.mrf.mxu3 }
  0xb7   : > { %v545_v46 = vadd.f32 %v544_v21, %v424_v20  ;;  %v614_v7 = vsel %vm585_vm4, %v573_v57, -inf  ;;  %v677_v21 = vsel %vm585_vm4, %v582_v3, -inf }
  0xb8   : > { %v401_v19 = vpop.f32.mrf.mxu0  ;;  %v615_v20 = vrot.slane %v614_v7, 4 }
  0xb9   : > { %v522_v33 = vadd.f32 %v521_v18, %v401_v19  ;;  %v567_v59 = vadd.f32 %v1096_v39, %v545_v46  ;;  %v664_v18 = vrot.slane %v663_v2, 4  ;;  %v610_v46 = vrot.slane %v609_v28, 2 }
  0xbb   : > { %v558_v48 = vadd.f32 %v1096_v39, %v522_v33  ;;  %v583_v9 = vmax.f32 %v567_v59, 0.0  ;;  %v678_v33 = vrot.slane %v677_v21, 4 }
  0xbc   : > { %v546_v37 = vpop.f32.mrf.mxu2 }
  0xbd   : > { %v574_v61 = vmax.f32 %v558_v48, 0.0  ;;  %v684_v27 = vsel %vm585_vm4, %v583_v9, -inf  ;;  %v679_v51 = vmax.f32 %v677_v21, %v678_v33 }
  0xbe   : > { %v524_v24 = vpop.f32.mrf.mxu1  ;;  %v426_v36 = vpop.f32.mrf.mxu3 }
  0xbf   : > { %v547_v50 = vadd.f32 %v546_v37, %v426_v36  ;;  %v621_v12 = vsel %vm585_vm4, %v574_v61, -inf  ;;  %v665_v36 = vmax.f32 %v663_v2, %v664_v18  ;;  %v685_v37 = vrot.slane %v684_v27, 4 }
  0xc0   : > { %v404_v25 = vpop.f32.mrf.mxu0  ;;  %v680_v2 = vrot.slane %v679_v51, 2 }
  0xc1   : > { %v525_v35 = vadd.f32 %v524_v24, %v404_v25  ;;  %v568_v62 = vadd.f32 %v1096_v39, %v547_v50  ;;  %v602_v24 = vmax.f32 %v600_v60, %v601_v6  ;;  %v622_v25 = vrot.slane %v621_v12, 4 }
  0xc2   : > { %v660_v50 = vmax.f32 %v658_v17, %v659_v32  ;;  %v666_v55 = vrot.slane %v665_v36, 2  ;;  %v681_v17 = vmax.f32 %v679_v51, %v680_v2 }
  0xc3   : > { %v559_v52 = vadd.f32 %v1096_v39, %v525_v35  ;;  %v584_v15 = vmax.f32 %v568_v62, 0.0  ;;  %v616_v35 = vmax.f32 %v614_v7, %v615_v20  ;;  %v603_v41 = vrot.slane %v602_v24, 2 }
  0xc4   : > { %v611_v62 = vmax.f32 %v609_v28, %v610_v46  ;;  %v667_v6 = vmax.f32 %v665_v36, %v666_v55  ;;  %v661_v9 = vrot.slane %v660_v50, 1  ;;  %v682_v32 = vrot.slane %v681_v17, 1 }
  0xc5   : > { %v575_v1 = vmax.f32 %v559_v52, 0.0  ;;  %v691_v31 = vsel %vm585_vm4, %v584_v15, -inf  ;;  %v617_v54 = vrot.slane %v616_v35, 2  ;;  %v604_v58 = vmax.f32 %v602_v24, %v603_v41 }
  0xc6   : > { %v526_v42 = vpop.f32.mrf.mxu1  ;;  %v692_v44 = vrot.slane %v691_v31, 4  ;;  %v674_v15 = vmax.f32 %v672_v47, %v673_v63  ;;  %v662_v24 = vmax.f32 %v660_v50, %v661_v9 }
  0xc7   : > { %v628_v19 = vsel %vm585_vm4, %v575_v1, -inf }
  0xc8   : > { %v406_v45 = vpop.f32.mrf.mxu0  ;;  %v629_v29 = vrot.slane %v628_v19, 4  ;;  %v693_v61 = vmax.f32 %v691_v31, %v692_v44 }
  0xc9   : > { %v527_v49 = vadd.f32 %v526_v42, %v406_v45  ;;  %v623_v42 = vmax.f32 %v621_v12, %v622_v25  ;;  %v605_v12 = vrot.slane %v604_v58, 1 }
  0xca   : > { %v630_v48 = vmax.f32 %v628_v19, %v629_v29  ;;  %v694_v11 = vrot.slane %v693_v61, 2 }
  0xcb   : > { %v560_v56 = vadd.f32 %v1096_v39, %v527_v49  ;;  %v624_v59 = vrot.slane %v623_v42, 2  ;;  %v606_v28 = vmax.f32 %v604_v58, %v605_v12 }
  0xcc   : > { %v631_v0 = vrot.slane %v630_v48, 2  ;;  %v695_v26 = vmax.f32 %v693_v61, %v694_v11 }
  0xcd   : > { %v576_v4 = vmax.f32 %v560_v56, 0.0  ;;  %v686_v56 = vmax.f32 %v684_v27, %v685_v37  ;;  %v700_v44 = vpack.c.bf16 %v606_v28, %v606_v28 }
  0xce   : > { %v529_v5 = vpop.f32.mrf.mxu1  ;;  %v632_v16 = vmax.f32 %v630_v48, %v631_v0  ;;  %v683_v48 = vmax.f32 %v681_v17, %v682_v32 }
  0xcf   : > { %v635_v22 = vsel %vm585_vm4, %v576_v4, -inf  ;;  %v687_v7 = vrot.slane %v686_v56, 2 }
  0xd0   : > { %v409_v10 = vpop.f32.mrf.mxu0  ;;  %v636_v34 = vrot.slane %v635_v22, 4  ;;  %v633_v31 = vrot.slane %v632_v16, 1  ;;  %v711_v63 = vpack.c.bf16 %v683_v48, %v683_v48 }
  0xd1   : > { %v530_v13 = vadd.f32 %v529_v5, %v409_v10  ;;  %v618_v5 = vmax.f32 %v616_v35, %v617_v54  ;;  %v625_v10 = vmax.f32 %v623_v42, %v624_v59  ;;  %v696_v42 = vrot.slane %v695_v26, 1 }
  0xd2   : > { %v637_v52 = vmax.f32 %v635_v22, %v636_v34  ;;  %v668_v22 = vrot.slane %v667_v6, 1  ;;  %v634_v47 = vmax.f32 %v632_v16, %v633_v31  ;;  %v740_v59 = vunpack.c.l.b16 %v700_v44 }
  0xd3   : > { %v561_v23 = vadd.f32 %v1096_v39, %v530_v13  ;;  %v612_v13 = vrot.slane %v611_v62, 1  ;;  %v619_v21 = vrot.slane %v618_v5, 1  ;;  %v626_v25 = vrot.slane %v625_v10, 1 }
  0xd4   : > { %v638_v3 = vrot.slane %v637_v52, 2  ;;  %v669_v37 = vmax.f32 %v667_v6, %v668_v22  ;;  %v757_v9 = vsel %vm756_vm6, %v740_v59, %v1103_v14 }
  0xd5   : > { %v577_v30 = vmax.f32 %v561_v23, 0.0  ;;  %v688_v23 = vmax.f32 %v686_v56, %v687_v7  ;;  %v613_v29 = vmax.f32 %v611_v62, %v612_v13  ;;  %v620_v36 = vmax.f32 %v618_v5, %v619_v21 }
  0xd6   : > { %v531_v40 = vpop.f32.mrf.mxu1  ;;  %v639_v18 = vmax.f32 %v637_v52, %v638_v3  ;;  %v627_v41 = vmax.f32 %v625_v10, %v626_v25  ;;  %v704_v62 = vpack.c.bf16 %v634_v47, %v634_v47  ;;  %v751_v13 = vunpack.c.l.b16 %v711_v63 }
  0xd7   : > { %v642_v38 = vsel %vm585_vm4, %v577_v30, -inf  ;;  %v675_v30 = vrot.slane %v674_v15, 1  ;;  %v702_v52 = vpack.c.bf16 %v620_v36, %v620_v36 }
  0xd8   : > { %v643_v43 = vrot.slane %v642_v38, 4  ;;  %v411_v45 = vpop.f32.mrf.mxu0  ;;  %v640_v33 = vrot.slane %v639_v18, 1  ;;  %v703_v56 = vpack.c.bf16 %v627_v41, %v627_v41  ;;  %v744_v11 = vunpack.c.l.b16 %v704_v62 }
  0xd9   : > { %v532_v49 = vadd.f32 %v531_v40, %v411_v45  ;;  %v708_v40 = vpack.c.bf16 %v662_v24, %v662_v24  ;;  %v701_v45 = vpack.c.bf16 %v613_v29, %v613_v29  ;;  %v676_v46 = vmax.f32 %v674_v15, %v675_v30 }
  0xda   : > { %v644_v53 = vmax.f32 %v642_v38, %v643_v43  ;;  %v689_v38 = vrot.slane %v688_v23, 1  ;;  %v742_v3 = vunpack.c.l.b16 %v702_v52  ;;  %v743_v6 = vunpack.c.l.b16 %v703_v56 }
  0xdb   : > { %v562_v57 = vadd.f32 %v1096_v39, %v532_v49  ;;  %v641_v49 = vmax.f32 %v639_v18, %v640_v33  ;;  %v748_v55 = vunpack.c.l.b16 %v708_v40  ;;  %v710_v61 = vpack.c.bf16 %v676_v46, %v676_v46 }
  0xdc   : > { %v645_v60 = vrot.slane %v644_v53, 2  ;;  %v690_v54 = vmax.f32 %v688_v23, %v689_v38 }
  0xdd   : > { %v578_v1 = vmax.f32 %v562_v57, 0.0  ;;  %v697_v57 = vmax.f32 %v695_v26, %v696_v42  ;;  %v705_v0 = vpack.c.bf16 %v641_v49, %v641_v49  ;;  %v750_v10 = vunpack.c.l.b16 %v710_v61 }
  0xde   : > { %v646_v4 = vmax.f32 %v644_v53, %v645_v60  ;;  %v709_v53 = vpack.c.bf16 %v669_v37, %v669_v37  ;;  %v741_v60 = vunpack.c.l.b16 %v701_v45  ;;  %v712_v5 = vpack.c.bf16 %v690_v54, %v690_v54 }
  0xdf   : > { %v649_v8 = vsel %vm585_vm4, %v578_v1, -inf  ;;  %v713_v7 = vpack.c.bf16 %v697_v57, %v697_v57  ;;  %v745_v15 = vunpack.c.l.b16 %v705_v0 }
  0xe0   : > { %v650_v39 = vrot.slane %v649_v8, 4  ;;  %v647_v19 = vrot.slane %v646_v4, 1  ;;  %v759_v12 = vsel %vm758_vm7, %v741_v60, %v757_v9  ;;  %v752_v17 = vunpack.c.l.b16 %v712_v5 }
  0xe1   : > { %v761_v18 = vsel %vm760_vm8, %v742_v3, %v759_v12 }
  0xe2   : > { %v651_v20 = vmax.f32 %v649_v8, %v650_v39  ;;  %v648_v34 = vmax.f32 %v646_v4, %v647_v19  ;;  %v749_v4 = vunpack.c.l.b16 %v709_v53  ;;  %v763_v14 = vsel %vm762_vm9, %v743_v6, %v761_v18 }
  0xe3   : > { %v765_v22 = vsel %vm764_vm10, %v744_v11, %v763_v14 }
  0xe4   : > { %v652_v27 = vrot.slane %v651_v20, 2  ;;  %v706_v50 = vpack.c.bf16 %v648_v34, %v648_v34  ;;  %v767_v24 = vsel %vm766_vm11, %v745_v15, %v765_v22 }
  0xe6   : > { %v653_v35 = vmax.f32 %v651_v20, %v652_v27  ;;  %v746_v1 = vunpack.c.l.b16 %v706_v50  ;;  %v753_v20 = vunpack.c.l.b16 %v713_v7  ;;  %v977_v27 = vld [vmem:[%s1169_s6] ss:$0 sm:$0xff] }
  0xe8   : > { %v654_v43 = vrot.slane %v653_v35, 1 }
  0xea   : > { %v655_v51 = vmax.f32 %v653_v35, %v654_v43 }
  0xec   : > { %v707_v58 = vpack.c.bf16 %v655_v51, %v655_v51 }
  0xee   : > { %v747_v2 = vunpack.c.l.b16 %v707_v58 }
  0xf0   : > { %v768_v8 = vsel %vm754_vm5, %v747_v2, %v746_v1 }
  0xf1   : > { %v769_v39 = vsel %vm756_vm6, %v748_v55, %v768_v8 }
  0xf2   : > { %v770_v16 = vsel %vm758_vm7, %v749_v4, %v769_v39 }
  0xf3   : > { %v771_v19 = vsel %vm760_vm8, %v750_v10, %v770_v16 }
  0xf4   : > { %v772_v21 = vsel %vm762_vm9, %v751_v13, %v771_v19 }
  0xf5   : > { %v773_v23 = vsel %vm764_vm10, %v752_v17, %v772_v21 }
  0xf6   : > { %v774_v25 = vsel %vm766_vm11, %v753_v20, %v773_v23 }
  0xf7   : > { %v775_v26 = vpack.c.b16 %v774_v25, %v767_v24 }
  0xf9   : > { %951 = vmatmul.msk.bf16.vlgmr.msrb.gmra.mxu2 %vm585_vm4, %v775_v26 }
 0x17c   : > { %v800_v28 = vpop.f32.mrf.mxu2 }
 0x17d   : > { %v801_v29 = vadd.f32 %v977_v27, %v800_v28 }
 0x17f   : > { %v805_v30 = vmax.f32 %v801_v29, 0.0 }
 0x181   : > { %v807_v31 = vpack.c.bf16 %v805_v30, %v805_v30 }
 0x183   : > { %810 = vst.msk [vmem:[%s302_s30] sm:$0xf] %vm809_vm12, %v807_v31 }
 0x184   : > { %v802_v32 = vpop.f32.mrf.mxu2 }
 0x185   : > { %v803_v33 = vadd.f32 %v977_v27, %v802_v32 }
 0x187   : > { %v806_v34 = vmax.f32 %v803_v33, 0.0 }
 0x189   : > { %v808_v35 = vpack.c.bf16 %v806_v34, %v806_v34 }
 0x18b   : > { %811 = vst.msk [vmem:[%s302_s30 + $0x4] sm:$0xf] %vm809_vm12, %v808_v35 }
 0x18c PF: > { %s17_s24 = sadd.s32 1, %s984_s24  }
 0x18d   : > { %p14_p5 = scmp.ge.s32.totalorder %s17_s24, 4  }
 0x18f   :  { %16 = sbr.rel (!%p14_p5) target bundleno = 1 (0x1), region = 81 }

// kernel: assanet_seg_forward.13
= control target key start
LH: loop header
LB: loop body
LE: loop exit
PB: predicated region body
PF: predicated region fallthrough
CT: control target
= control target key end

     0   :  { %10 = vsyncpa [#allocation3], 0  ;;  %s943_s0 = inlined_call_operand.vmem [shape: f32[2,4,3], index: 0, kind: input, shape index: {}]   ;;  %s944_s1 = inlined_call_operand.vmem [shape: f32[2,3,16], index: 1, kind: input, shape index: {}]   ;;  %s945_s2 = inlined_call_operand.vmem [shape: f32[2,1,16], index: 2, kind: input, shape index: {}]   ;;  %s946_s3 = inlined_call_operand.vmem [shape: s32[2,4,8], index: 3, kind: output, shape index: {0}]   ;;  %s947_s4 = inlined_call_operand.hbm [shape: f32[2,4,8], index: 4, kind: output, shape index: {1}]  }
   0x1   :  { %12 = vsyncpa [#allocation3 + $0x1], 0  ;;  %s747_s15 = smov 0   ;;  %s749_s16 = smov 0  }
   0x2   :  { %s751_s17 = smov 0   ;;  %s753_s18 = smov 0  }
   0x3   :  { %s755_s19 = smov 0   ;;  %s757_s20 = smov 0  }
   0x4 LB: > { %s566_s21 = sadd.s32 4294967295, %s720_s20   ;;  %s567_s22 = sadd.s32 4294967294, %s720_s20   ;;  %s720_s20 = sphi %s757_s20, %s18_s20   ;;  %s716_s19 = sphi %s755_s19, %s954_s19   ;;  %s712_s18 = sphi %s753_s18, %s953_s18   ;;  %s708_s17 = sphi %s751_s17, %s952_s17   ;;  %s704_s16 = sphi %s749_s16, %s951_s16   ;;  %s700_s15 = sphi %s747_s15, %s950_s15  }
   0x5   : > { %s30_s23 = sadd.s32 1, %s716_s19  ;;  %s147_s24 = sadd.s32 1, %s708_s17 }
   0x6   : > { %p32_p0 = scmp.ge.s32.totalorder %s30_s23, 2  ;;  %p157_p1 = scmp.ne.s32.totalorder %s708_s17, %s704_s16 }
   0x7   : > { %p158_p2 = scmp.eq.s32.totalorder %s566_s21, 1  ;;  %p163_p3 = scmp.ne.s32.totalorder %s704_s16, %s700_s15 }
   0x8   : > { %s956_s23 = smov (%p32_p0, %s30_s23), 0  ;;  %p164_p5 = scmp.eq.s32.totalorder %s567_s22, 1 }
   0x9   : > { %p787_p4 = por %p158_p2, %p157_p1  ;;  %s142_s26 = ssub.s32 %s716_s19, %s956_s23 }
   0xa   : > { %p570_p6 = scmp.ge.s32.totalorder %s720_s20, 1  ;;  %p145_p7 = scmp.eq.s32.totalorder %s142_s26, 0 }
   0xb   : > { %p794_p8 = por %p164_p5, %p163_p3  ;;  %p205_p9 = scmp.lt.s32.totalorder %s720_s20, 3 }
   0xc   : > { %s800_s28 = scalar_select %p145_p7, %s708_s17, %s147_s24  }
   0xd   : > { %p206_p10 = pnand %p570_p6, %p205_p9 }
   0xe   : > { %p247_p11 = scmp.lt.s32.totalorder (!%p206_p10), %s712_s18, 1  ;;  %s244_s14 = sand.u32 (!%p206_p10), 1, %s704_s16  }
   0xf   : > { %209 = sbr.rel (%p206_p10) target bundleno = 2066 (0x812), region = 32  ;;  %s571_s21 = sshll.u32 (!%p206_p10), %s244_s14, 2 }
  0x10   : > { %s578_s22 = sshll.u32 (!%p206_p10), %s712_s18, 2  ;;  %s246_s5 = scalar_lea.vmem (!%p206_p10), [#allocation2], %s571_s21 }
  0x11   : > { %s883_s6 = sshll.u32 (!%p206_p10), %s246_s5, 4  ;;  %s662_s12 = scalar_lea.hbm (!%p206_p10), %s947_s4, 8  ;;  %s441_s6 = int_to_ptr.vmem [resolvable:$true] %s883_s6 }
  0x14   : > { %s248_s29 = scalar_select %p247_p11, %s712_s18, 1  ;;  %vm284_vm0 = vcmask 1042432   ;;  %vm280_vm1 = vcmask 23552   ;;  %vm272_vm2 = vcmask 19456   ;;  %vm313_vm3 = vcmask 125952  }
  0x15   : > { %v310_v11 = vlaneseq }
  0x16   : > { %s804_s30 = sshll.u32 %s248_s29, 2  ;;  %s260_s7 = scalar_lea.vmem %s945_s2, %s248_s29 }
  0x17   : > { %s257_s10 = scalar_lea.vmem %s944_s1, %s804_s30  ;;  %s253_s13 = scalar_lea.vmem %s943_s0, %s804_s30  ;;  %v641_v4 = vld [vmem:[%s260_s7] ss:$0 sm:$0xff]  ;;  %v311_v12 = vand.u32 127, %v310_v11 }
  0x18   : > { %v269_v0 = vld [vmem:[%s257_s10] sm:$0x7]  ;;  %s438_s29 = scalar_lea.hbm %s947_s4, %s578_s22  ;;  %s424_s7 = scalar_lea.sflag [#allocation3], %s244_s14 }
  0x19   : > { %575 = vmatpush.msk.msra.mxu0 %vm284_vm0, %v269_v0  ;;  %v268_v1 = vld [vmem:[%s253_s13] sm:$0xf]  ;;  %v819_v13 = vcvt.s32.f32 %v311_v12  ;;  %s442_s18 = sshll.u32 %s438_s29, 4  ;;  %s443_s18 = int_to_ptr.hbm [resolvable:$true] %s442_s18 }
  0x1a   : > { %576 = vmatmul.msk.f32.vlgmr.msra.gmra.mxu0 %vm280_vm1, %v268_v1  ;;  %v271_v2 = vmul.f32 %v268_v1, %v268_v1  ;;  %s656_s8 = sshra.s32 %s443_s18, 4  ;;  %s657_s8 = int_to_ptr.hbm [resolvable:$true] %s656_s8 }
  0x1b   : > { %s658_s9 = scalar_lea.hbm %s657_s8, 4  ;;  %p663_p1 = scmp.lt.s32.totalorder %s657_s8, %s947_s4 }
  0x1c   : > { %v273_v3 = vsel %vm272_vm2, %v271_v2, 0.0  ;;  %p659_p12 = scmp.ne.s32.totalorder %s657_s8, %s658_s9  ;;  %p664_p2 = scmp.lt.s32.totalorder %s662_s12, %s658_s9 }
  0x1d   : > { %274 = vadd.xlane.f32.xlu0 %v273_v3 }
  0x1e   : > { %p660_p13 = pnand %p659_p12, %p787_p4  ;;  %p665_p3 = por %p664_p2, %p663_p1 }
  0x20   : > { %p661_p0 = pneg %p660_p13 }
  0x22   : > { %p666_p5 = pnand %p665_p3, %p661_p0 }
  0x90   : > { %v275_v5 = vpop.xlane.xlu0 %274 }
  0x91   : > { %v279_v6 = vadd.f32 %v641_v4, %v275_v5 }
  0x97   : > { %v305_v7 = vpop.f32.mrf.mxu0 }
  0x98   : > { %v308_v8 = vmul.f32 2.0, %v305_v7 }
  0x9a   : > { %v309_v9 = vsub.f32 %v279_v6, %v308_v8 }
  0x9c   : > { %v314_v10 = vsel %vm313_vm3, %v309_v9, inf }
  0x9d   : > { %315 = vmin.xlane.f32.xlu0 %v314_v10 }
 0x110   : > { %v821_v14 = vpop.xlane.xlu0 %315 }
 0x111   : > { %vm317_vm4 = vcmp.le.f32.partialorder %v309_v9, %v821_v14 }
 0x112   : > { %v318_v15 = vsel %vm317_vm4, %v819_v13, 16.0  ;;  %vm392_vm4 = vcmask 7168  }
 0x113   : > { %v319_v16 = vsel %vm313_vm3, %v318_v15, inf }
 0x114   : > { %320 = vmin.xlane.f32.xlu1 %v319_v16 }
 0x187   : > { %v826_v17 = vpop.xlane.xlu1 %320 }
 0x188   : > { %vm322_vm5 = vcmp.eq.f32.partialorder %v819_v13, %v826_v17 }
 0x189   : > { %v323_v18 = vsel %vm322_vm5, 1e+30, %v309_v9  ;;  %vm394_vm5 = vcmask 15360  }
 0x18a   : > { %v324_v19 = vsel %vm313_vm3, %v323_v18, inf }
 0x18b   : > { %325 = vmin.xlane.f32.xlu1 %v324_v19 }
 0x1fe   : > { %v831_v20 = vpop.xlane.xlu1 %325 }
 0x1ff   : > { %vm327_vm6 = vcmp.le.f32.partialorder %v323_v18, %v831_v20  ;;  %v408_v56 = vsel %vm392_vm4, %v821_v14, %v831_v20 }
 0x200   : > { %v328_v21 = vsel %vm327_vm6, %v819_v13, 16.0  ;;  %vm397_vm6 = vcmask 31744  }
 0x201   : > { %v329_v22 = vsel %vm313_vm3, %v328_v21, inf }
 0x202   : > { %330 = vmin.xlane.f32.xlu2 %v329_v22 }
 0x275   : > { %v836_v23 = vpop.xlane.xlu2 %330 }
 0x276   : > { %vm332_vm7 = vcmp.eq.f32.partialorder %v819_v13, %v836_v23 }
 0x277   : > { %v333_v24 = vsel %vm332_vm7, 1e+30, %v323_v18  ;;  %vm399_vm7 = vcmask 39936  }
 0x278   : > { %v334_v25 = vsel %vm313_vm3, %v333_v24, inf }
 0x279   : > { %335 = vmin.xlane.f32.xlu2 %v334_v25 }
 0x2ec   : > { %v336_v26 = vpop.xlane.xlu2 %335 }
 0x2ed   : > { %vm337_vm8 = vcmp.le.f32.partialorder %v333_v24, %v336_v26  ;;  %v409_v57 = vsel %vm394_vm5, %v408_v56, %v336_v26 }
 0x2ee   : > { %v338_v27 = vsel %vm337_vm8, %v819_v13, 16.0  ;;  %vm401_vm8 = vcmask 48128  }
 0x2ef   : > { %v339_v28 = vsel %vm313_vm3, %v338_v27, inf }
 0x2f0   : > { %340 = vmin.xlane.f32.xlu0 %v339_v28 }
 0x363   : > { %v843_v29 = vpop.xlane.xlu0 %340 }
 0x364   : > { %vm342_vm9 = vcmp.eq.f32.partialorder %v819_v13, %v843_v29 }
 0x365   : > { %v343_v30 = vsel %vm342_vm9, 1e+30, %v333_v24  ;;  %vm403_vm9 = vcmask 56320  }
 0x366   : > { %v344_v31 = vsel %vm313_vm3, %v343_v30, inf }
 0x367   : > { %345 = vmin.xlane.f32.xlu1 %v344_v31 }
 0x3da   : > { %v346_v32 = vpop.xlane.xlu1 %345 }
 0x3db   : > { %vm347_vm10 = vcmp.le.f32.partialorder %v343_v30, %v346_v32  ;;  %v410_v58 = vsel %vm280_vm1, %v409_v57, %v346_v32 }
 0x3dc   : > { %v348_v33 = vsel %vm347_vm10, %v819_v13, 16.0  ;;  %vm406_vm10 = vcmask 60416  }
 0x3dd   : > { %v349_v34 = vsel %vm313_vm3, %v348_v33, inf }
 0x3de   : > { %350 = vmin.xlane.f32.xlu2 %v349_v34 }
 0x451   : > { %v850_v35 = vpop.xlane.xlu2 %350 }
 0x452   : > { %vm352_vm11 = vcmp.eq.f32.partialorder %v819_v13, %v850_v35 }
 0x453   : > { %v353_v36 = vsel %vm352_vm11, 1e+30, %v343_v30 }
 0x454   : > { %v354_v37 = vsel %vm313_vm3, %v353_v36, inf }
 0x455   : > { %355 = vmin.xlane.f32.xlu0 %v354_v37 }
 0x4c8   : > { %v356_v38 = vpop.xlane.xlu0 %355 }
 0x4c9   : > { %vm357_vm12 = vcmp.le.f32.partialorder %v353_v36, %v356_v38  ;;  %v411_v59 = vsel %vm397_vm6, %v410_v58, %v356_v38 }
 0x4ca   : > { %v358_v39 = vsel %vm357_vm12, %v819_v13, 16.0 }
 0x4cb   : > { %v359_v40 = vsel %vm313_vm3, %v358_v39, inf }
 0x4cc   : > { %360 = vmin.xlane.f32.xlu1 %v359_v40 }
 0x53f   : > { %v857_v41 = vpop.xlane.xlu1 %360 }
 0x540   : > { %vm362_vm13 = vcmp.eq.f32.partialorder %v819_v13, %v857_v41 }
 0x541   : > { %v363_v42 = vsel %vm362_vm13, 1e+30, %v353_v36 }
 0x542   : > { %v364_v43 = vsel %vm313_vm3, %v363_v42, inf }
 0x543   : > { %365 = vmin.xlane.f32.xlu2 %v364_v43 }
 0x5b6   : > { %v366_v44 = vpop.xlane.xlu2 %365 }
 0x5b7   : > { %vm367_vm14 = vcmp.le.f32.partialorder %v363_v42, %v366_v44  ;;  %v412_v60 = vsel %vm399_vm7, %v411_v59, %v366_v44 }
 0x5b8   : > { %v368_v45 = vsel %vm367_vm14, %v819_v13, 16.0 }
 0x5b9   : > { %v369_v46 = vsel %vm313_vm3, %v368_v45, inf }
 0x5ba   : > { %370 = vmin.xlane.f32.xlu0 %v369_v46 }
 0x62d   : > { %v864_v47 = vpop.xlane.xlu0 %370 }
 0x62e   : > { %vm372_vm15 = vcmp.eq.f32.partialorder %v819_v13, %v864_v47 }
 0x62f   : > { %v373_v48 = vsel %vm372_vm15, 1e+30, %v363_v42 }
 0x630   : > { %v374_v49 = vsel %vm313_vm3, %v373_v48, inf }
 0x631   : > { %375 = vmin.xlane.f32.xlu1 %v374_v49 }
 0x6a4   : > { %v376_v50 = vpop.xlane.xlu1 %375 }
 0x6a5   : > { %vm377_vm0 = vcmp.le.f32.partialorder %v373_v48, %v376_v50  ;;  %v413_v61 = vsel %vm401_vm8, %v412_v60, %v376_v50 }
 0x6a6   : > { %v378_v51 = vsel %vm377_vm0, %v819_v13, 16.0 }
 0x6a7   : > { %v379_v52 = vsel %vm313_vm3, %v378_v51, inf }
 0x6a8   : > { %380 = vmin.xlane.f32.xlu2 %v379_v52 }
 0x71b   : > { %v381_v53 = vpop.xlane.xlu2 %380 }
 0x71c   : > { %vm382_vm2 = vcmp.eq.f32.partialorder %v819_v13, %v381_v53 }
 0x71d   : > { %v383_v54 = vsel %vm382_vm2, 1e+30, %v373_v48 }
 0x71e   : > { %v384_v55 = vsel %vm313_vm3, %v383_v54, inf }
 0x71f   : > { %385 = vmin.xlane.f32.xlu0 %v384_v55 }
 0x792   : > { %v386_v62 = vpop.xlane.xlu0 %385 }
 0x793   : > { %vm387_vm11 = vcmp.le.f32.partialorder %v383_v54, %v386_v62  ;;  %v414_v63 = vsel %vm403_vm9, %v413_v61, %v386_v62 }
 0x794   : > { %v388_v0 = vsel %vm387_vm11, %v819_v13, 16.0  ;;  %415 = vst.msk [vmem:[%s246_s5] sm:$0xf] %vm406_vm10, %v414_v63 }
 0x795   : > { %v389_v1 = vsel %vm313_vm3, %v388_v0, inf }
 0x796   : > { %669 = shalt.err (!%p666_p5)
}
 0x797   : > { %586 = dma.vmem_to_hbm [thread:$0]  (%p787_p4), %s441_s6, 64, %s443_s18, %s424_s7   ;;  %390 = vmin.xlane.f32.xlu1 %v389_v1  ;;  %v393_v2 = vsel %vm392_vm4, %v826_v17, %v836_v23 }
 0x798   : > { %v395_v3 = vsel %vm394_vm5, %v393_v2, %v843_v29  ;;  %s267_s22 = scalar_lea.vmem %s946_s3, %s804_s30 }
 0x799   : > { %v396_v4 = vsel %vm280_vm1, %v395_v3, %v850_v35 }
 0x79a   : > { %v398_v5 = vsel %vm397_vm6, %v396_v4, %v857_v41 }
 0x79b   : > { %v400_v6 = vsel %vm399_vm7, %v398_v5, %v864_v47 }
 0x79c   : > { %v402_v7 = vsel %vm401_vm8, %v400_v6, %v381_v53 }
 0x80a   : > { %v391_v8 = vpop.xlane.xlu1 %390 }
 0x80b   : > { %v404_v9 = vsel %vm403_vm9, %v402_v7, %v391_v8 }
 0x80c   : > { %vm581_vm3 = vcmp.lt.s32.totalorder %v404_v9, 0  ;;  %v582_v10 = vceil.f32 %v404_v9  ;;  %v583_v11 = vfloor.f32 %v404_v9 }
 0x80e   : > { %v584_v12 = vsel %vm581_vm3, %v582_v10, %v583_v11 }
 0x80f   : > { %v585_v13 = vcvt.f32.s32 %v584_v12 }
 0x811   : > { %407 = vst.msk [vmem:[%s267_s22] sm:$0xf] %vm406_vm10, %v585_v13 }
 0x812 PF: > { %p592_p4 = scmp.ge.s32.totalorder %s720_s20, 2  ;;  %s464_s24 = sand.u32 1, %s700_s15  }
 0x813   : > { %s465_s26 = scalar_lea.sflag [#allocation3], %s464_s24 }
 0x814   : > { %p589_p6 = pnand %p592_p4, %p794_p8 }
 0x816   : > { %p590_p7 = pneg %p589_p6 }
 0x818   : > { %695 = dma.done.wait (%p590_p7), %s465_s26, 64  }
 0x819   : > { %697 = vsyncadd (%p590_p7), %s465_s26, 4294967232  ;;  %s18_s20 = sadd.s32 1, %s720_s20   ;;  %s950_s15 = smov %s704_s16 }
 0x81a   : > { %p15_p9 = scmp.ge.s32.totalorder %s18_s20, 4   ;;  %s951_s16 = smov %s708_s17 }
 0x81b   : > { %s952_s17 = smov %s800_s28  ;;  %s953_s18 = smov %s716_s19 }
 0x81c   : > { %s954_s19 = smov %s956_s23  ;;  %17 = sbr.rel (!%p15_p9) target bundleno = 4 (0x4), region = 85 }
 0x821   :  { %471 = vsyncpa [#allocation3], 1 }
 0x822   :  { %473 = vsyncpa [#allocation3 + $0x1], 1 }

// kernel: assanet_seg_forward.14
= control target key start
LH: loop header
LB: loop body
LE: loop exit
PB: predicated region body
PF: predicated region fallthrough
CT: control target
= control target key end

     0   :  { %vm65_vm0 = vcmask 1040384   ;;  %vm66_vm1 = vcmask 1041408   ;;  %v416_v2 = vmov 65535   ;;  %vm52_vm2 = vcmask 23552   ;;  %s553_s2 = inlined_call_operand.vmem [shape: bf16[32,64], index: 2, kind: input, shape index: {}]   ;;  %s554_s3 = inlined_call_operand.vmem [shape: bf16[3,64], index: 3, kind: input, shape index: {}]   ;;  %s555_s1 = inlined_call_operand.vmem [shape: f32[64,3], index: 1, kind: input, shape index: {}]   ;;  %s556_s0 = inlined_call_operand.vmem [shape: bf16[64,32], index: 0, kind: input, shape index: {}]   ;;  %s557_s4 = inlined_call_operand.vmem [shape: f32[1,64], index: 4, kind: input, shape index: {}]   ;;  %s558_s6 = inlined_call_operand.vmem [shape: f32[1,64], index: 6, kind: input, shape index: {}]   ;;  %s559_s5 = inlined_call_operand.vmem [shape: bf16[64,64], index: 5, kind: input, shape index: {}]   ;;  %s560_s7 = inlined_call_operand.vmem [shape: bf16[8,64], index: 7, kind: output, shape index: {}]  }
   0x1   :  { %v405_v0 = vld [vmem:[%s553_s2 + $0x8] sm:$0xff]  ;;  %v51_v1 = vld [vmem:[%s554_s3] sm:$0x3]  ;;  %v67_v3 = vsel %vm65_vm0, 4294967295, %v416_v2  ;;  %v41_v7 = vld [vmem:[%s555_s1 + $0x30] sm:$0xff]  ;;  %vm133_vm3 = vcmask 261120  }
   0x2   :  { %v35_v4 = vld [vmem:[%s555_s1] sm:$0xff]  ;;  %v68_v5 = vsel %vm66_vm1, %v67_v3, 0  ;;  %v36_v6 = vld [vmem:[%s555_s1 + $0x8] sm:$0xff]  ;;  %v42_v8 = vld [vmem:[%s555_s1 + $0x38] sm:$0xff]  ;;  %411 = vmatpush.bf16.msra.mxu3 %v405_v0  ;;  %vm195_vm4 = vcmask 523264   ;;  %vm288_vm5 = vcmask 1041409  }
   0x3   :  { %v70_v9 = vand.u32 %v68_v5, %v51_v1  ;;  %v404_v10 = vld [vmem:[%s553_s2] sm:$0xff]  ;;  %v43_v11 = vpack.c.bf16 %v36_v6, %v35_v4  ;;  %v46_v12 = vpack.c.bf16 %v42_v8, %v41_v7  ;;  %v401_v13 = vld [vmem:[%s556_s0 + $0x8] sm:$0xff]  ;;  %v37_v14 = vld [vmem:[%s555_s1 + $0x10] sm:$0xff]  ;;  %vm290_vm6 = vcmask 1042434  }
   0x4   :  { %v38_v15 = vld [vmem:[%s555_s1 + $0x18] sm:$0xff]  ;;  %v400_v17 = vld [vmem:[%s556_s0] sm:$0xff]  ;;  %v402_v18 = vld [vmem:[%s556_s0 + $0x10] sm:$0xff]  ;;  %vm292_vm7 = vcmask 1043459   ;;  %vm294_vm8 = vcmask 1044484   ;;  %vm296_vm9 = vcmask 1045509  }
   0x5   :  { %79 = vmatpush.bf16.msra.mxu0 %v70_v9  ;;  %410 = vmatpush.bf16.msra.mxu1 %v70_v9  ;;  %v44_v16 = vpack.c.bf16 %v38_v15, %v37_v14  ;;  %v39_v19 = vld [vmem:[%s555_s1 + $0x20] sm:$0xff]  ;;  %v40_v20 = vld [vmem:[%s555_s1 + $0x28] sm:$0xff]  ;;  %v403_v22 = vld [vmem:[%s556_s0 + $0x18] sm:$0xff]  ;;  %vm298_vm10 = vcmask 1046534   ;;  %vm300_vm11 = vcmask 1047559   ;;  %vm345_vm12 = vcmask 519168  }
   0x6   :  { %412 = vmatpush.bf16.msra.mxu3 %v404_v10  ;;  %v45_v21 = vpack.c.bf16 %v40_v20, %v39_v19  ;;  %v515_v29 = vld [vmem:[%s557_s4] ss:$0 sm:$0xff]  ;;  %v409_v45 = vld [vmem:[%s559_s5 + $0x18] sm:$0xff]  ;;  %v408_v52 = vld [vmem:[%s559_s5 + $0x10] sm:$0xff] }
   0x7   :  { %334 = vmatpush.bf16.msra.mxu2 %v409_v45  ;;  %v407_v57 = vld [vmem:[%s559_s5 + $0x8] sm:$0xff]  ;;  %v406_v2 = vld [vmem:[%s559_s5] sm:$0xff] }
   0x8   :  { %351 = vmatmul.msk.bf16.vlgmr.msra.gmra.mxu0 %vm52_vm2, %v43_v11  ;;  %354 = vmatmul.msk.bf16.vlgmr.msra.gmra.mxu1 %vm52_vm2, %v46_v12 }
   0x9   :  { %152 = vmatpush.bf16.msrb.mxu1 %v405_v0  ;;  %380 = vmatmul.msk.bf16.vlgmr.msra.gmra.mxu3 %vm133_vm3, %v401_v13 }
   0xb   :  { %335 = vmatpush.bf16.msra.mxu2 %v408_v52 }
   0xd   :  { %153 = vmatpush.bf16.msrb.mxu1 %v404_v10 }
   0xf   :  { %336 = vmatpush.bf16.msra.mxu2 %v407_v57 }
  0x13   :  { %337 = vmatpush.bf16.msra.mxu2 %v406_v2 }
  0x18   :  { %352 = vmatmul.msk.bf16.gmra.mxu0 %vm52_vm2, %v44_v16  ;;  %379 = vmatmul.msk.bf16.vlgmr.msrb.gmra.mxu1 %vm133_vm3, %v400_v17 }
  0x19   :  { %381 = vmatmul.msk.bf16.gmra.mxu3 %vm133_vm3, %v402_v18 }
  0x28   :  { %353 = vmatmul.msk.bf16.gmra.mxu0 %vm52_vm2, %v45_v21 }
  0x29   :  { %382 = vmatmul.msk.bf16.gmra.mxu3 %vm133_vm3, %v403_v22 }
  0x85   :  { %v81_v23 = vpop.f32.mrf.mxu0  ;;  %v96_v24 = vpop.f32.mrf.mxu1 }
  0x8c   :  { %v160_v27 = vpop.f32.mrf.mxu3 }
  0x8d   :  { %v83_v25 = vpop.f32.mrf.mxu0  ;;  %v510_v26 = vpop.f32.mrf.mxu1 }
  0x94   :  { %v162_v32 = vpop.f32.mrf.mxu3 }
  0x95   :  { %v86_v28 = vpop.f32.mrf.mxu0  ;;  %v155_v30 = vpop.f32.mrf.mxu1 }
  0x96   :  { %v156_v31 = vadd.f32 %v155_v30, %v81_v23  ;;  %v161_v33 = vadd.f32 %v160_v27, %v86_v28 }
  0x98   :  { %v179_v34 = vadd.f32 %v515_v29, %v156_v31  ;;  %v181_v35 = vadd.f32 %v515_v29, %v161_v33 }
  0x9a   :  { %v187_v36 = vmax.f32 %v179_v34, 0.0  ;;  %v189_v42 = vmax.f32 %v181_v35, 0.0 }
  0x9c   :  { %v165_v41 = vpop.f32.mrf.mxu3  ;;  %v196_v46 = vsel %vm195_vm4, %v187_v36, -inf  ;;  %v210_v49 = vsel %vm195_vm4, %v189_v42, -inf }
  0x9d   :  { %v88_v37 = vpop.f32.mrf.mxu0  ;;  %v157_v38 = vpop.f32.mrf.mxu1  ;;  %v197_v50 = vrot.slane %v196_v46, 4  ;;  %v211_v58 = vrot.slane %v210_v49, 4 }
  0x9e   :  { %v163_v39 = vadd.f32 %v162_v32, %v88_v37  ;;  %v158_v40 = vadd.f32 %v157_v38, %v83_v25 }
  0x9f   :  { %v198_v61 = vmax.f32 %v196_v46, %v197_v50  ;;  %v212_v3 = vmax.f32 %v210_v49, %v211_v58 }
  0xa0   :  { %v182_v43 = vadd.f32 %v515_v29, %v163_v39  ;;  %v180_v44 = vadd.f32 %v515_v29, %v158_v40 }
  0xa1   :  { %v199_v4 = vrot.slane %v198_v61, 2  ;;  %v213_v12 = vrot.slane %v212_v3, 2 }
  0xa2   :  { %v188_v47 = vmax.f32 %v180_v44, 0.0  ;;  %v190_v48 = vmax.f32 %v182_v43, 0.0 }
  0xa3   :  { %v200_v15 = vmax.f32 %v198_v61, %v199_v4  ;;  %v214_v22 = vmax.f32 %v212_v3, %v213_v12 }
  0xa4   :  { %v203_v51 = vsel %vm195_vm4, %v188_v47, -inf  ;;  %v167_v56 = vpop.f32.mrf.mxu3  ;;  %v217_v59 = vsel %vm195_vm4, %v190_v48, -inf }
  0xa5   :  { %v204_v53 = vrot.slane %v203_v51, 4  ;;  %v91_v54 = vpop.f32.mrf.mxu0  ;;  %v218_v63 = vrot.slane %v217_v59, 4  ;;  %v201_v25 = vrot.slane %v200_v15, 1  ;;  %v215_v35 = vrot.slane %v214_v22, 1 }
  0xa6   :  { %v166_v55 = vadd.f32 %v165_v41, %v91_v54 }
  0xa7   :  { %v205_v60 = vmax.f32 %v203_v51, %v204_v53  ;;  %v219_v8 = vmax.f32 %v217_v59, %v218_v63  ;;  %v202_v38 = vmax.f32 %v200_v15, %v201_v25  ;;  %v216_v46 = vmax.f32 %v214_v22, %v215_v35 }
  0xa8   :  { %v183_v62 = vadd.f32 %v515_v29, %v166_v55 }
  0xa9   :  { %v206_v0 = vrot.slane %v205_v60, 2  ;;  %v220_v19 = vrot.slane %v219_v8, 2  ;;  %v252_v49 = vpack.c.bf16 %v202_v38, %v202_v38  ;;  %v254_v57 = vpack.c.bf16 %v216_v46, %v216_v46 }
  0xaa   :  { %v191_v1 = vmax.f32 %v183_v62, 0.0 }
  0xab   :  { %v207_v9 = vmax.f32 %v205_v60, %v206_v0  ;;  %v221_v32 = vmax.f32 %v219_v8, %v220_v19  ;;  %v282_v2 = vunpack.c.l.b16 %v254_v57 }
  0xac   :  { %v224_v5 = vsel %vm195_vm4, %v191_v1, -inf  ;;  %v170_v11 = vpop.f32.mrf.mxu3 }
  0xad   :  { %v225_v6 = vrot.slane %v224_v5, 4  ;;  %v93_v7 = vpop.f32.mrf.mxu0  ;;  %v171_v14 = vadd.f32 %v170_v11, %v96_v24  ;;  %v208_v20 = vrot.slane %v207_v9, 1  ;;  %v222_v43 = vrot.slane %v221_v32, 1 }
  0xae   :  { %v168_v10 = vadd.f32 %v167_v56, %v93_v7 }
  0xaf   :  { %v226_v13 = vmax.f32 %v224_v5, %v225_v6  ;;  %v185_v18 = vadd.f32 %v515_v29, %v171_v14  ;;  %v209_v24 = vmax.f32 %v207_v9, %v208_v20  ;;  %v223_v54 = vmax.f32 %v221_v32, %v222_v43  ;;  %v415_v20 = vld [vmem:[%s558_s6] ss:$0 sm:$0xff] }
  0xb0   :  { %v184_v16 = vadd.f32 %v515_v29, %v168_v10 }
  0xb1   :  { %v227_v17 = vrot.slane %v226_v13, 2  ;;  %v193_v23 = vmax.f32 %v185_v18, 0.0  ;;  %v253_v44 = vpack.c.bf16 %v209_v24, %v209_v24  ;;  %v255_v62 = vpack.c.bf16 %v223_v54, %v223_v54 }
  0xb2   :  { %v192_v21 = vmax.f32 %v184_v16, 0.0 }
  0xb3   :  { %v228_v28 = vmax.f32 %v226_v13, %v227_v17  ;;  %v238_v31 = vsel %vm195_vm4, %v193_v23, -inf  ;;  %v283_v7 = vunpack.c.l.b16 %v255_v62 }
  0xb4   :  { %v231_v27 = vsel %vm195_vm4, %v192_v21, -inf  ;;  %v239_v33 = vrot.slane %v238_v31, 4  ;;  %v172_v34 = vpop.f32.mrf.mxu3 }
  0xb5   :  { %v232_v30 = vrot.slane %v231_v27, 4  ;;  %v173_v37 = vadd.f32 %v172_v34, %v510_v26  ;;  %v229_v40 = vrot.slane %v228_v28, 1  ;;  %v281_v26 = vunpack.c.l.b16 %v253_v44 }
  0xb6   :  { %v240_v39 = vmax.f32 %v238_v31, %v239_v33 }
  0xb7   :  { %v233_v36 = vmax.f32 %v231_v27, %v232_v30  ;;  %v186_v42 = vadd.f32 %v515_v29, %v173_v37  ;;  %v230_v51 = vmax.f32 %v228_v28, %v229_v40  ;;  %v280_v29 = vunpack.c.l.b16 %v252_v49 }
  0xb8   :  { %v241_v45 = vrot.slane %v240_v39, 2 }
  0xb9   :  { %v234_v41 = vrot.slane %v233_v36, 2  ;;  %v194_v48 = vmax.f32 %v186_v42, 0.0  ;;  %v256_v60 = vpack.c.bf16 %v230_v51, %v230_v51  ;;  %v289_v63 = vsel %vm288_vm5, %v281_v26, %v280_v29 }
  0xba   :  { %v242_v50 = vmax.f32 %v240_v39, %v241_v45  ;;  %v291_v6 = vsel %vm290_vm6, %v282_v2, %v289_v63 }
  0xbb   :  { %v235_v47 = vmax.f32 %v233_v36, %v234_v41  ;;  %v245_v53 = vsel %vm195_vm4, %v194_v48, -inf  ;;  %v284_v4 = vunpack.c.l.b16 %v256_v60  ;;  %v293_v11 = vsel %vm292_vm7, %v283_v7, %v291_v6 }
  0xbc   :  { %v243_v55 = vrot.slane %v242_v50, 1  ;;  %v246_v56 = vrot.slane %v245_v53, 4 }
  0xbd   :  { %v236_v52 = vrot.slane %v235_v47, 1  ;;  %v295_v13 = vsel %vm294_vm8, %v284_v4, %v293_v11 }
  0xbe   :  { %v247_v59 = vmax.f32 %v245_v53, %v246_v56  ;;  %v244_v61 = vmax.f32 %v242_v50, %v243_v55 }
  0xbf   :  { %v237_v58 = vmax.f32 %v235_v47, %v236_v52 }
  0xc0   :  { %v248_v1 = vrot.slane %v247_v59, 2  ;;  %v258_v5 = vpack.c.bf16 %v244_v61, %v244_v61 }
  0xc1   :  { %v257_v0 = vpack.c.bf16 %v237_v58, %v237_v58 }
  0xc2   :  { %v249_v3 = vmax.f32 %v247_v59, %v248_v1  ;;  %v286_v12 = vunpack.c.l.b16 %v258_v5 }
  0xc3   :  { %v285_v8 = vunpack.c.l.b16 %v257_v0 }
  0xc4   :  { %v250_v9 = vrot.slane %v249_v3, 1 }
  0xc5   :  { %v297_v15 = vsel %vm296_vm9, %v285_v8, %v295_v13 }
  0xc6   :  { %v251_v10 = vmax.f32 %v249_v3, %v250_v9  ;;  %v299_v17 = vsel %vm298_vm10, %v286_v12, %v297_v15 }
  0xc8   :  { %v259_v14 = vpack.c.bf16 %v251_v10, %v251_v10 }
  0xca   :  { %v287_v16 = vunpack.c.l.b16 %v259_v14 }
  0xcc   :  { %v301_v18 = vsel %vm300_vm11, %v287_v16, %v299_v17 }
  0xcd   :  { %v302_v19 = vpack.c.b16 %v301_v18, %v301_v18 }
  0xcf   :  { %399 = vmatmul.msk.bf16.vlgmr.msra.gmra.mxu2 %vm195_vm4, %v302_v19 }
 0x152   :  { %v339_v21 = vpop.f32.mrf.mxu2 }
 0x153   :  { %v340_v22 = vadd.f32 %v415_v20, %v339_v21 }
 0x155   :  { %v343_v23 = vmax.f32 %v340_v22, 0.0 }
 0x157   :  { %v344_v25 = vpack.c.bf16 %v343_v23, %v343_v23 }
 0x159   :  { %346 = vst.msk [vmem:[%s560_s7] sm:$0xf] %vm345_vm12, %v344_v25 }
 0x15a   :  { %v341_v27 = vpop.f32.mrf.mxu2 }

// kernel: assanet_seg_forward.15
= control target key start
LH: loop header
LB: loop body
LE: loop exit
PB: predicated region body
PF: predicated region fallthrough
CT: control target
= control target key end

     0   :  { %s644_s15 = smov 0   ;;  %s646_s16 = smov 0   ;;  %s719_s0 = inlined_call_operand.vmem [shape: f32[2,16,3], index: 0, kind: input, shape index: {}]   ;;  %s720_s1 = inlined_call_operand.vmem [shape: f32[2,3,4], index: 1, kind: input, shape index: {}]   ;;  %s721_s2 = inlined_call_operand.vmem [shape: f32[2,1,4], index: 2, kind: input, shape index: {}]   ;;  %s722_s3 = inlined_call_operand.vmem [shape: s32[2,16,3], index: 3, kind: output, shape index: {0}]   ;;  %s723_s4 = inlined_call_operand.vmem [shape: f32[2,16,3], index: 4, kind: output, shape index: {1}]  }
   0x1   :  { %s648_s17 = smov 0   ;;  %s650_s18 = smov 0  }
   0x2   :  { %s652_s19 = smov 0  }
   0x3 LB: > { %s24_s20 = sadd.s32 1, %s609_s17  ;;  %s27_s21 = sadd.s32 1, %s613_s18  ;;  %s617_s19 = sphi %s652_s19, %s15_s19   ;;  %s613_s18 = sphi %s650_s18, %s727_s18   ;;  %s609_s17 = sphi %s648_s17, %s726_s17   ;;  %s605_s16 = sphi %s646_s16, %s725_s16   ;;  %s601_s15 = sphi %s644_s15, %s724_s15  }
   0x4   : > { %p25_p0 = scmp.ge.s32.totalorder %s24_s20, 2  ;;  %p521_p1 = scmp.ge.s32.totalorder %s617_s19, 1 }
   0x5   : > { %p203_p2 = scmp.lt.s32.totalorder %s617_s19, 5 }
   0x6   : > { %s729_s20 = smov (%p25_p0, %s24_s20), 0  ;;  %s731_s21 = smov (!%p25_p0, %s27_s21), %s613_s18 }
   0x7   : > { %p204_p3 = pnand %p521_p1, %p203_p2  ;;  %p29_p4 = scmp.ge.s32.totalorder %s731_s21, 2 }
   0x8   : > { %p250_p5 = scmp.lt.s32.totalorder (!%p204_p3), %s605_s16, 1  ;;  %p252_p6 = scmp.lt.s32.totalorder (!%p204_p3), %s601_s15, 1 }
   0x9   : > { %s733_s21 = smov (%p29_p4, %s731_s21), 0  ;;  %207 = sbr.rel (%p204_p3) target bundleno = 869 (0x365), region = 32 }
   0xe   : > { %s735_s16 = smov (!%p250_p5, %s605_s16), 1  ;;  %s737_s15 = smov (!%p252_p6, %s601_s15), 1  ;;  %vm296_vm0 = vcmask 1042432   ;;  %vm285_vm1 = vcmask 23552   ;;  %vm325_vm2 = vcmask 31744   ;;  %v322_v11 = vlaneseq }
   0xf   : > { %s524_s22 = sshll.u32 %s735_s16, 2  ;;  %s522_s23 = sshll.u32 %s735_s16, 1  ;;  %vm354_vm7 = vcmask 7168   ;;  %vm356_vm8 = vcmask 15360  }
  0x10   : > { %s261_s26 = scalar_lea.vmem %s720_s1, %s524_s22  ;;  %s255_s27 = sadd.s32 %s522_s23, %s737_s15  ;;  %v323_v12 = vand.u32 127, %v322_v11 }
  0x11   : > { %v282_v0 = vld [vmem:[%s261_s26] sm:$0x7]  ;;  %s677_s28 = sshll.u32 %s255_s27, 3  ;;  %s264_s5 = scalar_lea.vmem %s721_s2, %s735_s16 }
  0x12   : > { %529 = vmatpush.msk.msra.mxu0 %vm296_vm0, %v282_v0  ;;  %s257_s8 = scalar_lea.vmem %s719_s0, %s677_s28  ;;  %v578_v4 = vld [vmem:[%s264_s5] ss:$0 sm:$0xff]  ;;  %v324_v13 = vcvt.s32.f32 %v323_v12  ;;  %s280_s11 = scalar_lea.vmem %s723_s4, %s677_s28 }
  0x13   : > { %v281_v1 = vld [vmem:[%s257_s8] sm:$0xff]  ;;  %s272_s14 = scalar_lea.vmem %s722_s3, %s677_s28 }
  0x14   : > { %530 = vmatmul.msk.f32.vlgmr.msra.gmra.mxu0 %vm285_vm1, %v281_v1  ;;  %v284_v2 = vmul.f32 %v281_v1, %v281_v1 }
  0x16   : > { %v286_v3 = vsel %vm285_vm1, %v284_v2, 0.0 }
  0x17   : > { %287 = vadd.xlane.f32.xlu0 %v286_v3 }
  0x8a   : > { %v288_v5 = vpop.xlane.xlu0 %287 }
  0x8b   : > { %v292_v6 = vadd.f32 %v578_v4, %v288_v5 }
  0x91   : > { %v317_v7 = vpop.f32.mrf.mxu0 }
  0x92   : > { %v320_v8 = vmul.f32 2.0, %v317_v7 }
  0x94   : > { %v321_v9 = vsub.f32 %v292_v6, %v320_v8 }
  0x96   : > { %v326_v10 = vsel %vm325_vm2, %v321_v9, inf }
  0x97   : > { %327 = vmin.xlane.f32.xlu0 %v326_v10 }
 0x10a   : > { %v328_v14 = vpop.xlane.xlu0 %327 }
 0x10b   : > { %vm329_vm3 = vcmp.le.f32.partialorder %v321_v9, %v328_v14 }
 0x10c   : > { %v330_v15 = vsel %vm329_vm3, %v324_v13, 4.0 }
 0x10d   : > { %v331_v16 = vsel %vm325_vm2, %v330_v15, inf }
 0x10e   : > { %332 = vmin.xlane.f32.xlu1 %v331_v16 }
 0x181   : > { %v333_v17 = vpop.xlane.xlu1 %332 }
 0x182   : > { %vm334_vm4 = vcmp.eq.f32.partialorder %v324_v13, %v333_v17 }
 0x183   : > { %v335_v18 = vsel %vm334_vm4, 1e+30, %v321_v9 }
 0x184   : > { %v336_v19 = vsel %vm325_vm2, %v335_v18, inf }
 0x185   : > { %337 = vmin.xlane.f32.xlu1 %v336_v19 }
 0x1f8   : > { %v338_v20 = vpop.xlane.xlu1 %337 }
 0x1f9   : > { %vm339_vm5 = vcmp.le.f32.partialorder %v335_v18, %v338_v20  ;;  %v360_v26 = vsel %vm354_vm7, %v328_v14, %v338_v20 }
 0x1fa   : > { %v340_v21 = vsel %vm339_vm5, %v324_v13, 4.0 }
 0x1fb   : > { %v341_v22 = vsel %vm325_vm2, %v340_v21, inf }
 0x1fc   : > { %342 = vmin.xlane.f32.xlu2 %v341_v22 }
 0x26f   : > { %v343_v23 = vpop.xlane.xlu2 %342 }
 0x270   : > { %vm344_vm6 = vcmp.eq.f32.partialorder %v324_v13, %v343_v23  ;;  %v355_v31 = vsel %vm354_vm7, %v333_v17, %v343_v23 }
 0x271   : > { %v345_v24 = vsel %vm344_vm6, 1e+30, %v335_v18 }
 0x272   : > { %v346_v25 = vsel %vm325_vm2, %v345_v24, inf }
 0x273   : > { %347 = vmin.xlane.f32.xlu2 %v346_v25 }
 0x2e6   : > { %v348_v27 = vpop.xlane.xlu2 %347 }
 0x2e7   : > { %vm349_vm9 = vcmp.le.f32.partialorder %v345_v24, %v348_v27  ;;  %v361_v28 = vsel %vm356_vm8, %v360_v26, %v348_v27 }
 0x2e8   : > { %362 = vst.msk [vmem:[%s280_s11] sm:$0xff] %vm285_vm1, %v361_v28  ;;  %v350_v29 = vsel %vm349_vm9, %v324_v13, 4.0 }
 0x2e9   : > { %v351_v30 = vsel %vm325_vm2, %v350_v29, inf }
 0x2ea   : > { %352 = vmin.xlane.f32.xlu0 %v351_v30 }
 0x35d   : > { %v353_v32 = vpop.xlane.xlu0 %352 }
 0x35e   : > { %v357_v33 = vsel %vm356_vm8, %v355_v31, %v353_v32 }
 0x35f   : > { %vm533_vm10 = vcmp.lt.s32.totalorder %v357_v33, 0  ;;  %v534_v34 = vceil.f32 %v357_v33  ;;  %v535_v35 = vfloor.f32 %v357_v33 }
 0x361   : > { %v536_v36 = vsel %vm533_vm10, %v534_v34, %v535_v35 }
 0x362   : > { %v537_v37 = vcvt.f32.s32 %v536_v36 }
 0x364   : > { %359 = vst.msk [vmem:[%s272_s14] sm:$0xff] %vm285_vm1, %v537_v37 }
 0x365 PF: > { %s15_s19 = sadd.s32 1, %s617_s19   ;;  %s724_s15 = smov %s609_s17 }
 0x366   : > { %p12_p7 = scmp.ge.s32.totalorder %s15_s19, 6   ;;  %s725_s16 = smov %s613_s18 }
 0x367   : > { %s726_s17 = smov %s729_s20  ;;  %s727_s18 = smov %s733_s21 }
 0x368   :  { %14 = sbr.rel (!%p12_p7) target bundleno = 3 (0x3), region = 80 }

// kernel: assanet_seg_forward.16
= control target key start
LH: loop header
LB: loop body
LE: loop exit
PB: predicated region body
PF: predicated region fallthrough
CT: control target
= control target key end

     0   :  { %s1078_s27 = smov 0   ;;  %s1201_s0 = inlined_call_operand.vmem [shape: bf16[32,3,64], index: 0, kind: input, shape index: {}]   ;;  %s1202_s1 = inlined_call_operand.vmem [shape: f32[32,3], index: 1, kind: input, shape index: {}]   ;;  %s1203_s2 = inlined_call_operand.vmem [shape: bf16[32,32], index: 2, kind: input, shape index: {}]   ;;  %s1204_s3 = inlined_call_operand.vmem [shape: bf16[64,64], index: 3, kind: input, shape index: {}]   ;;  %s1205_s4 = inlined_call_operand.vmem [shape: bf16[32,64], index: 4, kind: input, shape index: {}]   ;;  %s1206_s5 = inlined_call_operand.vmem [shape: f32[1,64], index: 5, kind: input, shape index: {}]   ;;  %s1207_s6 = inlined_call_operand.vmem [shape: bf16[64,64], index: 6, kind: input, shape index: {}]   ;;  %s1208_s7 = inlined_call_operand.vmem [shape: f32[1,64], index: 7, kind: input, shape index: {}]   ;;  %s1209_s8 = inlined_call_operand.vmem [shape: bf16[32,64], index: 8, kind: output, shape index: {}]  }
   0x1 LB: > { %s939_s28 = sadd.s32 4294967295, %s1031_s27   ;;  %p943_p0 = scmp.ge.s32.totalorder %s1031_s27, 1  ;;  %s1031_s27 = sphi %s1078_s27, %s18_s27  }
   0x2   : > { %p285_p1 = scmp.lt.s32.totalorder %s1031_s27, 3 }
   0x4   : > { %p286_p2 = pnand %p943_p0, %p285_p1 }
   0x5   : > { %s946_s29 = sshll.u32 (!%p286_p2), %s939_s28, 1  ;;  %s944_s12 = sshll.u32 (!%p286_p2), %s939_s28, 4 }
   0x6   : > { %289 = sbr.rel (%p286_p2) target bundleno = 490 (0x1ea), region = 52  ;;  %p336_p3 = scmp.lt.s32.totalorder (!%p286_p2), %s946_s29, 3 }
   0x7   : > { %p330_p4 = scmp.lt.s32.totalorder (!%p286_p2), %s944_s12, 31 }
   0xb   : > { %v389_v0 = vlaneseq  ;;  %s1211_s29 = smov (!%p336_p3, %s946_s29), 3  ;;  %s1213_s12 = smov (!%p330_p4, %s944_s12), 31  ;;  %vm516_vm0 = vcmask 518144   ;;  %vm676_vm1 = vcmask 261120   ;;  %vm726_vm2 = vcmask 1041409  }
   0xc   : > { %s947_s30 = sshll.u32 %s1211_s29, 3  ;;  %s945_s13 = sshll.u32 %s1213_s12, 1  ;;  %vm728_vm3 = vcmask 1042434   ;;  %vm730_vm4 = vcmask 1043459   ;;  %vm732_vm5 = vcmask 1044484   ;;  %vm734_vm6 = vcmask 1045509  }
   0xd   : > { %v390_v1 = vshrl.u32 %v389_v0, 7  ;;  %s339_s11 = scalar_lea.vmem %s1202_s1, %s947_s30  ;;  %s1099_s16 = scalar_lea.vmem %s1201_s0, %s945_s13  ;;  %vm736_vm7 = vcmask 1046534   ;;  %vm738_vm8 = vcmask 1047559   ;;  %vm772_vm9 = vcmask 523264  }
   0xe   : > { %v387_v2 = vld [vmem:[%s339_s11 + $0x8] sm:$0xff]  ;;  %v386_v3 = vld [vmem:[%s339_s11] sm:$0xff]  ;;  %v364_v24 = vld [vmem:[%s1099_s16 + $0x14] sm:$0x3]  ;;  %s949_s21 = sshll.u32 %s1211_s29, 2  ;;  %vm856_vm10 = vcmask 519168  }
   0xf   : > { %1022 = vset.pattern.permute.xlu2 %v390_v1  ;;  %1021 = vset.pattern.permute.xlu1 %v390_v1  ;;  %v444_v4 = vperm.slane %v387_v2, 0  ;;  %v402_v5 = vperm.slane %v386_v3, 2  ;;  %v388_v6 = vperm.slane %v386_v3, 0  ;;  %v451_v7 = vperm.slane %v387_v2, 1  ;;  %v356_v21 = vld [vmem:[%s1099_s16 + $0x4] sm:$0x3]  ;;  %s345_s30 = scalar_lea.vmem %s1203_s2, %s949_s21 }
  0x10   : > { %1020 = vset.pattern.permute.xlu0 %v390_v1  ;;  %v458_v8 = vperm.slane %v387_v2, 2  ;;  %v395_v9 = vperm.slane %v386_v3, 1  ;;  %v465_v10 = vperm.slane %v387_v2, 3  ;;  %v416_v11 = vperm.slane %v386_v3, 4  ;;  %v362_v34 = vld [vmem:[%s1099_s16 + $0x10] sm:$0x3] }
  0x11   : > { %v409_v12 = vperm.slane %v386_v3, 3  ;;  %v423_v13 = vperm.slane %v386_v3, 5  ;;  %v479_v14 = vperm.slane %v387_v2, 5  ;;  %v472_v15 = vperm.slane %v387_v2, 4  ;;  %v355_v35 = vld [vmem:[%s1099_s16 + $0x2] sm:$0x3] }
  0x12   : > { %v486_v16 = vperm.slane %v387_v2, 6  ;;  %v437_v17 = vperm.slane %v386_v3, 7  ;;  %v430_v18 = vperm.slane %v386_v3, 6  ;;  %v493_v19 = vperm.slane %v387_v2, 7  ;;  %v354_v37 = vld [vmem:[%s1099_s16] sm:$0x3] }
  0x13   : > { %v372_v22 = vunpack.c.l.bf16 %v356_v21  ;;  %v380_v26 = vunpack.c.l.bf16 %v364_v24  ;;  %v363_v39 = vld [vmem:[%s1099_s16 + $0x12] sm:$0x3]  ;;  %v378_v40 = vunpack.c.l.bf16 %v362_v34  ;;  %v371_v41 = vunpack.c.l.bf16 %v355_v35  ;;  %v358_v44 = vld [vmem:[%s1099_s16 + $0x8] sm:$0x3]  ;;  %v367_v51 = vld [vmem:[%s1099_s16 + $0x1a] sm:$0x3] }
  0x14   : > { %v370_v42 = vunpack.c.l.bf16 %v354_v37  ;;  %v379_v46 = vunpack.c.l.bf16 %v363_v39  ;;  %v365_v53 = vld [vmem:[%s1099_s16 + $0x16] sm:$0x3]  ;;  %v374_v54 = vunpack.c.l.bf16 %v358_v44  ;;  %v357_v58 = vld [vmem:[%s1099_s16 + $0x6] sm:$0x3]  ;;  %v383_v60 = vunpack.c.l.bf16 %v367_v51  ;;  %v361_v2 = vld [vmem:[%s1099_s16 + $0xe] sm:$0x3] }
  0x15   : > { %v381_v62 = vunpack.c.l.bf16 %v365_v53  ;;  %v373_v3 = vunpack.c.l.bf16 %v357_v58  ;;  %v1005_v44 = vld [vmem:[%s345_s30] sm:$0xff]  ;;  %s351_s30 = scalar_lea.vmem %s1209_s8, %s949_s21 }
  0x17   : > { %449 = vperm.xlu1 %1021, %v444_v4   ;;  %407 = vperm.xlu2 %1022, %v402_v5  }
  0x18   : > { %393 = vperm.xlu0 %1020, %v388_v6  }
  0x1f   : > { %456 = vperm.xlu1 %1021, %v451_v7   ;;  %463 = vperm.xlu2 %1022, %v458_v8  }
  0x20   : > { %400 = vperm.xlu0 %1020, %v395_v9  }
  0x27   : > { %470 = vperm.xlu1 %1021, %v465_v10   ;;  %421 = vperm.xlu2 %1022, %v416_v11  }
  0x28   : > { %414 = vperm.xlu0 %1020, %v409_v12  }
  0x2f   : > { %428 = vperm.xlu1 %1021, %v423_v13   ;;  %484 = vperm.xlu2 %1022, %v479_v14   ;;  %v359_v13 = vld [vmem:[%s1099_s16 + $0xa] sm:$0x3] }
  0x30   : > { %477 = vperm.xlu0 %1020, %v472_v15   ;;  %v1007_v14 = vld [vmem:[%s1205_s4 + $0x8] sm:$0xff]  ;;  %v1004_v15 = vld [vmem:[%s1204_s3 + $0x18] sm:$0xff] }
  0x31   : > { %686 = vmatpush.bf16.msra.mxu0 %v1007_v14  ;;  %780 = vmatpush.bf16.msra.mxu1 %v1004_v15 }
  0x37   : > { %491 = vperm.xlu1 %1021, %v486_v16   ;;  %442 = vperm.xlu2 %1022, %v437_v17   ;;  %v377_v17 = vunpack.c.l.bf16 %v361_v2 }
  0x38   : > { %435 = vperm.xlu0 %1020, %v430_v18  }
  0x40   : > { %498 = vperm.xlu0 %1020, %v493_v19  }
  0x71   : > { %v408_v20 = vpop.permute.xlu2 %407 }
  0x72   : > { %v502_v25 = vmul.f32 %v408_v20, %v372_v22 }
  0x74   : > { %v531_v27 = vsel %vm516_vm0, %v502_v25, 0.0  ;;  %v375_v25 = vunpack.c.l.bf16 %v359_v13 }
  0x75   : > { %v532_v30 = vrot.slane %v531_v27, 4 }
  0x77   : > { %v533_v36 = vadd.f32 %v532_v30, %v531_v27 }
  0x79   : > { %v464_v23 = vpop.permute.xlu2 %463  ;;  %v534_v43 = vrot.slane %v533_v36, 2 }
  0x7a   : > { %v510_v28 = vmul.f32 %v464_v23, %v380_v26  ;;  %v366_v26 = vld [vmem:[%s1099_s16 + $0x18] sm:$0x3] }
  0x7b   : > { %v535_v56 = vadd.f32 %v534_v43, %v533_v36  ;;  %v382_v39 = vunpack.c.l.bf16 %v366_v26 }
  0x7c   : > { %v587_v33 = vsel %vm516_vm0, %v510_v28, 0.0 }
  0x7d   : > { %v588_v38 = vrot.slane %v587_v33, 4  ;;  %v536_v4 = vrot.slane %v535_v56, 1 }
  0x7f   : > { %v589_v47 = vadd.f32 %v588_v38, %v587_v33  ;;  %v537_v22 = vadd.f32 %v536_v4, %v535_v56 }
  0x81   : > { %v422_v29 = vpop.permute.xlu2 %421  ;;  %v590_v59 = vrot.slane %v589_v47, 2 }
  0x82   : > { %v504_v0 = vmul.f32 %v422_v29, %v374_v54 }
  0x83   : > { %v591_v8 = vadd.f32 %v590_v59, %v589_v47 }
  0x84   : > { %v545_v18 = vsel %vm516_vm0, %v504_v0, 0.0 }
  0x85   : > { %v592_v27 = vrot.slane %v591_v8, 1  ;;  %v546_v33 = vrot.slane %v545_v18, 4 }
  0x87   : > { %v1146_v51 = vadd.f32 %v592_v27, %v591_v8 }
  0x89   : > { %v450_v31 = vpop.permute.xlu1 %449  ;;  %v485_v48 = vpop.permute.xlu2 %484 }
  0x8a   : > { %v394_v32 = vpop.permute.xlu0 %393  ;;  %v508_v50 = vmul.f32 %v450_v31, %v378_v40  ;;  %v513_v10 = vmul.f32 %v485_v48, %v383_v60  ;;  %v1006_v31 = vld [vmem:[%s1205_s4] sm:$0xff]  ;;  %v631_v40 = vpack.c.bf16 %v537_v22, %v537_v22 }
  0x8b   : > { %v500_v55 = vmul.f32 %v394_v32, %v370_v42  ;;  %v1003_v32 = vld [vmem:[%s1204_s3 + $0x10] sm:$0xff]  ;;  %687 = vmatpush.bf16.msra.mxu0 %v1006_v31  ;;  %v1001_v60 = vld [vmem:[%s1204_s3] sm:$0xff] }
  0x8c   : > { %v573_v63 = vsel %vm516_vm0, %v508_v50, 0.0  ;;  %v608_v29 = vsel %vm516_vm0, %v513_v10, 0.0  ;;  %781 = vmatpush.bf16.msra.mxu1 %v1003_v32  ;;  %v1002_v50 = vld [vmem:[%s1204_s3 + $0x8] sm:$0xff] }
  0x8d   : > { %v517_v1 = vsel %vm516_vm0, %v500_v55, 0.0  ;;  %v574_v9 = vrot.slane %v573_v63, 4  ;;  %v360_v55 = vld [vmem:[%s1099_s16 + $0xc] sm:$0x3] }
  0x8e   : > { %v518_v16 = vrot.slane %v517_v1, 4  ;;  %964 = vmatmul.msk.bf16.vlgmr.msra.gmra.mxu0 %vm676_vm1, %v1005_v44  ;;  %v376_v4 = vunpack.c.l.bf16 %v360_v55 }
  0x8f   : > { %v575_v28 = vadd.f32 %v574_v9, %v573_v63  ;;  %v1155_v9 = vunpack.c.l.b16 %v631_v40 }
  0x90   : > { %v519_v34 = vadd.f32 %v518_v16, %v517_v1  ;;  %782 = vmatpush.bf16.msra.mxu1 %v1002_v50 }
  0x91   : > { %v457_v45 = vpop.permute.xlu1 %456  ;;  %v443_v20 = vpop.permute.xlu2 %442 }
  0x92   : > { %v401_v49 = vpop.permute.xlu0 %400  ;;  %v509_v57 = vmul.f32 %v457_v45, %v379_v46  ;;  %v507_v35 = vmul.f32 %v443_v20, %v377_v17  ;;  %v576_v45 = vrot.slane %v575_v28, 2  ;;  %v520_v53 = vrot.slane %v519_v34, 2 }
  0x93   : > { %v501_v52 = vmul.f32 %v401_v49, %v371_v41  ;;  %v609_v41 = vrot.slane %v608_v29, 4  ;;  %v368_v49 = vld [vmem:[%s1099_s16 + $0x1c] sm:$0x3] }
  0x94   : > { %v580_v5 = vsel %vm516_vm0, %v509_v57, 0.0  ;;  %v566_v54 = vsel %vm516_vm0, %v507_v35, 0.0  ;;  %v384_v0 = vunpack.c.l.bf16 %v368_v49  ;;  %v577_v1 = vadd.f32 %v576_v45, %v575_v28  ;;  %783 = vmatpush.bf16.msra.mxu1 %v1001_v60 }
  0x95   : > { %v524_v61 = vsel %vm516_vm0, %v501_v52, 0.0  ;;  %v581_v19 = vrot.slane %v580_v5, 4  ;;  %v547_v52 = vadd.f32 %v546_v33, %v545_v18 }
  0x96   : > { %v525_v6 = vrot.slane %v524_v61, 4  ;;  %v578_v22 = vrot.slane %v577_v1, 1 }
  0x97   : > { %v582_v37 = vadd.f32 %v581_v19, %v580_v5  ;;  %v521_v5 = vadd.f32 %v520_v53, %v519_v34  ;;  %v548_v13 = vrot.slane %v547_v52, 2 }
  0x98   : > { %v526_v23 = vadd.f32 %v525_v6, %v524_v61  ;;  %v610_v61 = vadd.f32 %v609_v41, %v608_v29  ;;  %v567_v6 = vrot.slane %v566_v54, 4 }
  0x99   : > { %v471_v7 = vpop.permute.xlu1 %470  ;;  %v583_v56 = vrot.slane %v582_v37, 2  ;;  %v549_v31 = vadd.f32 %v548_v13, %v547_v52 }
  0x9a   : > { %v511_v11 = vmul.f32 %v471_v7, %v381_v62  ;;  %v415_v12 = vpop.permute.xlu0 %414  ;;  %v527_v42 = vrot.slane %v526_v23, 2  ;;  %v611_v14 = vrot.slane %v610_v61, 2 }
  0x9b   : > { %v503_v21 = vmul.f32 %v415_v12, %v373_v3  ;;  %v584_v10 = vadd.f32 %v583_v56, %v582_v37  ;;  %v639_v12 = vpack.c.bf16 %v1146_v51, %v1146_v51 }
  0x9c   : > { %v594_v24 = vsel %vm516_vm0, %v511_v11, 0.0  ;;  %v528_v62 = vadd.f32 %v527_v42, %v526_v23  ;;  %v522_v23 = vrot.slane %v521_v5, 1  ;;  %v612_v32 = vadd.f32 %v611_v14, %v610_v61 }
  0x9d   : > { %v538_v30 = vsel %vm516_vm0, %v503_v21, 0.0  ;;  %v595_v38 = vrot.slane %v594_v24, 4  ;;  %v585_v26 = vrot.slane %v584_v10, 1 }
  0x9e   : > { %v539_v36 = vrot.slane %v538_v30, 4  ;;  %v529_v15 = vrot.slane %v528_v62, 1  ;;  %v613_v52 = vrot.slane %v612_v32, 1 }
  0x9f   : > { %v596_v57 = vadd.f32 %v595_v38, %v594_v24  ;;  %v568_v24 = vadd.f32 %v567_v6, %v566_v54  ;;  %v586_v44 = vadd.f32 %v585_v26, %v584_v10 }
  0xa0   : > { %v540_v46 = vadd.f32 %v539_v36, %v538_v30  ;;  %v369_v30 = vld [vmem:[%s1099_s16 + $0x1e] sm:$0x3]  ;;  %v530_v33 = vadd.f32 %v529_v15, %v528_v62 }
  0xa1   : > { %v429_v43 = vpop.permute.xlu1 %428  ;;  %v597_v11 = vrot.slane %v596_v57, 2  ;;  %v385_v42 = vunpack.c.l.bf16 %v369_v30  ;;  %v569_v45 = vrot.slane %v568_v24, 2  ;;  %v638_v62 = vpack.c.bf16 %v586_v44, %v586_v44 }
  0xa2   : > { %v505_v47 = vmul.f32 %v429_v43, %v375_v25  ;;  %v478_v48 = vpop.permute.xlu0 %477  ;;  %v541_v2 = vrot.slane %v540_v46, 2  ;;  %v579_v43 = vadd.f32 %v578_v22, %v577_v1  ;;  %v630_v53 = vpack.c.bf16 %v530_v33, %v530_v33 }
  0xa3   : > { %v512_v59 = vmul.f32 %v478_v48, %v382_v39  ;;  %v598_v27 = vadd.f32 %v597_v11, %v596_v57  ;;  %v523_v39 = vadd.f32 %v522_v23, %v521_v5  ;;  %v614_v11 = vadd.f32 %v613_v52, %v612_v32 }
  0xa4   : > { %v552_v58 = vsel %vm516_vm0, %v505_v47, 0.0  ;;  %v542_v17 = vadd.f32 %v541_v2, %v540_v46  ;;  %v550_v47 = vrot.slane %v549_v31, 1  ;;  %v637_v61 = vpack.c.bf16 %v579_v43, %v579_v43 }
  0xa5   : > { %v553_v63 = vrot.slane %v552_v58, 4  ;;  %v601_v3 = vsel %vm516_vm0, %v512_v59, 0.0  ;;  %v599_v46 = vrot.slane %v598_v27, 1  ;;  %v629_v57 = vpack.c.bf16 %v523_v39, %v523_v39 }
  0xa6   : > { %v602_v8 = vrot.slane %v601_v3, 4  ;;  %v543_v35 = vrot.slane %v542_v17, 1  ;;  %v711_v5 = vunpack.c.l.b16 %v630_v53  ;;  %v551_v10 = vadd.f32 %v550_v47, %v549_v31 }
  0xa7   : > { %v554_v7 = vadd.f32 %v553_v63, %v552_v58  ;;  %v570_v63 = vadd.f32 %v569_v45, %v568_v24  ;;  %v710_v13 = vunpack.c.l.b16 %v629_v57  ;;  %v719_v15 = vunpack.c.l.b16 %v638_v62  ;;  %v1008_v62 = vld [vmem:[%s1207_s6] sm:$0xff] }
  0xa8   : > { %v603_v19 = vadd.f32 %v602_v8, %v601_v3  ;;  %v544_v54 = vadd.f32 %v543_v35, %v542_v17 }
  0xa9   : > { %v492_v16 = vpop.permute.xlu1 %491  ;;  %v555_v18 = vrot.slane %v554_v7, 2  ;;  %v727_v23 = vsel %vm726_vm2, %v711_v5, %v710_v13  ;;  %v1024_v13 = vld [vmem:[%s1208_s7] ss:$0 sm:$0xff] }
  0xaa   : > { %v514_v20 = vmul.f32 %v492_v16, %v384_v0  ;;  %v436_v21 = vpop.permute.xlu0 %435  ;;  %v604_v28 = vrot.slane %v603_v19, 2  ;;  %v600_v0 = vadd.f32 %v599_v46, %v598_v27  ;;  %v632_v6 = vpack.c.bf16 %v544_v54, %v544_v54 }
  0xab   : > { %v506_v25 = vmul.f32 %v436_v21, %v376_v4  ;;  %v556_v36 = vadd.f32 %v555_v18, %v554_v7  ;;  %v571_v16 = vrot.slane %v570_v63, 1  ;;  %v720_v27 = vunpack.c.l.b16 %v639_v12 }
  0xac   : > { %v615_v29 = vsel %vm516_vm0, %v514_v20, 0.0  ;;  %v605_v37 = vadd.f32 %v604_v28, %v603_v19  ;;  %v640_v17 = vpack.c.bf16 %v600_v0, %v600_v0  ;;  %v718_v19 = vunpack.c.l.b16 %v637_v61  ;;  %v1009_v61 = vld [vmem:[%s1207_s6 + $0x8] sm:$0xff] }
  0xad   : > { %v616_v34 = vrot.slane %v615_v29, 4  ;;  %v559_v38 = vsel %vm516_vm0, %v506_v25, 0.0  ;;  %v557_v55 = vrot.slane %v556_v36, 1  ;;  %v713_v24 = vunpack.c.l.b16 %v632_v6 }
  0xae   : > { %v560_v41 = vrot.slane %v559_v38, 4  ;;  %v606_v48 = vrot.slane %v605_v37, 1  ;;  %v633_v28 = vpack.c.bf16 %v551_v10, %v551_v10  ;;  %v740_v30 = vsel %vm726_vm2, %v719_v15, %v718_v19 }
  0xaf   : > { %v617_v40 = vadd.f32 %v616_v34, %v615_v29  ;;  %v558_v7 = vadd.f32 %v557_v55, %v556_v36  ;;  %v572_v31 = vadd.f32 %v571_v16, %v570_v63  ;;  %v721_v32 = vunpack.c.l.b16 %v640_v17 }
  0xb0   : > { %v561_v50 = vadd.f32 %v560_v41, %v559_v38  ;;  %v607_v1 = vadd.f32 %v606_v48, %v605_v37  ;;  %v729_v34 = vsel %vm728_vm3, %v1155_v9, %v727_v23  ;;  %v642_v37 = vpack.c.bf16 %v614_v11, %v614_v11 }
  0xb1   : > { %v618_v49 = vrot.slane %v617_v40, 2  ;;  %v634_v25 = vpack.c.bf16 %v558_v7, %v558_v7  ;;  %v731_v38 = vsel %vm730_vm4, %v713_v24, %v729_v34  ;;  %v714_v12 = vunpack.c.l.b16 %v633_v28 }
  0xb2   : > { %v499_v56 = vpop.permute.xlu0 %498  ;;  %v562_v59 = vrot.slane %v561_v50, 2  ;;  %v641_v20 = vpack.c.bf16 %v607_v1, %v607_v1  ;;  %v723_v47 = vunpack.c.l.b16 %v642_v37 }
  0xb3   : > { %v619_v58 = vadd.f32 %v618_v49, %v617_v40  ;;  %v515_v60 = vmul.f32 %v499_v56, %v385_v42  ;;  %v715_v39 = vunpack.c.l.b16 %v634_v25  ;;  %v741_v40 = vsel %vm728_vm3, %v720_v27, %v740_v30 }
  0xb4   : > { %v563_v3 = vadd.f32 %v562_v59, %v561_v50  ;;  %v722_v35 = vunpack.c.l.b16 %v641_v20  ;;  %v636_v42 = vpack.c.bf16 %v572_v31, %v572_v31  ;;  %v742_v43 = vsel %vm730_vm4, %v721_v32, %v741_v40  ;;  %v1011_v59 = vld [vmem:[%s1207_s6 + $0x18] sm:$0xff] }
  0xb5   : > { %v620_v2 = vrot.slane %v619_v58, 1  ;;  %v622_v4 = vsel %vm516_vm0, %v515_v60, 0.0  ;;  %v733_v9 = vsel %vm732_vm5, %v714_v12, %v731_v38  ;;  %842 = vmatpush.bf16.msra.mxu2 %v1011_v59  ;;  %v1010_v60 = vld [vmem:[%s1207_s6 + $0x10] sm:$0xff] }
  0xb6   : > { %v623_v8 = vrot.slane %v622_v4, 4  ;;  %v564_v14 = vrot.slane %v563_v3, 1  ;;  %v743_v46 = vsel %vm732_vm5, %v722_v35, %v742_v43  ;;  %v735_v49 = vsel %vm734_vm6, %v715_v39, %v733_v9 }
  0xb7   : > { %v621_v21 = vadd.f32 %v620_v2, %v619_v58  ;;  %v717_v52 = vunpack.c.l.b16 %v636_v42  ;;  %v744_v54 = vsel %vm734_vm6, %v723_v47, %v743_v46  ;;  %v1023_v2 = vld [vmem:[%s1206_s5] ss:$0 sm:$0xff] }
  0xb8   : > { %v624_v18 = vadd.f32 %v623_v8, %v622_v4  ;;  %v565_v22 = vadd.f32 %v564_v14, %v563_v3 }
  0xb9   : > { %v643_v36 = vpack.c.bf16 %v621_v21, %v621_v21  ;;  %843 = vmatpush.bf16.msra.mxu2 %v1010_v60 }
  0xba   : > { %v625_v26 = vrot.slane %v624_v18, 2  ;;  %v635_v29 = vpack.c.bf16 %v565_v22, %v565_v22 }
  0xbb   : > { %v724_v45 = vunpack.c.l.b16 %v643_v36 }
  0xbc   : > { %v626_v33 = vadd.f32 %v625_v26, %v624_v18  ;;  %v716_v41 = vunpack.c.l.b16 %v635_v29 }
  0xbd   : > { %v745_v55 = vsel %vm736_vm7, %v724_v45, %v744_v54  ;;  %844 = vmatpush.bf16.msra.mxu2 %v1009_v61 }
  0xbe   : > { %v627_v51 = vrot.slane %v626_v33, 1  ;;  %v737_v50 = vsel %vm736_vm7, %v716_v41, %v735_v49 }
  0xbf   : > { %v739_v56 = vsel %vm738_vm8, %v717_v52, %v737_v50 }
  0xc0   : > { %v628_v44 = vadd.f32 %v627_v51, %v626_v33 }
  0xc1   : > { %845 = vmatpush.bf16.msra.mxu2 %v1008_v62 }
  0xc2   : > { %v644_v48 = vpack.c.bf16 %v628_v44, %v628_v44 }
  0xc4   : > { %v725_v53 = vunpack.c.l.b16 %v644_v48 }
  0xc6   : > { %v746_v57 = vsel %vm738_vm8, %v725_v53, %v745_v55 }
  0xc7   : > { %v747_v58 = vpack.c.b16 %v746_v57, %v739_v56 }
  0xc9   : > { %981 = vmatmul.msk.bf16.vlgmr.msra.gmra.mxu1 %vm772_vm9, %v747_v58 }
 0x10b   : > { %v689_v63 = vpop.f32.mrf.mxu0 }
 0x113   : > { %v691_v3 = vpop.f32.mrf.mxu0 }
 0x146   : > { %v785_v0 = vpop.f32.mrf.mxu1 }
 0x147   : > { %v786_v1 = vadd.f32 %v785_v0, %v689_v63 }
 0x149   : > { %v794_v5 = vadd.f32 %v1023_v2, %v786_v1 }
 0x14b   : > { %v796_v8 = vmax.f32 %v794_v5, 0.0 }
 0x14e   : > { %v787_v4 = vpop.f32.mrf.mxu1 }
 0x14f   : > { %v788_v6 = vadd.f32 %v787_v4, %v691_v3 }
 0x151   : > { %v795_v7 = vadd.f32 %v1023_v2, %v788_v6 }
 0x153   : > { %v797_v10 = vmax.f32 %v795_v7, 0.0 }
 0x155   : > { %v798_v11 = vpack.c.bf16 %v797_v10, %v796_v8 }
 0x157   : > { %998 = vmatmul.msk.bf16.vlgmr.msra.gmra.mxu2 %vm772_vm9, %v798_v11 }
 0x1da   : > { %v847_v14 = vpop.f32.mrf.mxu2 }
 0x1db   : > { %v848_v15 = vadd.f32 %v1024_v13, %v847_v14 }
 0x1dd   : > { %v852_v16 = vmax.f32 %v848_v15, 0.0 }
 0x1df   : > { %v854_v17 = vpack.c.bf16 %v852_v16, %v852_v16 }
 0x1e1   : > { %857 = vst.msk [vmem:[%s351_s30] sm:$0xf] %vm856_vm10, %v854_v17 }
 0x1e2   : > { %v849_v18 = vpop.f32.mrf.mxu2 }
 0x1e3   : > { %v850_v19 = vadd.f32 %v1024_v13, %v849_v18 }
 0x1e5   : > { %v853_v20 = vmax.f32 %v850_v19, 0.0 }
 0x1e7   : > { %v855_v21 = vpack.c.bf16 %v853_v20, %v853_v20 }
 0x1e9   : > { %858 = vst.msk [vmem:[%s351_s30 + $0x4] sm:$0xf] %vm856_vm10, %v855_v21 }
 0x1ea PF: > { %s18_s27 = sadd.s32 1, %s1031_s27  }
 0x1eb   : > { %p15_p5 = scmp.ge.s32.totalorder %s18_s27, 4  }
 0x1ed   :  { %17 = sbr.rel (!%p15_p5) target bundleno = 1 (0x1), region = 88 }

// kernel: assanet_seg_forward.17
= control target key start
LH: loop header
LB: loop body
LE: loop exit
PB: predicated region body
PF: predicated region fallthrough
CT: control target
= control target key end

     0   :  { %s833_s15 = smov 0   ;;  %s835_s16 = smov 0   ;;  %s1013_s0 = inlined_call_operand.vmem [shape: f32[2,64,3], index: 0, kind: input, shape index: {}]   ;;  %s1014_s1 = inlined_call_operand.vmem [shape: f32[2,3,16], index: 1, kind: input, shape index: {}]   ;;  %s1015_s2 = inlined_call_operand.vmem [shape: f32[2,1,16], index: 2, kind: input, shape index: {}]   ;;  %s1016_s3 = inlined_call_operand.vmem [shape: s32[2,64,3], index: 3, kind: output, shape index: {0}]   ;;  %s1017_s4 = inlined_call_operand.vmem [shape: f32[2,64,3], index: 4, kind: output, shape index: {1}]  }
   0x1   :  { %s837_s17 = smov 0   ;;  %s839_s18 = smov 0  }
   0x2   :  { %s841_s19 = smov 0  }
   0x3 LB: > { %s24_s20 = sadd.s32 1, %s798_s17  ;;  %s27_s21 = sadd.s32 1, %s802_s18  ;;  %s806_s19 = sphi %s841_s19, %s15_s19   ;;  %s802_s18 = sphi %s839_s18, %s1021_s18   ;;  %s798_s17 = sphi %s837_s17, %s1020_s17   ;;  %s794_s16 = sphi %s835_s16, %s1019_s16   ;;  %s790_s15 = sphi %s833_s15, %s1018_s15  }
   0x4   : > { %p25_p0 = scmp.ge.s32.totalorder %s24_s20, 2  ;;  %p686_p1 = scmp.ge.s32.totalorder %s806_s19, 1 }
   0x5   : > { %p205_p2 = scmp.lt.s32.totalorder %s806_s19, 5 }
   0x6   : > { %s1023_s20 = smov (%p25_p0, %s24_s20), 0  ;;  %s1025_s21 = smov (!%p25_p0, %s27_s21), %s802_s18 }
   0x7   : > { %p206_p3 = pnand %p686_p1, %p205_p2  ;;  %p29_p4 = scmp.ge.s32.totalorder %s1025_s21, 2 }
   0x8   : > { %p256_p5 = scmp.lt.s32.totalorder (!%p206_p3), %s794_s16, 1  ;;  %s687_s22 = sshll.u32 (!%p206_p3), %s790_s15, 2 }
   0x9   : > { %s1027_s21 = smov (%p29_p4, %s1025_s21), 0  ;;  %209 = sbr.rel (%p206_p3) target bundleno = 878 (0x36e), region = 32 }
   0xa   : > { %p258_p6 = scmp.lt.s32.totalorder (!%p206_p3), %s687_s22, 7 }
   0xe   : > { %s1029_s16 = smov (!%p256_p5, %s794_s16), 1  ;;  %s1031_s22 = smov (!%p258_p6, %s687_s22), 7  ;;  %vm334_vm0 = vcmask 1042432   ;;  %vm302_vm1 = vcmask 23552   ;;  %vm378_vm2 = vcmask 130048   ;;  %v375_v38 = vlaneseq }
   0xf   : > { %s690_s23 = sshll.u32 %s1029_s16, 2  ;;  %s688_s24 = sshll.u32 %s1029_s16, 3 }
  0x10   : > { %s268_s27 = scalar_lea.vmem %s1014_s1, %s690_s23  ;;  %s261_s28 = sadd.s32 %s688_s24, %s1031_s22  ;;  %v376_v39 = vand.u32 127, %v375_v38 }
  0x11   : > { %v296_v0 = vld [vmem:[%s268_s27] sm:$0x7]  ;;  %s870_s29 = sshll.u32 %s261_s28, 3  ;;  %s271_s6 = scalar_lea.vmem %s1015_s2, %s1029_s16 }
  0x12   : > { %697 = vmatpush.msk.msra.mxu0 %vm334_vm0, %v296_v0  ;;  %705 = vmatpush.msk.msra.mxu2 %vm334_vm0, %v296_v0  ;;  %s263_s9 = scalar_lea.vmem %s1013_s0, %s870_s29  ;;  %v767_v15 = vld [vmem:[%s271_s6] ss:$0 sm:$0xff]  ;;  %v892_v40 = vcvt.s32.f32 %v376_v39  ;;  %s290_s12 = scalar_lea.vmem %s1017_s4, %s870_s29 }
  0x13   : > { %706 = vmatpush.msk.msra.mxu3 %vm334_vm0, %v296_v0  ;;  %v292_v1 = vld [vmem:[%s263_s9] sm:$0xff]  ;;  %v294_v2 = vld [vmem:[%s263_s9 + $0x10] sm:$0xff]  ;;  %v295_v3 = vld [vmem:[%s263_s9 + $0x18] sm:$0xff]  ;;  %704 = vmatpush.msk.msra.mxu1 %vm334_vm0, %v296_v0  ;;  %s280_s15 = scalar_lea.vmem %s1016_s3, %s870_s29 }
  0x14   : > { %698 = vmatmul.msk.f32.vlgmr.msra.gmra.mxu0 %vm302_vm1, %v292_v1  ;;  %700 = vmatmul.msk.f32.vlgmr.msra.gmra.mxu2 %vm302_vm1, %v294_v2  ;;  %v300_v4 = vmul.f32 %v294_v2, %v294_v2  ;;  %v293_v5 = vld [vmem:[%s263_s9 + $0x8] sm:$0xff]  ;;  %v298_v6 = vmul.f32 %v292_v1, %v292_v1  ;;  %v301_v9 = vmul.f32 %v295_v3, %v295_v3 }
  0x15   : > { %701 = vmatmul.msk.f32.vlgmr.msra.gmra.mxu3 %vm302_vm1, %v295_v3  ;;  %699 = vmatmul.msk.f32.vlgmr.msra.gmra.mxu1 %vm302_vm1, %v293_v5  ;;  %v299_v10 = vmul.f32 %v293_v5, %v293_v5 }
  0x16   : > { %v309_v7 = vsel %vm302_vm1, %v300_v4, 0.0  ;;  %v303_v8 = vsel %vm302_vm1, %v298_v6, 0.0  ;;  %v312_v11 = vsel %vm302_vm1, %v301_v9, 0.0 }
  0x17   : > { %310 = vadd.xlane.f32.xlu1 %v309_v7  ;;  %304 = vadd.xlane.f32.xlu0 %v303_v8  ;;  %v306_v12 = vsel %vm302_vm1, %v299_v10, 0.0 }
  0x1f   : > { %313 = vadd.xlane.f32.xlu1 %v312_v11  ;;  %307 = vadd.xlane.f32.xlu0 %v306_v12 }
  0x8a   : > { %v311_v13 = vpop.xlane.xlu1 %310  ;;  %v305_v14 = vpop.xlane.xlu0 %304 }
  0x8b   : > { %v318_v16 = vadd.f32 %v767_v15, %v305_v14  ;;  %v320_v28 = vadd.f32 %v767_v15, %v311_v13 }
  0x91   : > { %v355_v17 = vpop.f32.mrf.mxu0 }
  0x92   : > { %v367_v18 = vmul.f32 2.0, %v355_v17  ;;  %v358_v19 = vpop.f32.mrf.mxu1  ;;  %v308_v20 = vpop.xlane.xlu0 %307 }
  0x93   : > { %v314_v22 = vpop.xlane.xlu1 %313  ;;  %v368_v23 = vmul.f32 2.0, %v358_v19  ;;  %v319_v24 = vadd.f32 %v767_v15, %v308_v20 }
  0x94   : > { %v371_v21 = vsub.f32 %v318_v16, %v367_v18  ;;  %v321_v27 = vadd.f32 %v767_v15, %v314_v22 }
  0x95   : > { %v372_v31 = vsub.f32 %v319_v24, %v368_v23 }
  0x96   : > { %v379_v25 = vsel %vm378_vm2, %v371_v21, inf }
  0x97   : > { %v361_v26 = vpop.f32.mrf.mxu2  ;;  %380 = vmin.xlane.f32.xlu2 %v379_v25  ;;  %v382_v36 = vsel %vm378_vm2, %v372_v31, inf }
  0x98   : > { %v369_v29 = vmul.f32 2.0, %v361_v26  ;;  %v364_v30 = vpop.f32.mrf.mxu3 }
  0x99   : > { %v370_v32 = vmul.f32 2.0, %v364_v30 }
  0x9a   : > { %v373_v33 = vsub.f32 %v320_v28, %v369_v29 }
  0x9b   : > { %v374_v34 = vsub.f32 %v321_v27, %v370_v32 }
  0x9c   : > { %v385_v35 = vsel %vm378_vm2, %v373_v33, inf }
  0x9d   : > { %v388_v37 = vsel %vm378_vm2, %v374_v34, inf  ;;  %386 = vmin.xlane.f32.xlu0 %v385_v35 }
  0x9e   : > { %389 = vmin.xlane.f32.xlu1 %v388_v37 }
  0x9f   : > { %383 = vmin.xlane.f32.xlu2 %v382_v36 }
 0x10a   : > { %v894_v41 = vpop.xlane.xlu2 %380 }
 0x10b   : > { %vm391_vm3 = vcmp.le.f32.partialorder %v371_v21, %v894_v41 }
 0x10c   : > { %v395_v42 = vsel %vm391_vm3, %v892_v40, 16.0 }
 0x10d   : > { %v399_v43 = vsel %vm378_vm2, %v395_v42, inf }
 0x10e   : > { %400 = vmin.xlane.f32.xlu2 %v399_v43 }
 0x110   : > { %v899_v44 = vpop.xlane.xlu0 %386 }
 0x111   : > { %v901_v45 = vpop.xlane.xlu1 %389  ;;  %vm393_vm4 = vcmp.le.f32.partialorder %v373_v33, %v899_v44 }
 0x112   : > { %vm394_vm5 = vcmp.le.f32.partialorder %v374_v34, %v901_v45  ;;  %v905_v46 = vpop.xlane.xlu2 %383  ;;  %v397_v47 = vsel %vm393_vm4, %v892_v40, 16.0 }
 0x113   : > { %vm392_vm6 = vcmp.le.f32.partialorder %v372_v31, %v905_v46  ;;  %v405_v48 = vsel %vm378_vm2, %v397_v47, inf  ;;  %v398_v49 = vsel %vm394_vm5, %v892_v40, 16.0  ;;  %vm491_vm5 = vcmask 7168  }
 0x114   : > { %406 = vmin.xlane.f32.xlu1 %v405_v48  ;;  %v396_v50 = vsel %vm392_vm6, %v892_v40, 16.0  ;;  %v408_v51 = vsel %vm378_vm2, %v398_v49, inf  ;;  %vm496_vm6 = vcmask 15360  }
 0x115   : > { %v402_v52 = vsel %vm378_vm2, %v396_v50, inf }
 0x116   : > { %409 = vmin.xlane.f32.xlu2 %v408_v51  ;;  %403 = vmin.xlane.f32.xlu0 %v402_v52 }
 0x181   : > { %v914_v53 = vpop.xlane.xlu2 %400 }
 0x182   : > { %vm411_vm7 = vcmp.eq.f32.partialorder %v892_v40, %v914_v53 }
 0x183   : > { %v415_v54 = vsel %vm411_vm7, 1e+30, %v371_v21 }
 0x184   : > { %v419_v55 = vsel %vm378_vm2, %v415_v54, inf }
 0x185   : > { %420 = vmin.xlane.f32.xlu0 %v419_v55 }
 0x187   : > { %v919_v56 = vpop.xlane.xlu1 %406 }
 0x188   : > { %vm413_vm8 = vcmp.eq.f32.partialorder %v892_v40, %v919_v56 }
 0x189   : > { %v923_v57 = vpop.xlane.xlu2 %409  ;;  %v925_v58 = vpop.xlane.xlu0 %403  ;;  %v417_v59 = vsel %vm413_vm8, 1e+30, %v373_v33 }
 0x18a   : > { %vm414_vm9 = vcmp.eq.f32.partialorder %v892_v40, %v923_v57  ;;  %vm412_vm10 = vcmp.eq.f32.partialorder %v892_v40, %v925_v58  ;;  %v425_v60 = vsel %vm378_vm2, %v417_v59, inf }
 0x18b   : > { %426 = vmin.xlane.f32.xlu2 %v425_v60  ;;  %v418_v61 = vsel %vm414_vm9, 1e+30, %v374_v34  ;;  %v416_v62 = vsel %vm412_vm10, 1e+30, %v372_v31 }
 0x18c   : > { %v428_v63 = vsel %vm378_vm2, %v418_v61, inf  ;;  %v422_v0 = vsel %vm378_vm2, %v416_v62, inf }
 0x18d   : > { %429 = vmin.xlane.f32.xlu0 %v428_v63  ;;  %423 = vmin.xlane.f32.xlu1 %v422_v0 }
 0x1f8   : > { %v421_v1 = vpop.xlane.xlu0 %420 }
 0x1f9   : > { %vm431_vm11 = vcmp.le.f32.partialorder %v415_v54, %v421_v1  ;;  %v509_v25 = vsel %vm491_vm5, %v894_v41, %v421_v1 }
 0x1fa   : > { %v435_v2 = vsel %vm431_vm11, %v892_v40, 16.0 }
 0x1fb   : > { %v439_v3 = vsel %vm378_vm2, %v435_v2, inf }
 0x1fc   : > { %440 = vmin.xlane.f32.xlu1 %v439_v3 }
 0x1fe   : > { %v427_v4 = vpop.xlane.xlu2 %426 }
 0x1ff   : > { %vm433_vm12 = vcmp.le.f32.partialorder %v417_v59, %v427_v4  ;;  %v511_v30 = vsel %vm491_vm5, %v899_v44, %v427_v4 }
 0x200   : > { %v424_v5 = vpop.xlane.xlu1 %423  ;;  %v430_v6 = vpop.xlane.xlu0 %429  ;;  %v437_v7 = vsel %vm433_vm12, %v892_v40, 16.0 }
 0x201   : > { %vm432_vm13 = vcmp.le.f32.partialorder %v416_v62, %v424_v5  ;;  %vm434_vm14 = vcmp.le.f32.partialorder %v418_v61, %v430_v6  ;;  %v445_v8 = vsel %vm378_vm2, %v437_v7, inf  ;;  %v510_v31 = vsel %vm491_vm5, %v905_v46, %v424_v5 }
 0x202   : > { %v436_v9 = vsel %vm432_vm13, %v892_v40, 16.0  ;;  %v438_v10 = vsel %vm434_vm14, %v892_v40, 16.0  ;;  %446 = vmin.xlane.f32.xlu0 %v445_v8  ;;  %v512_v32 = vsel %vm491_vm5, %v901_v45, %v430_v6 }
 0x203   : > { %v442_v11 = vsel %vm378_vm2, %v436_v9, inf  ;;  %v448_v12 = vsel %vm378_vm2, %v438_v10, inf }
 0x204   : > { %443 = vmin.xlane.f32.xlu2 %v442_v11  ;;  %449 = vmin.xlane.f32.xlu1 %v448_v12 }
 0x26f   : > { %v441_v13 = vpop.xlane.xlu1 %440 }
 0x270   : > { %vm451_vm15 = vcmp.eq.f32.partialorder %v892_v40, %v441_v13  ;;  %v492_v46 = vsel %vm491_vm5, %v914_v53, %v441_v13 }
 0x271   : > { %v455_v14 = vsel %vm451_vm15, 1e+30, %v415_v54 }
 0x272   : > { %v459_v15 = vsel %vm378_vm2, %v455_v14, inf }
 0x273   : > { %460 = vmin.xlane.f32.xlu2 %v459_v15 }
 0x275   : > { %v447_v16 = vpop.xlane.xlu0 %446 }
 0x276   : > { %vm453_vm0 = vcmp.eq.f32.partialorder %v892_v40, %v447_v16  ;;  %v494_v52 = vsel %vm491_vm5, %v919_v56, %v447_v16 }
 0x277   : > { %v444_v17 = vpop.xlane.xlu2 %443  ;;  %v450_v18 = vpop.xlane.xlu1 %449  ;;  %v457_v19 = vsel %vm453_vm0, 1e+30, %v417_v59 }
 0x278   : > { %vm452_vm3 = vcmp.eq.f32.partialorder %v892_v40, %v444_v17  ;;  %vm454_vm4 = vcmp.eq.f32.partialorder %v892_v40, %v450_v18  ;;  %v465_v22 = vsel %vm378_vm2, %v457_v19, inf  ;;  %v493_v53 = vsel %vm491_vm5, %v925_v58, %v444_v17 }
 0x279   : > { %v456_v20 = vsel %vm452_vm3, 1e+30, %v416_v62  ;;  %v458_v21 = vsel %vm454_vm4, 1e+30, %v418_v61  ;;  %466 = vmin.xlane.f32.xlu1 %v465_v22  ;;  %v495_v59 = vsel %vm491_vm5, %v923_v57, %v450_v18 }
 0x27a   : > { %v462_v23 = vsel %vm378_vm2, %v456_v20, inf  ;;  %v468_v24 = vsel %vm378_vm2, %v458_v21, inf }
 0x27b   : > { %463 = vmin.xlane.f32.xlu0 %v462_v23  ;;  %469 = vmin.xlane.f32.xlu2 %v468_v24 }
 0x2e6   : > { %v461_v26 = vpop.xlane.xlu2 %460 }
 0x2e7   : > { %vm471_vm7 = vcmp.le.f32.partialorder %v455_v14, %v461_v26  ;;  %v513_v27 = vsel %vm496_vm6, %v509_v25, %v461_v26 }
 0x2e8   : > { %517 = vst.msk [vmem:[%s290_s12] sm:$0xff] %vm302_vm1, %v513_v27  ;;  %v475_v28 = vsel %vm471_vm7, %v892_v40, 16.0 }
 0x2e9   : > { %v479_v29 = vsel %vm378_vm2, %v475_v28, inf }
 0x2ea   : > { %480 = vmin.xlane.f32.xlu0 %v479_v29 }
 0x2ec   : > { %v467_v33 = vpop.xlane.xlu1 %466 }
 0x2ed   : > { %vm473_vm8 = vcmp.le.f32.partialorder %v457_v19, %v467_v33  ;;  %v515_v35 = vsel %vm496_vm6, %v511_v30, %v467_v33 }
 0x2ee   : > { %v464_v34 = vpop.xlane.xlu0 %463  ;;  %v470_v36 = vpop.xlane.xlu2 %469  ;;  %519 = vst.msk [vmem:[%s290_s12 + $0x10] sm:$0xff] %vm302_vm1, %v515_v35  ;;  %v477_v39 = vsel %vm473_vm8, %v892_v40, 16.0 }
 0x2ef   : > { %vm472_vm9 = vcmp.le.f32.partialorder %v456_v20, %v464_v34  ;;  %v514_v37 = vsel %vm496_vm6, %v510_v31, %v464_v34  ;;  %vm474_vm10 = vcmp.le.f32.partialorder %v458_v21, %v470_v36  ;;  %v516_v38 = vsel %vm496_vm6, %v512_v32, %v470_v36 }
 0x2f0   : > { %v476_v41 = vsel %vm472_vm9, %v892_v40, 16.0  ;;  %520 = vst.msk [vmem:[%s290_s12 + $0x18] sm:$0xff] %vm302_vm1, %v516_v38  ;;  %v485_v42 = vsel %vm378_vm2, %v477_v39, inf  ;;  %v478_v43 = vsel %vm474_vm10, %v892_v40, 16.0 }
 0x2f1   : > { %v482_v44 = vsel %vm378_vm2, %v476_v41, inf  ;;  %518 = vst.msk [vmem:[%s290_s12 + $0x8] sm:$0xff] %vm302_vm1, %v514_v37  ;;  %486 = vmin.xlane.f32.xlu2 %v485_v42  ;;  %v488_v45 = vsel %vm378_vm2, %v478_v43, inf }
 0x2f2   : > { %483 = vmin.xlane.f32.xlu1 %v482_v44  ;;  %489 = vmin.xlane.f32.xlu0 %v488_v45 }
 0x35d   : > { %v481_v47 = vpop.xlane.xlu0 %480 }
 0x35e   : > { %v497_v48 = vsel %vm496_vm6, %v492_v46, %v481_v47 }
 0x35f   : > { %vm707_vm11 = vcmp.lt.s32.totalorder %v497_v48, 0  ;;  %v708_v49 = vceil.f32 %v497_v48  ;;  %v709_v50 = vfloor.f32 %v497_v48 }
 0x361   : > { %v710_v40 = vsel %vm707_vm11, %v708_v49, %v709_v50 }
 0x362   : > { %v711_v51 = vcvt.f32.s32 %v710_v40 }
 0x364   : > { %505 = vst.msk [vmem:[%s280_s15] sm:$0xff] %vm302_vm1, %v711_v51  ;;  %v487_v54 = vpop.xlane.xlu2 %486 }
 0x365   : > { %v484_v55 = vpop.xlane.xlu1 %483  ;;  %v499_v60 = vsel %vm496_vm6, %v494_v52, %v487_v54  ;;  %v490_v62 = vpop.xlane.xlu0 %489 }
 0x366   : > { %v498_v61 = vsel %vm496_vm6, %v493_v53, %v484_v55  ;;  %vm717_vm2 = vcmp.lt.s32.totalorder %v499_v60, 0  ;;  %v718_v63 = vceil.f32 %v499_v60  ;;  %v719_v0 = vfloor.f32 %v499_v60 }
 0x367   : > { %vm712_vm12 = vcmp.lt.s32.totalorder %v498_v61, 0  ;;  %v713_v1 = vceil.f32 %v498_v61  ;;  %v714_v2 = vfloor.f32 %v498_v61  ;;  %v500_v56 = vsel %vm496_vm6, %v495_v59, %v490_v62 }
 0x368   : > { %v720_v3 = vsel %vm717_vm2, %v718_v63, %v719_v0  ;;  %vm722_vm13 = vcmp.lt.s32.totalorder %v500_v56, 0  ;;  %v723_v58 = vceil.f32 %v500_v56  ;;  %v724_v4 = vfloor.f32 %v500_v56 }
 0x369   : > { %v721_v5 = vcvt.f32.s32 %v720_v3  ;;  %v715_v6 = vsel %vm712_vm12, %v713_v1, %v714_v2 }
 0x36a   : > { %v716_v57 = vcvt.f32.s32 %v715_v6  ;;  %v725_v7 = vsel %vm722_vm13, %v723_v58, %v724_v4 }
 0x36b   : > { %507 = vst.msk [vmem:[%s280_s15 + $0x10] sm:$0xff] %vm302_vm1, %v721_v5  ;;  %v726_v8 = vcvt.f32.s32 %v725_v7 }
 0x36c   : > { %506 = vst.msk [vmem:[%s280_s15 + $0x8] sm:$0xff] %vm302_vm1, %v716_v57 }
 0x36d   : > { %508 = vst.msk [vmem:[%s280_s15 + $0x18] sm:$0xff] %vm302_vm1, %v726_v8 }
 0x36e PF: > { %s15_s19 = sadd.s32 1, %s806_s19   ;;  %s1018_s15 = smov %s798_s17 }
 0x36f   : > { %p12_p7 = scmp.ge.s32.totalorder %s15_s19, 6   ;;  %s1019_s16 = smov %s802_s18 }
 0x370   : > { %s1020_s17 = smov %s1023_s20  ;;  %s1021_s18 = smov %s1027_s21 }
 0x371   :  { %14 = sbr.rel (!%p12_p7) target bundleno = 3 (0x3), region = 80 }

// kernel: assanet_seg_forward.19
= control target key start
LH: loop header
LB: loop body
LE: loop exit
PB: predicated region body
PF: predicated region fallthrough
CT: control target
= control target key end

     0   :  { %s568_s18 = smov 0   ;;  %s623_s0 = inlined_call_operand.vmem [shape: bf16[128,32], index: 0, kind: input, shape index: {}]   ;;  %s624_s1 = inlined_call_operand.vmem [shape: bf16[32,32], index: 1, kind: input, shape index: {}]   ;;  %s625_s2 = inlined_call_operand.vmem [shape: f32[1,32], index: 2, kind: input, shape index: {}]   ;;  %s626_s3 = inlined_call_operand.vmem [shape: bf16[32,13], index: 3, kind: input, shape index: {}]   ;;  %s627_s4 = inlined_call_operand.vmem [shape: f32[1,13], index: 4, kind: input, shape index: {}]   ;;  %s628_s5 = inlined_call_operand.vmem [shape: f32[128,13], index: 5, kind: output, shape index: {}]  }
   0x1 LB: > { %s457_s19 = sadd.s32 4294967295, %s536_s18   ;;  %p461_p0 = scmp.ge.s32.totalorder %s536_s18, 1  ;;  %s536_s18 = sphi %s568_s18, %s15_s18  }
   0x2   : > { %p188_p1 = scmp.lt.s32.totalorder %s536_s18, 3 }
   0x4   : > { %p189_p2 = pnand %p461_p0, %p188_p1 }
   0x5   : > { %s462_s22 = sshll.u32 (!%p189_p2), %s457_s19, 3 }
   0x6   : > { %192 = sbr.rel (%p189_p2) target bundleno = 324 (0x144), region = 40  ;;  %p217_p3 = scmp.lt.s32.totalorder (!%p189_p2), %s462_s22, 15 }
   0xb   : > { %v513_v0 = vld [vmem:[%s624_s1 + $0x8] sm:$0xff]  ;;  %v512_v1 = vld [vmem:[%s624_s1] sm:$0xff]  ;;  %s630_s22 = smov (!%p217_p3, %s462_s22), 15  ;;  %vm277_vm0 = vcmask 261120   ;;  %vm392_vm1 = vcmask 105472  }
   0xc   : > { %296 = vmatpush.bf16.msra.mxu0 %v513_v0  ;;  %516 = vmatpush.bf16.msra.mxu2 %v513_v0  ;;  %s463_s25 = sshll.u32 %s630_s22, 2  ;;  %v515_v6 = vld [vmem:[%s626_s3 + $0x8] sm:$0xff]  ;;  %v514_v7 = vld [vmem:[%s626_s3] sm:$0xff]  ;;  %s465_s10 = sshll.u32 %s630_s22, 3 }
   0xd   : > { %s220_s28 = scalar_lea.vmem %s623_s0, %s463_s25  ;;  %369 = vmatpush.bf16.msra.mxu1 %v515_v6  ;;  %518 = vmatpush.bf16.msra.mxu3 %v515_v6  ;;  %v528_v9 = vld [vmem:[%s625_s2] ss:$0 sm:$0xff]  ;;  %s226_s15 = scalar_lea.vmem %s628_s5, %s465_s10 }
   0xe   : > { %v508_v2 = vld [vmem:[%s220_s28] sm:$0xff]  ;;  %v510_v3 = vld [vmem:[%s220_s28 + $0x10] sm:$0xff]  ;;  %v509_v4 = vld [vmem:[%s220_s28 + $0x8] sm:$0xff] }
   0xf   : > { %v511_v5 = vld [vmem:[%s220_s28 + $0x18] sm:$0xff]  ;;  %v529_v37 = vld [vmem:[%s627_s4] ss:$0 sm:$0xff] }
  0x10   : > { %297 = vmatpush.bf16.msra.mxu0 %v512_v1  ;;  %517 = vmatpush.bf16.msra.mxu2 %v512_v1 }
  0x11   : > { %370 = vmatpush.bf16.msra.mxu1 %v514_v7  ;;  %519 = vmatpush.bf16.msra.mxu3 %v514_v7 }
  0x13   : > { %490 = vmatmul.msk.bf16.vlgmr.msra.gmra.mxu0 %vm277_vm0, %v508_v2  ;;  %492 = vmatmul.msk.bf16.vlgmr.msra.gmra.mxu2 %vm277_vm0, %v510_v3 }
  0x23   : > { %491 = vmatmul.msk.bf16.gmra.mxu0 %vm277_vm0, %v509_v4  ;;  %493 = vmatmul.msk.bf16.gmra.mxu2 %vm277_vm0, %v511_v5 }
  0x90   : > { %v299_v8 = vpop.f32.mrf.mxu0 }
  0x91   : > { %v300_v10 = vadd.f32 %v528_v9, %v299_v8 }
  0x93   : > { %v319_v13 = vmax.f32 %v300_v10, 0.0 }
  0x96   : > { %v309_v11 = vpop.f32.mrf.mxu2 }
  0x97   : > { %v310_v16 = vadd.f32 %v528_v9, %v309_v11 }
  0x98   : > { %v301_v12 = vpop.f32.mrf.mxu0 }
  0x99   : > { %v302_v14 = vadd.f32 %v528_v9, %v301_v12  ;;  %v323_v21 = vmax.f32 %v310_v16, 0.0 }
  0x9b   : > { %v320_v15 = vmax.f32 %v302_v14, 0.0 }
  0x9d   : > { %v327_v17 = vpack.c.bf16 %v320_v15, %v319_v13 }
  0x9e   : > { %v311_v18 = vpop.f32.mrf.mxu2 }
  0x9f   : > { %v312_v19 = vadd.f32 %v528_v9, %v311_v18  ;;  %502 = vmatmul.msk.bf16.vlgmr.msra.gmra.mxu1 %vm277_vm0, %v327_v17 }
  0xa0   : > { %v304_v20 = vpop.f32.mrf.mxu0 }
  0xa1   : > { %v324_v22 = vmax.f32 %v312_v19, 0.0  ;;  %v305_v24 = vadd.f32 %v528_v9, %v304_v20 }
  0xa3   : > { %v329_v23 = vpack.c.bf16 %v324_v22, %v323_v21  ;;  %v321_v27 = vmax.f32 %v305_v24, 0.0 }
  0xa5   : > { %504 = vmatmul.msk.bf16.vlgmr.msra.gmra.mxu3 %vm277_vm0, %v329_v23 }
  0xa6   : > { %v314_v25 = vpop.f32.mrf.mxu2 }
  0xa7   : > { %v315_v30 = vadd.f32 %v528_v9, %v314_v25 }
  0xa8   : > { %v306_v26 = vpop.f32.mrf.mxu0 }
  0xa9   : > { %v307_v28 = vadd.f32 %v528_v9, %v306_v26  ;;  %v325_v34 = vmax.f32 %v315_v30, 0.0 }
  0xab   : > { %v322_v29 = vmax.f32 %v307_v28, 0.0 }
  0xad   : > { %v328_v31 = vpack.c.bf16 %v322_v29, %v321_v27 }
  0xae   : > { %v316_v32 = vpop.f32.mrf.mxu2 }
  0xaf   : > { %v317_v33 = vadd.f32 %v528_v9, %v316_v32  ;;  %503 = vmatmul.msk.bf16.gmra.mxu1 %vm277_vm0, %v328_v31 }
  0xb1   : > { %v326_v35 = vmax.f32 %v317_v33, 0.0 }
  0xb3   : > { %v330_v36 = vpack.c.bf16 %v326_v35, %v325_v34 }
  0xb5   : > { %505 = vmatmul.msk.bf16.gmra.mxu3 %vm277_vm0, %v330_v36 }
 0x11c   : > { %v372_v38 = vpop.f32.mrf.mxu1 }
 0x11d   : > { %v373_v39 = vadd.f32 %v529_v37, %v372_v38 }
 0x11f   : > { %393 = vst.msk [vmem:[%s226_s15] sm:$0xff] %vm392_vm1, %v373_v39 }
 0x124   : > { %v374_v40 = vpop.f32.mrf.mxu1 }
 0x125   : > { %v375_v41 = vadd.f32 %v529_v37, %v374_v40 }
 0x127   : > { %394 = vst.msk [vmem:[%s226_s15 + $0x8] sm:$0xff] %vm392_vm1, %v375_v41 }
 0x128   : > { %v382_v42 = vpop.f32.mrf.mxu3 }
 0x129   : > { %v383_v43 = vadd.f32 %v529_v37, %v382_v42 }
 0x12b   : > { %397 = vst.msk [vmem:[%s226_s15 + $0x20] sm:$0xff] %vm392_vm1, %v383_v43 }
 0x12c   : > { %v377_v44 = vpop.f32.mrf.mxu1 }
 0x12d   : > { %v378_v45 = vadd.f32 %v529_v37, %v377_v44 }
 0x12f   : > { %395 = vst.msk [vmem:[%s226_s15 + $0x10] sm:$0xff] %vm392_vm1, %v378_v45 }
 0x130   : > { %v384_v46 = vpop.f32.mrf.mxu3 }
 0x131   : > { %v385_v47 = vadd.f32 %v529_v37, %v384_v46 }
 0x133   : > { %398 = vst.msk [vmem:[%s226_s15 + $0x28] sm:$0xff] %vm392_vm1, %v385_v47 }
 0x134   : > { %v379_v48 = vpop.f32.mrf.mxu1 }
 0x135   : > { %v380_v49 = vadd.f32 %v529_v37, %v379_v48 }
 0x137   : > { %396 = vst.msk [vmem:[%s226_s15 + $0x18] sm:$0xff] %vm392_vm1, %v380_v49 }
 0x138   : > { %v387_v50 = vpop.f32.mrf.mxu3 }
 0x139   : > { %v388_v51 = vadd.f32 %v529_v37, %v387_v50 }
 0x13b   : > { %399 = vst.msk [vmem:[%s226_s15 + $0x30] sm:$0xff] %vm392_vm1, %v388_v51 }
 0x140   : > { %v389_v52 = vpop.f32.mrf.mxu3 }
 0x141   : > { %v390_v53 = vadd.f32 %v529_v37, %v389_v52 }
 0x143   : > { %400 = vst.msk [vmem:[%s226_s15 + $0x38] sm:$0xff] %vm392_vm1, %v390_v53 }
 0x144 PF: > { %s15_s18 = sadd.s32 1, %s536_s18  }
 0x145   : > { %p12_p4 = scmp.ge.s32.totalorder %s15_s18, 4  }
 0x147   :  { %14 = sbr.rel (!%p12_p4) target bundleno = 1 (0x1), region = 70 }

// kernel: assanet_seg_forward.18
= control target key start
LH: loop header
LB: loop body
LE: loop exit
PB: predicated region body
PF: predicated region fallthrough
CT: control target
= control target key end

     0   :  { %s2205_s27 = smov 0   ;;  %s2743_s0 = inlined_call_operand.vmem [shape: bf16[128,3,64], index: 0, kind: input, shape index: {}]   ;;  %s2744_s1 = inlined_call_operand.vmem [shape: f32[128,3], index: 1, kind: input, shape index: {}]   ;;  %s2745_s2 = inlined_call_operand.vmem [shape: bf16[128,16], index: 2, kind: input, shape index: {}]   ;;  %s2746_s3 = inlined_call_operand.vmem [shape: bf16[64,32], index: 3, kind: input, shape index: {}]   ;;  %s2747_s4 = inlined_call_operand.vmem [shape: bf16[16,32], index: 4, kind: input, shape index: {}]   ;;  %s2748_s5 = inlined_call_operand.vmem [shape: f32[1,32], index: 5, kind: input, shape index: {}]   ;;  %s2749_s6 = inlined_call_operand.vmem [shape: bf16[32,32], index: 6, kind: input, shape index: {}]   ;;  %s2750_s7 = inlined_call_operand.vmem [shape: f32[1,32], index: 7, kind: input, shape index: {}]   ;;  %s2751_s8 = inlined_call_operand.vmem [shape: bf16[128,32], index: 8, kind: output, shape index: {}]  }
   0x1 LB: > { %s2053_s28 = sadd.s32 4294967295, %s2158_s27   ;;  %p2057_p0 = scmp.ge.s32.totalorder %s2158_s27, 1  ;;  %s2158_s27 = sphi %s2205_s27, %s18_s27  }
   0x2   : > { %p285_p1 = scmp.lt.s32.totalorder %s2158_s27, 3 }
   0x4   : > { %p286_p2 = pnand %p2057_p0, %p285_p1 }
   0x5   : > { %s2060_s29 = sshll.u32 (!%p286_p2), %s2053_s28, 3  ;;  %s2058_s12 = sshll.u32 (!%p286_p2), %s2053_s28, 6 }
   0x6   : > { %289 = sbr.rel (%p286_p2) target bundleno = 624 (0x270), region = 52  ;;  %p336_p3 = scmp.lt.s32.totalorder (!%p286_p2), %s2060_s29, 15 }
   0x7   : > { %p330_p4 = scmp.lt.s32.totalorder (!%p286_p2), %s2058_s12, 127 }
   0xb   : > { %v491_v0 = vlaneseq  ;;  %s2753_s29 = smov (!%p336_p3, %s2060_s29), 15  ;;  %s2755_s12 = smov (!%p330_p4, %s2058_s12), 127  ;;  %vm1002_vm0 = vcmask 518144   ;;  %vm1729_vm1 = vcmask 1041409   ;;  %vm1731_vm2 = vcmask 1042434  }
   0xc   : > { %s2061_s30 = sshll.u32 %s2753_s29, 3  ;;  %s2059_s13 = sshll.u32 %s2755_s12, 1  ;;  %vm1733_vm3 = vcmask 1043459   ;;  %vm1559_vm4 = vcmask 130048   ;;  %vm1735_vm5 = vcmask 1044484   ;;  %vm1737_vm6 = vcmask 1045509  }
   0xd   : > { %v492_v1 = vshrl.u32 %v491_v0, 7  ;;  %s2221_s11 = scalar_lea.vmem %s2744_s1, %s2061_s30  ;;  %s2242_s16 = scalar_lea.vmem %s2743_s0, %s2059_s13  ;;  %vm1739_vm7 = vcmask 1046534   ;;  %vm1741_vm8 = vcmask 1047559   ;;  %vm1820_vm9 = vcmask 523264  }
   0xe   : > { %v483_v2 = vld [vmem:[%s2221_s11 + $0x8] sm:$0xff]  ;;  %v482_v3 = vld [vmem:[%s2221_s11] sm:$0xff]  ;;  %v484_v19 = vld [vmem:[%s2221_s11 + $0x10] sm:$0xff]  ;;  %s2063_s28 = sshll.u32 %s2753_s29, 2  ;;  %vm1906_vm10 = vcmask 261120   ;;  %vm1964_vm11 = vcmask 257024  }
   0xf   : > { %2149 = vset.pattern.permute.xlu2 %v492_v1  ;;  %2148 = vset.pattern.permute.xlu1 %v492_v1  ;;  %v546_v4 = vperm.slane %v483_v2, 0  ;;  %v504_v5 = vperm.slane %v482_v3, 2  ;;  %v490_v6 = vperm.slane %v482_v3, 0  ;;  %v553_v7 = vperm.slane %v483_v2, 1  ;;  %v485_v23 = vld [vmem:[%s2221_s11 + $0x18] sm:$0xff]  ;;  %v2230_v36 = vld [vmem:[%s2221_s11 + $0x20] sm:$0xff]  ;;  %s2413_s10 = scalar_lea.vmem %s2745_s2, %s2063_s28  ;;  %s2722_s21 = scalar_lea.vmem %s2751_s8, %s2063_s28 }
  0x10   : > { %2147 = vset.pattern.permute.xlu0 %v492_v1  ;;  %v560_v8 = vperm.slane %v483_v2, 2  ;;  %v497_v9 = vperm.slane %v482_v3, 1  ;;  %v567_v10 = vperm.slane %v483_v2, 3  ;;  %v518_v11 = vperm.slane %v482_v3, 4  ;;  %v2234_v40 = vld [vmem:[%s2221_s11 + $0x28] sm:$0xff] }
  0x11   : > { %v511_v12 = vperm.slane %v482_v3, 3  ;;  %v525_v13 = vperm.slane %v482_v3, 5  ;;  %v581_v14 = vperm.slane %v483_v2, 5  ;;  %v574_v15 = vperm.slane %v483_v2, 4  ;;  %v356_v44 = vld [vmem:[%s2242_s16 + $0x4] sm:$0x3] }
  0x12   : > { %v588_v16 = vperm.slane %v483_v2, 6  ;;  %v539_v17 = vperm.slane %v482_v3, 7  ;;  %v532_v18 = vperm.slane %v482_v3, 6  ;;  %v602_v20 = vperm.slane %v484_v19, 0  ;;  %v364_v49 = vld [vmem:[%s2242_s16 + $0x14] sm:$0x3] }
  0x13   : > { %v609_v21 = vperm.slane %v484_v19, 1  ;;  %v595_v22 = vperm.slane %v483_v2, 7  ;;  %v665_v24 = vperm.slane %v485_v23, 1  ;;  %v616_v25 = vperm.slane %v484_v19, 2  ;;  %v358_v58 = vld [vmem:[%s2242_s16 + $0x8] sm:$0x3] }
  0x14   : > { %v658_v26 = vperm.slane %v485_v23, 0  ;;  %v623_v27 = vperm.slane %v484_v19, 3  ;;  %v679_v28 = vperm.slane %v485_v23, 3  ;;  %v672_v29 = vperm.slane %v485_v23, 2 }
  0x15   : > { %v686_v30 = vperm.slane %v485_v23, 4  ;;  %v637_v31 = vperm.slane %v484_v19, 5  ;;  %v630_v32 = vperm.slane %v484_v19, 4  ;;  %v644_v33 = vperm.slane %v484_v19, 6 }
  0x16   : > { %v700_v34 = vperm.slane %v485_v23, 6  ;;  %v693_v35 = vperm.slane %v485_v23, 5  ;;  %v707_v37 = vperm.slane %v485_v23, 7  ;;  %v714_v38 = vperm.slane %v2230_v36, 0 }
  0x17   : > { %551 = vperm.xlu1 %2148, %v546_v4   ;;  %509 = vperm.xlu2 %2149, %v504_v5   ;;  %v651_v39 = vperm.slane %v484_v19, 7  ;;  %v770_v41 = vperm.slane %v2234_v40, 0  ;;  %v777_v42 = vperm.slane %v2234_v40, 1  ;;  %v721_v43 = vperm.slane %v2230_v36, 1 }
  0x18   : > { %495 = vperm.xlu0 %2147, %v490_v6   ;;  %v420_v46 = vunpack.c.l.bf16 %v356_v44  ;;  %v784_v47 = vperm.slane %v2234_v40, 2  ;;  %v735_v48 = vperm.slane %v2230_v36, 3  ;;  %v728_v50 = vperm.slane %v2230_v36, 2  ;;  %v362_v6 = vld [vmem:[%s2242_s16 + $0x10] sm:$0x3]  ;;  %v2275_v44 = vld [vmem:[%s2221_s11 + $0x38] sm:$0xff] }
  0x19   : > { %v428_v52 = vunpack.c.l.bf16 %v364_v49  ;;  %v742_v56 = vperm.slane %v2230_v36, 4  ;;  %v798_v57 = vperm.slane %v2234_v40, 4  ;;  %v791_v61 = vperm.slane %v2234_v40, 3  ;;  %v371_v49 = vld [vmem:[%s2242_s16 + $0x22] sm:$0x3] }
  0x1a   : > { %v422_v63 = vunpack.c.l.bf16 %v358_v58  ;;  %v805_v4 = vperm.slane %v2234_v40, 5  ;;  %v756_v5 = vperm.slane %v2230_v36, 6 }
  0x1f   : > { %558 = vperm.xlu1 %2148, %v553_v7   ;;  %565 = vperm.xlu2 %2149, %v560_v8   ;;  %v367_v7 = vld [vmem:[%s2242_s16 + $0x1a] sm:$0x3] }
  0x20   : > { %502 = vperm.xlu0 %2147, %v497_v9  }
  0x27   : > { %572 = vperm.xlu1 %2148, %v567_v10   ;;  %523 = vperm.xlu2 %2149, %v518_v11   ;;  %v749_v10 = vperm.slane %v2230_v36, 5  ;;  %v354_v11 = vld [vmem:[%s2242_s16] sm:$0x3] }
  0x28   : > { %516 = vperm.xlu0 %2147, %v511_v12  }
  0x2f   : > { %530 = vperm.xlu1 %2148, %v525_v13   ;;  %586 = vperm.xlu2 %2149, %v581_v14   ;;  %v426_v13 = vunpack.c.l.bf16 %v362_v6  ;;  %v431_v14 = vunpack.c.l.bf16 %v367_v7 }
  0x30   : > { %579 = vperm.xlu0 %2147, %v574_v15  }
  0x37   : > { %593 = vperm.xlu1 %2148, %v588_v16   ;;  %544 = vperm.xlu2 %2149, %v539_v17   ;;  %v418_v16 = vunpack.c.l.bf16 %v354_v11  ;;  %v896_v11 = vperm.slane %v2275_v44, 2 }
  0x38   : > { %537 = vperm.xlu0 %2147, %v532_v18  }
  0x3f   : > { %607 = vperm.xlu1 %2148, %v602_v20   ;;  %614 = vperm.xlu2 %2149, %v609_v21  }
  0x40   : > { %600 = vperm.xlu0 %2147, %v595_v22  }
  0x47   : > { %670 = vperm.xlu1 %2148, %v665_v24   ;;  %621 = vperm.xlu2 %2149, %v616_v25  }
  0x48   : > { %663 = vperm.xlu0 %2147, %v658_v26   ;;  %v763_v26 = vperm.slane %v2230_v36, 7 }
  0x4f   : > { %628 = vperm.xlu1 %2148, %v623_v27   ;;  %684 = vperm.xlu2 %2149, %v679_v28   ;;  %v819_v27 = vperm.slane %v2234_v40, 7  ;;  %v363_v28 = vld [vmem:[%s2242_s16 + $0x12] sm:$0x3] }
  0x50   : > { %677 = vperm.xlu0 %2147, %v672_v29   ;;  %v361_v29 = vld [vmem:[%s2242_s16 + $0xe] sm:$0x3] }
  0x57   : > { %691 = vperm.xlu1 %2148, %v686_v30   ;;  %642 = vperm.xlu2 %2149, %v637_v31  }
  0x58   : > { %635 = vperm.xlu0 %2147, %v630_v32  }
  0x5f   : > { %649 = vperm.xlu1 %2148, %v644_v33   ;;  %705 = vperm.xlu2 %2149, %v700_v34   ;;  %v812_v33 = vperm.slane %v2234_v40, 6  ;;  %v355_v34 = vld [vmem:[%s2242_s16 + $0x2] sm:$0x3] }
  0x60   : > { %698 = vperm.xlu0 %2147, %v693_v35   ;;  %v419_v40 = vunpack.c.l.bf16 %v355_v34 }
  0x67   : > { %712 = vperm.xlu1 %2148, %v707_v37   ;;  %719 = vperm.xlu2 %2149, %v714_v38  }
  0x68   : > { %656 = vperm.xlu0 %2147, %v651_v39  }
  0x6f   : > { %775 = vperm.xlu1 %2148, %v770_v41   ;;  %782 = vperm.xlu2 %2149, %v777_v42   ;;  %v427_v41 = vunpack.c.l.bf16 %v363_v28  ;;  %v425_v42 = vunpack.c.l.bf16 %v361_v29 }
  0x70   : > { %726 = vperm.xlu0 %2147, %v721_v43   ;;  %v2272_v43 = vld [vmem:[%s2221_s11 + $0x30] sm:$0xff] }
  0x71   : > { %v510_v45 = vpop.permute.xlu2 %509 }
  0x72   : > { %v940_v51 = vmul.f32 %v510_v45, %v420_v46  ;;  %v365_v45 = vld [vmem:[%s2242_s16 + $0x16] sm:$0x3] }
  0x74   : > { %v1017_v53 = vsel %vm1002_vm0, %v940_v51, 0.0 }
  0x75   : > { %v1018_v59 = vrot.slane %v1017_v53, 4 }
  0x77   : > { %789 = vperm.xlu1 %2148, %v784_v47   ;;  %740 = vperm.xlu2 %2149, %v735_v48   ;;  %v1019_v0 = vadd.f32 %v1018_v59, %v1017_v53 }
  0x78   : > { %733 = vperm.xlu0 %2147, %v728_v50  }
  0x79   : > { %v566_v54 = vpop.permute.xlu2 %565  ;;  %v1020_v8 = vrot.slane %v1019_v0, 2 }
  0x7a   : > { %v948_v55 = vmul.f32 %v566_v54, %v428_v52  ;;  %v833_v54 = vperm.slane %v2272_v43, 1 }
  0x7b   : > { %v1021_v17 = vadd.f32 %v1020_v8, %v1019_v0 }
  0x7c   : > { %v1073_v60 = vsel %vm1002_vm0, %v948_v55, 0.0  ;;  %v882_v55 = vperm.slane %v2275_v44, 0 }
  0x7d   : > { %v1074_v62 = vrot.slane %v1073_v60, 4  ;;  %v1022_v30 = vrot.slane %v1021_v17, 1 }
  0x7f   : > { %747 = vperm.xlu1 %2148, %v742_v56   ;;  %803 = vperm.xlu2 %2149, %v798_v57   ;;  %v1075_v2 = vadd.f32 %v1074_v62, %v1073_v60  ;;  %v1023_v50 = vadd.f32 %v1022_v30, %v1021_v17  ;;  %v826_v56 = vperm.slane %v2272_v43, 0  ;;  %v429_v57 = vunpack.c.l.bf16 %v365_v45  ;;  %v2293_v17 = vld [vmem:[%s2242_s16 + $0x24] sm:$0x3] }
  0x80   : > { %796 = vperm.xlu0 %2147, %v791_v61   ;;  %v435_v62 = vunpack.c.l.bf16 %v371_v49 }
  0x81   : > { %v524_v1 = vpop.permute.xlu2 %523  ;;  %v1076_v12 = vrot.slane %v1075_v2, 2 }
  0x82   : > { %v942_v3 = vmul.f32 %v524_v1, %v422_v63 }
  0x83   : > { %v1077_v20 = vadd.f32 %v1076_v12, %v1075_v2  ;;  %v2288_v12 = vld [vmem:[%s2242_s16 + $0xa] sm:$0x3] }
  0x84   : > { %v1031_v9 = vsel %vm1002_vm0, %v942_v3, 0.0  ;;  %v357_v3 = vld [vmem:[%s2242_s16 + $0x6] sm:$0x3] }
  0x85   : > { %v1032_v15 = vrot.slane %v1031_v9, 4  ;;  %v1078_v38 = vrot.slane %v1077_v20, 1 }
  0x87   : > { %810 = vperm.xlu1 %2148, %v805_v4   ;;  %761 = vperm.xlu2 %2149, %v756_v5   ;;  %v1033_v24 = vadd.f32 %v1032_v15, %v1031_v9  ;;  %v1079_v58 = vadd.f32 %v1078_v38, %v1077_v20  ;;  %v1453_v4 = vpack.c.bf16 %v1023_v50, %v1023_v50  ;;  %v421_v15 = vunpack.c.l.bf16 %v357_v3  ;;  %v2322_v3 = vld [vmem:[%s2242_s16 + $0xc] sm:$0x3] }
  0x88   : > { %754 = vperm.xlu0 %2147, %v749_v10   ;;  %v840_v10 = vperm.slane %v2272_v43, 2 }
  0x89   : > { %v552_v18 = vpop.permute.xlu1 %551  ;;  %v587_v19 = vpop.permute.xlu2 %586  ;;  %v1034_v46 = vrot.slane %v1033_v24, 2 }
  0x8a   : > { %v946_v21 = vmul.f32 %v552_v18, %v426_v13  ;;  %v951_v22 = vmul.f32 %v587_v19, %v431_v14  ;;  %v496_v23 = vpop.permute.xlu0 %495  ;;  %v1461_v13 = vpack.c.bf16 %v1079_v58, %v1079_v58  ;;  %v2296_v18 = vld [vmem:[%s2242_s16 + $0x18] sm:$0x3]  ;;  %v2316_v58 = vld [vmem:[%s2242_s16 + $0x36] sm:$0x3] }
  0x8b   : > { %v938_v25 = vmul.f32 %v496_v23, %v418_v16  ;;  %v1035_v63 = vadd.f32 %v1034_v46, %v1033_v24  ;;  %v889_v16 = vperm.slane %v2275_v44, 1  ;;  %v2298_v23 = vunpack.c.l.b16 %v1453_v4 }
  0x8c   : > { %v1059_v31 = vsel %vm1002_vm0, %v946_v21, 0.0  ;;  %v1094_v32 = vsel %vm1002_vm0, %v951_v22, 0.0 }
  0x8d   : > { %v1060_v35 = vrot.slane %v1059_v31, 4  ;;  %v1095_v37 = vrot.slane %v1094_v32, 4  ;;  %v1003_v36 = vsel %vm1002_vm0, %v938_v25, 0.0  ;;  %v1036_v19 = vrot.slane %v1035_v63, 1 }
  0x8e   : > { %v1004_v39 = vrot.slane %v1003_v36, 4 }
  0x8f   : > { %v1061_v47 = vadd.f32 %v1060_v35, %v1059_v31  ;;  %v1096_v48 = vadd.f32 %v1095_v37, %v1094_v32  ;;  %768 = vperm.xlu1 %2148, %v763_v26   ;;  %824 = vperm.xlu2 %2149, %v819_v27   ;;  %v423_v26 = vunpack.c.l.bf16 %v2288_v12  ;;  %v436_v31 = vunpack.c.l.bf16 %v2293_v17 }
  0x90   : > { %v1005_v51 = vadd.f32 %v1004_v39, %v1003_v36  ;;  %817 = vperm.xlu0 %2147, %v812_v33   ;;  %v430_v32 = vunpack.c.l.bf16 %v2296_v18  ;;  %v2303_v33 = vunpack.c.l.b16 %v1461_v13  ;;  %v1037_v38 = vadd.f32 %v1036_v19, %v1035_v63 }
  0x91   : > { %v559_v52 = vpop.permute.xlu1 %558  ;;  %v545_v53 = vpop.permute.xlu2 %544  ;;  %v1062_v0 = vrot.slane %v1061_v47, 2  ;;  %v1097_v1 = vrot.slane %v1096_v48, 2  ;;  %v424_v19 = vunpack.c.l.bf16 %v2322_v3  ;;  %v868_v3 = vperm.slane %v2272_v43, 6 }
  0x92   : > { %v947_v59 = vmul.f32 %v559_v52, %v427_v41  ;;  %v945_v60 = vmul.f32 %v545_v53, %v425_v42  ;;  %v503_v61 = vpop.permute.xlu0 %502  ;;  %v1006_v5 = vrot.slane %v1005_v51, 2  ;;  %v2127_v53 = vld [vmem:[%s2746_s3 + $0x18] sm:$0xff] }
  0x93   : > { %v939_v2 = vmul.f32 %v503_v61, %v419_v40  ;;  %v1063_v20 = vadd.f32 %v1062_v0, %v1061_v47  ;;  %v1098_v21 = vadd.f32 %v1097_v1, %v1096_v48  ;;  %v2308_v40 = vld [vmem:[%s2242_s16 + $0x1c] sm:$0x3]  ;;  %v847_v61 = vperm.slane %v2272_v43, 3  ;;  %1837 = vmatpush.bf16.msra.mxu1 %v2127_v53  ;;  %2135 = vmatpush.bf16.msra.mxu3 %v2127_v53 }
  0x94   : > { %v1066_v6 = vsel %vm1002_vm0, %v947_v59, 0.0  ;;  %v1052_v7 = vsel %vm1002_vm0, %v945_v60, 0.0  ;;  %v1007_v24 = vadd.f32 %v1006_v5, %v1005_v51  ;;  %v1455_v59 = vpack.c.bf16 %v1037_v38, %v1037_v38 }
  0x95   : > { %v1067_v8 = vrot.slane %v1066_v6, 4  ;;  %v1053_v9 = vrot.slane %v1052_v7, 4  ;;  %v1010_v14 = vsel %vm1002_vm0, %v939_v2, 0.0  ;;  %v1064_v39 = vrot.slane %v1063_v20, 1 }
  0x96   : > { %v1011_v25 = vrot.slane %v1010_v14, 4  ;;  %v1099_v41 = vrot.slane %v1098_v21, 1  ;;  %v1008_v45 = vrot.slane %v1007_v24, 1  ;;  %v910_v38 = vperm.slane %v2275_v44, 4 }
  0x97   : > { %v1068_v22 = vadd.f32 %v1067_v8, %v1066_v6  ;;  %838 = vperm.xlu1 %2148, %v833_v54   ;;  %887 = vperm.xlu2 %2149, %v882_v55   ;;  %v1054_v28 = vadd.f32 %v1053_v9, %v1052_v7  ;;  %v1065_v63 = vadd.f32 %v1064_v39, %v1063_v20  ;;  %v445_v9 = vunpack.c.l.bf16 %v2316_v58 }
  0x98   : > { %831 = vperm.xlu0 %2147, %v826_v56   ;;  %v1012_v34 = vadd.f32 %v1011_v25, %v1010_v14  ;;  %v903_v56 = vperm.slane %v2275_v44, 3  ;;  %v1100_v0 = vadd.f32 %v1099_v41, %v1098_v21  ;;  %v1009_v4 = vadd.f32 %v1008_v45, %v1007_v24 }
  0x99   : > { %v1069_v27 = vrot.slane %v1068_v22, 2  ;;  %v573_v29 = vpop.permute.xlu1 %572  ;;  %v615_v30 = vpop.permute.xlu2 %614  ;;  %v1055_v50 = vrot.slane %v1054_v28, 2  ;;  %v861_v20 = vperm.slane %v2272_v43, 5  ;;  %v1459_v21 = vpack.c.bf16 %v1065_v63, %v1065_v63 }
  0x9a   : > { %v949_v35 = vmul.f32 %v573_v29, %v429_v57  ;;  %v955_v37 = vmul.f32 %v615_v30, %v435_v62  ;;  %v517_v36 = vpop.permute.xlu0 %516  ;;  %v1013_v46 = vrot.slane %v1012_v34, 2  ;;  %v854_v57 = vperm.slane %v2272_v43, 4 }
  0x9b   : > { %v1070_v42 = vadd.f32 %v1069_v27, %v1068_v22  ;;  %v941_v55 = vmul.f32 %v517_v36, %v421_v15  ;;  %v432_v62 = vunpack.c.l.bf16 %v2308_v40  ;;  %v1056_v6 = vadd.f32 %v1055_v50, %v1054_v28  ;;  %v2334_v27 = vld [vmem:[%s2242_s16 + $0x20] sm:$0x3]  ;;  %v2352_v50 = vld [vmem:[%s2242_s16 + $0x1e] sm:$0x3] }
  0x9c   : > { %v1080_v47 = vsel %vm1002_vm0, %v949_v35, 0.0  ;;  %v1122_v48 = vsel %vm1002_vm0, %v955_v37, 0.0  ;;  %v1014_v54 = vadd.f32 %v1013_v46, %v1012_v34  ;;  %v1464_v22 = vpack.c.bf16 %v1100_v0, %v1100_v0  ;;  %v2125_v34 = vld [vmem:[%s2746_s3 + $0x8] sm:$0xff] }
  0x9d   : > { %v1071_v49 = vrot.slane %v1070_v42, 1  ;;  %v1081_v51 = vrot.slane %v1080_v47, 4  ;;  %v1123_v52 = vrot.slane %v1122_v48, 4  ;;  %v1024_v2 = vsel %vm1002_vm0, %v941_v55, 0.0 }
  0x9e   : > { %v1015_v12 = vrot.slane %v1014_v54, 1  ;;  %v1025_v13 = vrot.slane %v1024_v2, 4  ;;  %v1451_v28 = vpack.c.bf16 %v1009_v4, %v1009_v4  ;;  %v917_v30 = vperm.slane %v2275_v44, 5  ;;  %v2124_v4 = vld [vmem:[%s2746_s3] sm:$0xff] }
  0x9f   : > { %v1082_v60 = vadd.f32 %v1081_v51, %v1080_v47  ;;  %845 = vperm.xlu1 %2148, %v840_v10   ;;  %v1124_v1 = vadd.f32 %v1123_v52, %v1122_v48  ;;  %901 = vperm.xlu2 %2149, %v896_v11   ;;  %v1072_v5 = vadd.f32 %v1071_v49, %v1070_v42  ;;  %v2126_v10 = vld [vmem:[%s2746_s3 + $0x10] sm:$0xff]  ;;  %v434_v45 = vunpack.c.l.bf16 %v2334_v27 }
  0xa0   : > { %894 = vperm.xlu0 %2147, %v889_v16   ;;  %v2328_v16 = vunpack.c.l.b16 %v1455_v59  ;;  %v1026_v29 = vadd.f32 %v1025_v13, %v1024_v2  ;;  %1838 = vmatpush.bf16.msra.mxu1 %v2126_v10  ;;  %v1016_v37 = vadd.f32 %v1015_v12, %v1014_v54  ;;  %v1673_v46 = vunpack.c.l.b16 %v1459_v21  ;;  %v2132_v2 = vld [vmem:[%s2747_s4] sm:$0xff] }
  0xa1   : > { %v531_v7 = vpop.permute.xlu1 %530  ;;  %v622_v8 = vpop.permute.xlu2 %621  ;;  %v1083_v17 = vrot.slane %v1082_v60, 2  ;;  %v1125_v24 = vrot.slane %v1124_v1, 2  ;;  %2136 = vmatpush.bf16.msra.mxu3 %v2126_v10  ;;  %v1460_v35 = vpack.c.bf16 %v1072_v5, %v1072_v5  ;;  %v2348_v47 = vunpack.c.l.b16 %v1464_v22  ;;  %1579 = vmatpush.bf16.msra.mxu0 %v2132_v2  ;;  %v378_v2 = vld [vmem:[%s2242_s16 + $0x30] sm:$0x3] }
  0xa2   : > { %v943_v11 = vmul.f32 %v531_v7, %v423_v26  ;;  %v956_v14 = vmul.f32 %v622_v8, %v436_v31  ;;  %v580_v15 = vpop.permute.xlu0 %579  ;;  %v1057_v26 = vrot.slane %v1056_v6, 1  ;;  %v2338_v31 = vld [vmem:[%s2242_s16 + $0x2a] sm:$0x3]  ;;  %v1665_v51 = vunpack.c.l.b16 %v1451_v28 }
  0xa3   : > { %v1084_v39 = vadd.f32 %v1083_v17, %v1082_v60  ;;  %v950_v42 = vmul.f32 %v580_v15, %v430_v32  ;;  %v1126_v48 = vadd.f32 %v1125_v24, %v1124_v1  ;;  %v439_v49 = vunpack.c.l.bf16 %v2338_v31 }
  0xa4   : > { %v1038_v25 = vsel %vm1002_vm0, %v943_v11, 0.0  ;;  %v1129_v36 = vsel %vm1002_vm0, %v956_v14, 0.0  ;;  %v1058_v52 = vadd.f32 %v1057_v26, %v1056_v6  ;;  %v1027_v53 = vrot.slane %v1026_v29, 2  ;;  %1839 = vmatpush.bf16.msra.mxu1 %v2125_v34 }
  0xa5   : > { %v1039_v41 = vrot.slane %v1038_v25, 4  ;;  %v1130_v54 = vrot.slane %v1129_v36, 4  ;;  %2137 = vmatpush.bf16.msra.mxu3 %v2125_v34  ;;  %v1674_v32 = vunpack.c.l.b16 %v1460_v35  ;;  %v1087_v59 = vsel %vm1002_vm0, %v950_v42, 0.0 }
  0xa6   : > { %v1088_v0 = vrot.slane %v1087_v59, 4  ;;  %v433_v1 = vunpack.c.l.bf16 %v2352_v50  ;;  %v1127_v5 = vrot.slane %v1126_v48, 1  ;;  %v1458_v7 = vpack.c.bf16 %v1058_v52, %v1058_v52 }
  0xa7   : > { %908 = vperm.xlu1 %2148, %v903_v56   ;;  %859 = vperm.xlu2 %2149, %v854_v57   ;;  %v1452_v56 = vpack.c.bf16 %v1016_v37, %v1016_v37  ;;  %v1040_v63 = vadd.f32 %v1039_v41, %v1038_v25  ;;  %v1028_v8 = vadd.f32 %v1027_v53, %v1026_v29  ;;  %v875_v25 = vperm.slane %v2272_v43, 7 }
  0xa8   : > { %852 = vperm.xlu0 %2147, %v847_v61   ;;  %v1085_v61 = vrot.slane %v1084_v39, 1  ;;  %v1131_v10 = vadd.f32 %v1130_v54, %v1129_v36  ;;  %1840 = vmatpush.bf16.msra.mxu1 %v2124_v4  ;;  %v1743_v13 = vsel %vm1729_vm1, %v1674_v32, %v1673_v46  ;;  %v1128_v22 = vadd.f32 %v1127_v5, %v1126_v48 }
  0xa9   : > { %v594_v55 = vpop.permute.xlu1 %593  ;;  %v685_v18 = vpop.permute.xlu2 %684  ;;  %v1666_v11 = vunpack.c.l.b16 %v1452_v56  ;;  %2138 = vmatpush.bf16.msra.mxu3 %v2124_v4  ;;  %v1041_v58 = vrot.slane %v1040_v63, 2  ;;  %v1029_v28 = vrot.slane %v1028_v8, 1  ;;  %v384_v56 = vld [vmem:[%s2242_s16 + $0x3c] sm:$0x3] }
  0xaa   : > { %v952_v57 = vmul.f32 %v594_v55, %v432_v62  ;;  %v538_v60 = vpop.permute.xlu0 %537  ;;  %v965_v40 = vmul.f32 %v685_v18, %v445_v9  ;;  %v924_v62 = vperm.slane %v2275_v44, 6  ;;  %v1086_v17 = vadd.f32 %v1085_v61, %v1084_v39 }
  0xab   : > { %v944_v15 = vmul.f32 %v538_v60, %v424_v19  ;;  %v1089_v9 = vadd.f32 %v1088_v0, %v1087_v59  ;;  %v2379_v19 = vunpack.c.l.b16 %v1458_v7  ;;  %v1132_v26 = vrot.slane %v1131_v10, 2 }
  0xac   : > { %v1101_v6 = vsel %vm1002_vm0, %v952_v57, 0.0  ;;  %v1192_v14 = vsel %vm1002_vm0, %v965_v40, 0.0  ;;  %v1730_v43 = vsel %vm1729_vm1, %v1666_v11, %v1665_v51  ;;  %v1462_v39 = vpack.c.bf16 %v1086_v17, %v1086_v17 }
  0xad   : > { %v1102_v12 = vrot.slane %v1101_v6, 4  ;;  %v1193_v21 = vrot.slane %v1192_v14, 4  ;;  %v1045_v24 = vsel %vm1002_vm0, %v944_v15, 0.0  ;;  %v1042_v41 = vadd.f32 %v1041_v58, %v1040_v63 }
  0xae   : > { %v1046_v36 = vrot.slane %v1045_v24, 4  ;;  %v1090_v42 = vrot.slane %v1089_v9, 2  ;;  %v1468_v46 = vpack.c.bf16 %v1128_v22, %v1128_v22  ;;  %v1030_v53 = vadd.f32 %v1029_v28, %v1028_v8  ;;  %v373_v22 = vld [vmem:[%s2242_s16 + $0x26] sm:$0x3] }
  0xaf   : > { %866 = vperm.xlu1 %2148, %v861_v20   ;;  %922 = vperm.xlu2 %2149, %v917_v30   ;;  %v1103_v29 = vadd.f32 %v1102_v12, %v1101_v6  ;;  %v1744_v20 = vsel %vm1731_vm2, %v2303_v33, %v1743_v13  ;;  %v1194_v37 = vadd.f32 %v1193_v21, %v1192_v14  ;;  %v379_v33 = vld [vmem:[%s2242_s16 + $0x32] sm:$0x3]  ;;  %v1043_v59 = vrot.slane %v1042_v41, 1 }
  0xb0   : > { %915 = vperm.xlu0 %2147, %v910_v38   ;;  %v1047_v48 = vadd.f32 %v1046_v36, %v1045_v24  ;;  %v1133_v54 = vadd.f32 %v1132_v26, %v1131_v10  ;;  %v1091_v57 = vadd.f32 %v1090_v42, %v1089_v9  ;;  %v443_v61 = vunpack.c.l.bf16 %v379_v33 }
  0xb1   : > { %v608_v34 = vpop.permute.xlu1 %607  ;;  %v643_v35 = vpop.permute.xlu2 %642  ;;  %v1104_v55 = vrot.slane %v1103_v29, 2  ;;  %v1676_v63 = vunpack.c.l.b16 %v1462_v39  ;;  %v1732_v31 = vsel %vm1731_vm2, %v2298_v23, %v1730_v43  ;;  %v2396_v4 = vunpack.c.l.b16 %v1468_v46 }
  0xb2   : > { %v954_v30 = vmul.f32 %v608_v34, %v434_v45  ;;  %v601_v38 = vpop.permute.xlu0 %600  ;;  %v959_v52 = vmul.f32 %v643_v35, %v439_v49  ;;  %v1195_v45 = vrot.slane %v1194_v37, 2  ;;  %v1048_v18 = vrot.slane %v1047_v48, 2 }
  0xb3   : > { %v953_v32 = vmul.f32 %v601_v38, %v433_v1  ;;  %v1134_v5 = vrot.slane %v1133_v54, 1  ;;  %v1105_v1 = vadd.f32 %v1104_v55, %v1103_v29  ;;  %v448_v7 = vunpack.c.l.bf16 %v384_v56 }
  0xb4   : > { %v1115_v50 = vsel %vm1002_vm0, %v954_v30, 0.0  ;;  %v1150_v51 = vsel %vm1002_vm0, %v959_v52, 0.0  ;;  %v1196_v8 = vadd.f32 %v1195_v45, %v1194_v37  ;;  %v1049_v10 = vadd.f32 %v1048_v18, %v1047_v48  ;;  %v386_v37 = vld [vmem:[%s2242_s16 + $0x40] sm:$0x3] }
  0xb5   : > { %v1116_v27 = vrot.slane %v1115_v50, 4  ;;  %v1151_v49 = vrot.slane %v1150_v51, 4  ;;  %v1108_v0 = vsel %vm1002_vm0, %v953_v32, 0.0  ;;  %v1044_v23 = vadd.f32 %v1043_v59, %v1042_v41 }
  0xb6   : > { %v1109_v12 = vrot.slane %v1108_v0, 4  ;;  %v1092_v11 = vrot.slane %v1091_v57, 1  ;;  %v442_v15 = vunpack.c.l.bf16 %v378_v2  ;;  %v931_v21 = vperm.slane %v2275_v44, 7 }
  0xb7   : > { %v1117_v60 = vadd.f32 %v1116_v27, %v1115_v50  ;;  %929 = vperm.xlu1 %2148, %v924_v62   ;;  %880 = vperm.xlu2 %2149, %v875_v25   ;;  %v1454_v62 = vpack.c.bf16 %v1030_v53, %v1030_v53  ;;  %v1152_v17 = vadd.f32 %v1151_v49, %v1150_v51  ;;  %v1197_v29 = vrot.slane %v1196_v8, 1 }
  0xb8   : > { %873 = vperm.xlu0 %2147, %v868_v3   ;;  %v1110_v58 = vadd.f32 %v1109_v12, %v1108_v0  ;;  %v2401_v24 = vsel %vm1733_vm3, %v1676_v63, %v1744_v20  ;;  %v1135_v25 = vadd.f32 %v1134_v5, %v1133_v54  ;;  %v1106_v3 = vrot.slane %v1105_v1, 1  ;;  %v380_v5 = vld [vmem:[%s2242_s16 + $0x34] sm:$0x3] }
  0xb9   : > { %v671_v6 = vpop.permute.xlu1 %670  ;;  %v706_v40 = vpop.permute.xlu2 %705  ;;  %v1118_v14 = vrot.slane %v1117_v60, 2  ;;  %v1668_v26 = vunpack.c.l.b16 %v1454_v62  ;;  %v1050_v34 = vrot.slane %v1049_v10, 1  ;;  %v1456_v36 = vpack.c.bf16 %v1044_v23, %v1044_v23  ;;  %v2128_v62 = vld [vmem:[%s2413_s10] sm:$0xff] }
  0xba   : > { %v664_v13 = vpop.permute.xlu0 %663  ;;  %v963_v9 = vmul.f32 %v671_v6, %v443_v61  ;;  %v968_v28 = vmul.f32 %v706_v40, %v448_v7  ;;  %v1111_v35 = vrot.slane %v1110_v58, 2  ;;  %v437_v43 = vunpack.c.l.bf16 %v373_v22  ;;  %2086 = vmatmul.msk.bf16.vlgmr.msra.gmra.mxu0 %vm1559_vm4, %v2128_v62 }
  0xbb   : > { %v1119_v30 = vadd.f32 %v1118_v14, %v1117_v60  ;;  %v962_v38 = vmul.f32 %v664_v13, %v442_v15  ;;  %v1093_v39 = vadd.f32 %v1092_v11, %v1091_v57  ;;  %v1153_v41 = vrot.slane %v1152_v17, 2 }
  0xbc   : > { %v1112_v44 = vadd.f32 %v1111_v35, %v1110_v58  ;;  %v1178_v42 = vsel %vm1002_vm0, %v963_v9, 0.0  ;;  %v1469_v20 = vpack.c.bf16 %v1135_v25, %v1135_v25  ;;  %v1107_v46 = vadd.f32 %v1106_v3, %v1105_v1 }
  0xbd   : > { %v1213_v48 = vsel %vm1002_vm0, %v968_v28, 0.0  ;;  %v450_v33 = vunpack.c.l.bf16 %v386_v37  ;;  %v1198_v53 = vadd.f32 %v1197_v29, %v1196_v8  ;;  %v1051_v54 = vadd.f32 %v1050_v34, %v1049_v10 }
  0xbe   : > { %v1113_v55 = vrot.slane %v1112_v44, 1  ;;  %v1171_v27 = vsel %vm1002_vm0, %v962_v38, 0.0  ;;  %v1120_v18 = vrot.slane %v1119_v30, 1  ;;  %v1179_v51 = vrot.slane %v1178_v42, 4 }
  0xbf   : > { %v1734_v59 = vsel %vm1733_vm3, %v1668_v26, %v1732_v31  ;;  %v1463_v57 = vpack.c.bf16 %v1093_v39, %v1093_v39  ;;  %v1154_v60 = vadd.f32 %v1153_v41, %v1152_v17  ;;  %v1214_v61 = vrot.slane %v1213_v48, 4 }
  0xc0   : > { %936 = vperm.xlu0 %2147, %v931_v21   ;;  %v1670_v63 = vunpack.c.l.b16 %v1456_v36  ;;  %v1114_v49 = vadd.f32 %v1113_v55, %v1112_v44  ;;  %v1172_v0 = vrot.slane %v1171_v27, 4  ;;  %v2418_v1 = vunpack.c.l.b16 %v1469_v20 }
  0xc1   : > { %v629_v50 = vpop.permute.xlu1 %628  ;;  %v720_v52 = vpop.permute.xlu2 %719  ;;  %v1465_v6 = vpack.c.bf16 %v1107_v46, %v1107_v46  ;;  %v1478_v40 = vpack.c.bf16 %v1198_v53, %v1198_v53  ;;  %v1457_v8 = vpack.c.bf16 %v1051_v54, %v1051_v54  ;;  %v1121_v10 = vadd.f32 %v1120_v18, %v1119_v30 }
  0xc2   : > { %v678_v45 = vpop.permute.xlu0 %677  ;;  %v957_v32 = vmul.f32 %v629_v50, %v437_v43  ;;  %v970_v56 = vmul.f32 %v720_v52, %v450_v33  ;;  %v1180_v12 = vadd.f32 %v1179_v51, %v1178_v42  ;;  %v1677_v13 = vunpack.c.l.b16 %v1463_v57  ;;  %v382_v52 = vld [vmem:[%s2242_s16 + $0x38] sm:$0x3]  ;;  %v395_v33 = vld [vmem:[%s2242_s16 + $0x52] sm:$0x3]  ;;  %v374_v51 = vld [vmem:[%s2242_s16 + $0x28] sm:$0x3] }
  0xc3   : > { %v1155_v23 = vrot.slane %v1154_v60, 1  ;;  %v1215_v11 = vadd.f32 %v1214_v61, %v1213_v48  ;;  %v444_v14 = vunpack.c.l.bf16 %v380_v5  ;;  %v1466_v15 = vpack.c.bf16 %v1114_v49, %v1114_v49 }
  0xc4   : > { %v1136_v2 = vsel %vm1002_vm0, %v957_v32, 0.0  ;;  %v1227_v7 = vsel %vm1002_vm0, %v970_v56, 0.0  ;;  %v1173_v17 = vadd.f32 %v1172_v0, %v1171_v27  ;;  %v1679_v22 = vunpack.c.l.b16 %v1465_v6  ;;  %v376_v56 = vld [vmem:[%s2242_s16 + $0x2c] sm:$0x3] }
  0xc5   : > { %v1137_v31 = vrot.slane %v1136_v2, 4  ;;  %v1228_v58 = vrot.slane %v1227_v7, 4  ;;  %v2422_v25 = vunpack.c.l.b16 %v1478_v40  ;;  %v964_v3 = vmul.f32 %v678_v45, %v444_v14 }
  0xc6   : > { %v1671_v26 = vunpack.c.l.b16 %v1457_v8  ;;  %v1467_v29 = vpack.c.bf16 %v1121_v10, %v1121_v10  ;;  %v1181_v34 = vrot.slane %v1180_v12, 2  ;;  %v2425_v37 = vadd.f32 %v1155_v23, %v1154_v60 }
  0xc7   : > { %v1138_v35 = vadd.f32 %v1137_v31, %v1136_v2  ;;  %v1216_v36 = vrot.slane %v1215_v11, 2  ;;  %v1185_v30 = vsel %vm1002_vm0, %v964_v3, 0.0  ;;  %v1680_v38 = vunpack.c.l.b16 %v1466_v15  ;;  %v383_v31 = vld [vmem:[%s2242_s16 + $0x3a] sm:$0x3] }
  0xc8   : > { %v1174_v43 = vrot.slane %v1173_v17, 2  ;;  %v1229_v39 = vadd.f32 %v1228_v58, %v1227_v7  ;;  %v1736_v41 = vsel %vm1735_vm5, %v2328_v16, %v1734_v59  ;;  %v1746_v42 = vsel %vm1735_vm5, %v1677_v13, %v2401_v24 }
  0xc9   : > { %v692_v9 = vpop.permute.xlu1 %691  ;;  %v783_v21 = vpop.permute.xlu2 %782  ;;  %v1738_v44 = vsel %vm1737_vm6, %v1670_v63, %v1736_v41  ;;  %v1182_v20 = vadd.f32 %v1181_v34, %v1180_v12  ;;  %v1139_v46 = vrot.slane %v1138_v35, 2  ;;  %v1186_v48 = vrot.slane %v1185_v30, 4  ;;  %v389_v63 = vld [vmem:[%s2242_s16 + $0x46] sm:$0x3] }
  0xca   : > { %v636_v28 = vpop.permute.xlu0 %635  ;;  %v1740_v50 = vsel %vm1739_vm7, %v1671_v26, %v1738_v44  ;;  %v1681_v53 = vunpack.c.l.b16 %v1467_v29  ;;  %v1472_v16 = vpack.c.bf16 %v2425_v37, %v2425_v37  ;;  %v2438_v54 = vadd.f32 %v1216_v36, %v1215_v11 }
  0xcb   : > { %v1747_v55 = vsel %vm1737_vm6, %v2348_v47, %v1746_v42  ;;  %v1175_v27 = vadd.f32 %v1174_v43, %v1173_v17  ;;  %v1230_v24 = vrot.slane %v1229_v39, 2  ;;  %v1742_v45 = vsel %vm1741_vm8, %v2379_v19, %v1740_v50 }
  0xcc   : > { %v1748_v18 = vsel %vm1739_vm7, %v1679_v22, %v1747_v55  ;;  %v446_v60 = vunpack.c.l.bf16 %v382_v52  ;;  %v459_v61 = vunpack.c.l.bf16 %v395_v33  ;;  %v1183_v47 = vrot.slane %v1182_v20, 1 }
  0xcd   : > { %v1749_v57 = vsel %vm1741_vm8, %v1680_v38, %v1748_v18  ;;  %v1140_v0 = vadd.f32 %v1139_v46, %v1138_v35  ;;  %v1187_v2 = vadd.f32 %v1186_v48, %v1185_v30  ;;  %v438_v40 = vunpack.c.l.bf16 %v374_v51 }
  0xce   : > { %v1792_v5 = vpack.c.b16 %v1749_v57, %v1742_v45  ;;  %v966_v6 = vmul.f32 %v692_v9, %v446_v60  ;;  %v979_v19 = vmul.f32 %v783_v21, %v459_v61  ;;  %v440_v7 = vunpack.c.l.bf16 %v376_v56  ;;  %v385_v21 = vld [vmem:[%s2242_s16 + $0x3e] sm:$0x3] }
  0xcf   : > { %v1218_v62 = vrot.slane %v2438_v54, 1  ;;  %v1176_v8 = vrot.slane %v1175_v27, 1  ;;  %v1231_v10 = vadd.f32 %v1230_v24, %v1229_v39  ;;  %v453_v12 = vunpack.c.l.bf16 %v389_v63 }
  0xd0   : > { %2106 = vmatmul.msk.bf16.vlgmr.msra.gmra.mxu1 %vm1820_vm9, %v1792_v5  ;;  %v1199_v13 = vsel %vm1002_vm0, %v966_v6, 0.0  ;;  %v1290_v23 = vsel %vm1002_vm0, %v979_v19, 0.0  ;;  %v958_v11 = vmul.f32 %v636_v28, %v438_v40  ;;  %v1141_v15 = vrot.slane %v1140_v0, 1 }
  0xd1   : > { %v650_v32 = vpop.permute.xlu1 %649  ;;  %v741_v59 = vpop.permute.xlu2 %740  ;;  %v1188_v17 = vrot.slane %v1187_v2, 2  ;;  %v1200_v58 = vrot.slane %v1199_v13, 4  ;;  %v1291_v9 = vrot.slane %v1290_v23, 4  ;;  %v1184_v22 = vadd.f32 %v1183_v47, %v1182_v20 }
  0xd2   : > { %v699_v49 = vpop.permute.xlu0 %698  ;;  %v960_v14 = vmul.f32 %v650_v32, %v440_v7  ;;  %v1143_v3 = vsel %vm1002_vm0, %v958_v11, 0.0  ;;  %v447_v29 = vunpack.c.l.bf16 %v383_v31  ;;  %v1177_v34 = vadd.f32 %v1176_v8, %v1175_v27  ;;  %v398_v32 = vld [vmem:[%s2242_s16 + $0x58] sm:$0x3] }
  0xd3   : > { %v1201_v35 = vadd.f32 %v1200_v58, %v1199_v13  ;;  %v1144_v36 = vrot.slane %v1143_v3, 4  ;;  %v973_v30 = vmul.f32 %v741_v59, %v453_v12  ;;  %v1232_v39 = vrot.slane %v1231_v10, 1 }
  0xd4   : > { %v1157_v26 = vsel %vm1002_vm0, %v960_v14, 0.0  ;;  %v1292_v28 = vadd.f32 %v1291_v9, %v1290_v23  ;;  %v967_v41 = vmul.f32 %v699_v49, %v447_v29  ;;  %v449_v44 = vunpack.c.l.bf16 %v385_v21  ;;  %v377_v21 = vld [vmem:[%s2242_s16 + $0x2e] sm:$0x3] }
  0xd5   : > { %v1750_v20 = vsel %vm1729_vm1, %v2396_v4, %v1681_v53  ;;  %v1142_v46 = vadd.f32 %v1141_v15, %v1140_v0  ;;  %v1189_v48 = vadd.f32 %v1188_v17, %v1187_v2  ;;  %v1158_v50 = vrot.slane %v1157_v26, 4 }
  0xd6   : > { %v1202_v52 = vrot.slane %v1201_v35, 2  ;;  %v1145_v33 = vadd.f32 %v1144_v36, %v1143_v3  ;;  %v1206_v55 = vsel %vm1002_vm0, %v967_v41, 0.0  ;;  %v1476_v24 = vpack.c.bf16 %v1184_v22, %v1184_v22  ;;  %v394_v22 = vld [vmem:[%s2242_s16 + $0x50] sm:$0x3]  ;;  %v387_v41 = vld [vmem:[%s2242_s16 + $0x42] sm:$0x3] }
  0xd7   : > { %v1219_v45 = vadd.f32 %v1218_v62, %v2438_v54  ;;  %v1475_v18 = vpack.c.bf16 %v1177_v34, %v1177_v34  ;;  %v1248_v51 = vsel %vm1002_vm0, %v973_v30, 0.0  ;;  %v1233_v56 = vadd.f32 %v1232_v39, %v1231_v10  ;;  %v392_v30 = vld [vmem:[%s2242_s16 + $0x4c] sm:$0x3] }
  0xd8   : > { %v1293_v59 = vrot.slane %v1292_v28, 2  ;;  %v1207_v57 = vrot.slane %v1206_v55, 4  ;;  %v1470_v53 = vpack.c.bf16 %v1142_v46, %v1142_v46  ;;  %v1190_v60 = vrot.slane %v1189_v48, 1 }
  0xd9   : > { %v713_v38 = vpop.permute.xlu1 %712  ;;  %v804_v43 = vpop.permute.xlu2 %803  ;;  %v1159_v61 = vadd.f32 %v1158_v50, %v1157_v26  ;;  %v1203_v49 = vadd.f32 %v1202_v52, %v1201_v35  ;;  %v1146_v47 = vrot.slane %v1145_v33, 2  ;;  %v1249_v0 = vrot.slane %v1248_v51, 4 }
  0xda   : > { %v2457_v42 = vpop.permute.xlu0 %656  ;;  %v969_v27 = vmul.f32 %v713_v38, %v449_v44  ;;  %v462_v2 = vunpack.c.l.bf16 %v398_v32  ;;  %v1690_v5 = vunpack.c.l.b16 %v1476_v24  ;;  %v1481_v6 = vpack.c.bf16 %v1219_v45, %v1219_v45  ;;  %v396_v32 = vld [vmem:[%s2242_s16 + $0x54] sm:$0x3] }
  0xdb   : > { %v1689_v54 = vunpack.c.l.b16 %v1475_v18  ;;  %v1208_v19 = vadd.f32 %v1207_v57, %v1206_v55  ;;  %v1483_v62 = vpack.c.bf16 %v1233_v56, %v1233_v56  ;;  %v1294_v8 = vadd.f32 %v1293_v59, %v1292_v28 }
  0xdc   : > { %v1220_v4 = vsel %vm1002_vm0, %v969_v27, 0.0  ;;  %v982_v12 = vmul.f32 %v804_v43, %v462_v2  ;;  %v2469_v13 = vunpack.c.l.b16 %v1472_v16  ;;  %v1684_v23 = vunpack.c.l.b16 %v1470_v53 }
  0xdd   : > { %v1221_v63 = vrot.slane %v1220_v4, 4  ;;  %v2471_v11 = vadd.f32 %v1190_v60, %v1189_v48  ;;  %v1160_v14 = vrot.slane %v1159_v61, 2  ;;  %v1204_v15 = vrot.slane %v1203_v49, 1 }
  0xde   : > { %v1147_v17 = vadd.f32 %v1146_v47, %v1145_v33  ;;  %v1250_v58 = vadd.f32 %v1249_v0, %v1248_v51  ;;  %v1311_v9 = vsel %vm1002_vm0, %v982_v12, 0.0  ;;  %v2476_v3 = vunpack.c.l.b16 %v1481_v6  ;;  %v388_v47 = vld [vmem:[%s2242_s16 + $0x44] sm:$0x3] }
  0xdf   : > { %v1222_v10 = vadd.f32 %v1221_v63, %v1220_v4  ;;  %v2479_v26 = vsel %vm1729_vm1, %v1690_v5, %v1689_v54  ;;  %v1751_v37 = vsel %vm1731_vm2, %v2418_v1, %v1750_v20  ;;  %v1209_v16 = vrot.slane %v1208_v19, 2 }
  0xe0   : > { %v2483_v29 = vunpack.c.l.b16 %v1483_v62  ;;  %v1295_v34 = vrot.slane %v1294_v8, 1  ;;  %v1312_v36 = vrot.slane %v1311_v9, 4  ;;  %v2487_v38 = vsel %vm1733_vm3, %v1684_v23, %v1751_v37 }
  0xe1   : > { %v776_v40 = vpop.permute.xlu1 %775  ;;  %v762_v7 = vpop.permute.xlu2 %761  ;;  %v1223_v35 = vrot.slane %v1222_v10, 2  ;;  %v1161_v43 = vadd.f32 %v1160_v14, %v1159_v61  ;;  %v441_v39 = vunpack.c.l.bf16 %v377_v21  ;;  %v458_v28 = vunpack.c.l.bf16 %v394_v22 }
  0xe2   : > { %v727_v31 = vpop.permute.xlu0 %726  ;;  %v1477_v44 = vpack.c.bf16 %v2471_v11, %v2471_v11  ;;  %v2492_v46 = vadd.f32 %v1204_v15, %v1203_v49  ;;  %v1148_v1 = vrot.slane %v1147_v17, 1  ;;  %v1251_v20 = vrot.slane %v1250_v58, 2  ;;  %v401_v49 = vld [vmem:[%s2242_s16 + $0x5e] sm:$0x3] }
  0xe3   : > { %v1210_v48 = vadd.f32 %v1209_v16, %v1208_v19  ;;  %v961_v50 = vmul.f32 %v2457_v42, %v441_v39  ;;  %v978_v52 = vmul.f32 %v776_v40, %v458_v28  ;;  %v456_v33 = vunpack.c.l.bf16 %v392_v30 }
  0xe4   : > { %v2495_v24 = vadd.f32 %v1295_v34, %v1294_v8  ;;  %v1224_v45 = vadd.f32 %v1223_v35, %v1222_v10  ;;  %v1313_v18 = vadd.f32 %v1312_v36, %v1311_v9  ;;  %v451_v51 = vunpack.c.l.bf16 %v387_v41 }
  0xe5   : > { %v1162_v59 = vrot.slane %v1161_v43, 1  ;;  %v1164_v57 = vsel %vm1002_vm0, %v961_v50, 0.0  ;;  %v1283_v4 = vsel %vm1002_vm0, %v978_v52, 0.0  ;;  %v976_v53 = vmul.f32 %v762_v7, %v456_v33  ;;  %v2129_v52 = vld [vmem:[%s2413_s10 + $0x8] sm:$0xff] }
  0xe6   : > { %v1149_v42 = vadd.f32 %v1148_v1, %v1147_v17  ;;  %v2500_v60 = vadd.f32 %v1251_v20, %v1250_v58  ;;  %v1165_v61 = vrot.slane %v1164_v57, 4  ;;  %v1284_v63 = vrot.slane %v1283_v4, 4  ;;  %2087 = vmatmul.msk.bf16.gmra.mxu0 %vm1559_vm4, %v2129_v52  ;;  %v399_v52 = vld [vmem:[%s2242_s16 + $0x5a] sm:$0x3] }
  0xe7   : > { %v1211_v0 = vrot.slane %v1210_v48, 1  ;;  %v1269_v2 = vsel %vm1002_vm0, %v976_v53, 0.0  ;;  %v971_v5 = vmul.f32 %v727_v31, %v451_v51  ;;  %v460_v6 = vunpack.c.l.bf16 %v396_v32 }
  0xe8   : > { %v1225_v54 = vrot.slane %v1224_v45, 1  ;;  %v1314_v19 = vrot.slane %v1313_v18, 2  ;;  %v1166_v40 = vadd.f32 %v1165_v61, %v1164_v57  ;;  %v1285_v62 = vadd.f32 %v1284_v63, %v1283_v4 }
  0xe9   : > { %v790_v55 = vpop.permute.xlu1 %789  ;;  %v825_v27 = vpop.permute.xlu2 %824  ;;  %v1234_v8 = vsel %vm1002_vm0, %v971_v5, 0.0  ;;  %v465_v7 = vunpack.c.l.bf16 %v401_v49  ;;  %v452_v12 = vunpack.c.l.bf16 %v388_v47  ;;  %v1163_v23 = vadd.f32 %v1162_v59, %v1161_v43 }
  0xea   : > { %v734_v56 = vpop.permute.xlu0 %733  ;;  %v980_v10 = vmul.f32 %v790_v55, %v460_v6  ;;  %v1167_v11 = vrot.slane %v1166_v40, 2  ;;  %v1286_v14 = vrot.slane %v1285_v62, 2  ;;  %v1270_v15 = vrot.slane %v1269_v2, 4 }
  0xeb   : > { %v1235_v17 = vrot.slane %v1234_v8, 4  ;;  %v985_v9 = vmul.f32 %v825_v27, %v465_v7  ;;  %v972_v21 = vmul.f32 %v734_v56, %v452_v12  ;;  %v1471_v22 = vpack.c.bf16 %v1149_v42, %v1149_v42  ;;  %v397_v7 = vld [vmem:[%s2242_s16 + $0x56] sm:$0x3] }
  0xec   : > { %v1297_v58 = vsel %vm1002_vm0, %v980_v10, 0.0  ;;  %v1212_v37 = vadd.f32 %v1211_v0, %v1210_v48  ;;  %v1226_v16 = vadd.f32 %v1225_v54, %v1224_v45  ;;  %v1168_v34 = vadd.f32 %v1167_v11, %v1166_v40  ;;  %v390_v54 = vld [vmem:[%s2242_s16 + $0x48] sm:$0x3]  ;;  %v410_v10 = vld [vmem:[%s2242_s16 + $0x70] sm:$0x3] }
  0xed   : > { %v1315_v36 = vadd.f32 %v1314_v19, %v1313_v18  ;;  %v1236_v30 = vadd.f32 %v1235_v17, %v1234_v8  ;;  %v1298_v43 = vrot.slane %v1297_v58, 4  ;;  %v1241_v39 = vsel %vm1002_vm0, %v972_v21, 0.0 }
  0xee   : > { %v1169_v41 = vrot.slane %v1168_v34, 1  ;;  %v1287_v1 = vadd.f32 %v1286_v14, %v1285_v62  ;;  %v1271_v20 = vadd.f32 %v1270_v15, %v1269_v2  ;;  %v1332_v50 = vsel %vm1002_vm0, %v985_v9, 0.0 }
  0xef   : > { %v1691_v33 = vunpack.c.l.b16 %v1477_v44  ;;  %v1479_v48 = vpack.c.bf16 %v2492_v46, %v2492_v46  ;;  %v1237_v55 = vrot.slane %v1236_v30, 2  ;;  %v1242_v27 = vrot.slane %v1241_v39, 4 }
  0xf0   : > { %v1492_v45 = vpack.c.bf16 %v2495_v24, %v2495_v24  ;;  %v1685_v18 = vunpack.c.l.b16 %v1471_v22  ;;  %v1253_v51 = vrot.slane %v2500_v60, 1  ;;  %v1170_v32 = vadd.f32 %v1169_v41, %v1168_v34 }
  0xf1   : > { %v2507_v31 = vpop.permute.xlu1 %747  ;;  %v888_v28 = vpop.permute.xlu2 %887  ;;  %v1473_v56 = vpack.c.bf16 %v1163_v23, %v1163_v23  ;;  %v1480_v59 = vpack.c.bf16 %v1212_v37, %v1212_v37  ;;  %v1299_v57 = vadd.f32 %v1298_v43, %v1297_v58  ;;  %v1333_v4 = vrot.slane %v1332_v50, 4 }
  0xf2   : > { %v2509_v35 = vpop.permute.xlu0 %796  ;;  %v1482_v44 = vpack.c.bf16 %v1226_v16, %v1226_v16  ;;  %v1316_v53 = vrot.slane %v1315_v36, 1  ;;  %v1288_v42 = vrot.slane %v1287_v1, 1  ;;  %v1272_v46 = vrot.slane %v1271_v20, 2 }
  0xf3   : > { %v1758_v61 = vsel %vm1731_vm2, %v1691_v33, %v2479_v26  ;;  %v1474_v24 = vpack.c.bf16 %v1170_v32, %v1170_v32  ;;  %v1238_v63 = vadd.f32 %v1237_v55, %v1236_v30  ;;  %v1243_v49 = vadd.f32 %v1242_v27, %v1241_v39  ;;  %v412_v33 = vld [vmem:[%s2242_s16 + $0x74] sm:$0x3]  ;;  %v391_v27 = vld [vmem:[%s2242_s16 + $0x4a] sm:$0x3] }
  0xf4   : > { %v1693_v0 = vunpack.c.l.b16 %v1479_v48  ;;  %v2524_v2 = vunpack.c.l.b16 %v1492_v45  ;;  %v2527_v5 = vadd.f32 %v1253_v51, %v2500_v60  ;;  %v1753_v6 = vsel %vm1735_vm5, %v1685_v18, %v2487_v38 }
  0xf5   : > { %v1687_v40 = vunpack.c.l.b16 %v1473_v56  ;;  %v1694_v62 = vunpack.c.l.b16 %v1480_v59  ;;  %v1300_v26 = vrot.slane %v1299_v57, 2  ;;  %v1334_v8 = vadd.f32 %v1333_v4, %v1332_v50  ;;  %v393_v59 = vld [vmem:[%s2242_s16 + $0x4e] sm:$0x3] }
  0xf6   : > { %v1696_v12 = vunpack.c.l.b16 %v1482_v44  ;;  %v2534_v23 = vadd.f32 %v1316_v53, %v1315_v36  ;;  %v2536_v11 = vadd.f32 %v1288_v42, %v1287_v1  ;;  %v1273_v14 = vadd.f32 %v1272_v46, %v1271_v20 }
  0xf7   : > { %v1688_v15 = vunpack.c.l.b16 %v1474_v24  ;;  %v1239_v60 = vrot.slane %v1238_v63, 1  ;;  %v1244_v17 = vrot.slane %v1243_v49, 2  ;;  %v1754_v38 = vsel %vm1737_vm6, %v2469_v13, %v1753_v6 }
  0xf8   : > { %v1759_v9 = vsel %vm1733_vm3, %v2422_v25, %v1758_v61  ;;  %v454_v21 = vunpack.c.l.bf16 %v390_v54  ;;  %v474_v22 = vunpack.c.l.bf16 %v410_v10  ;;  %v461_v37 = vunpack.c.l.bf16 %v397_v7 }
  0xf9   : > { %v2522_v47 = vpop.permute.xlu1 %810  ;;  %v902_v58 = vpop.permute.xlu2 %901  ;;  %v1301_v16 = vadd.f32 %v1300_v26, %v1299_v57  ;;  %v1335_v34 = vrot.slane %v1334_v8, 2  ;;  %v1755_v36 = vsel %vm1739_vm7, %v1687_v40, %v1754_v38  ;;  %v1760_v30 = vsel %vm1735_vm5, %v1693_v0, %v1759_v9 }
  0xfa   : > { %v755_v19 = vpop.permute.xlu0 %754  ;;  %v1761_v43 = vsel %vm1737_vm6, %v1694_v62, %v1760_v30  ;;  %v974_v13 = vmul.f32 %v2507_v31, %v454_v21  ;;  %v994_v39 = vmul.f32 %v888_v28, %v474_v22  ;;  %v981_v41 = vmul.f32 %v2509_v35, %v461_v37 }
  0xfb   : > { %v1491_v25 = vpack.c.bf16 %v2536_v11, %v2536_v11  ;;  %v1274_v1 = vrot.slane %v1273_v14, 1  ;;  %v1245_v20 = vadd.f32 %v1244_v17, %v1243_v49  ;;  %v1756_v50 = vsel %vm1741_vm8, %v1688_v15, %v1755_v36 }
  0xfc   : > { %v1762_v55 = vsel %vm1739_vm7, %v2476_v3, %v1761_v43  ;;  %v1255_v31 = vsel %vm1002_vm0, %v974_v13, 0.0  ;;  %v1395_v28 = vsel %vm1002_vm0, %v994_v39, 0.0  ;;  %v1304_v35 = vsel %vm1002_vm0, %v981_v41, 0.0  ;;  %v406_v3 = vld [vmem:[%s2242_s16 + $0x68] sm:$0x3] }
  0xfd   : > { %v1240_v18 = vadd.f32 %v1239_v60, %v1238_v63  ;;  %v1302_v51 = vrot.slane %v1301_v16, 1  ;;  %v1336_v32 = vadd.f32 %v1335_v34, %v1334_v8  ;;  %v1763_v56 = vsel %vm1741_vm8, %v1696_v12, %v1762_v55 }
  0xfe   : > { %v1793_v57 = vpack.c.b16 %v1763_v56, %v1756_v50  ;;  %v1256_v4 = vrot.slane %v1255_v31, 4  ;;  %v1396_v44 = vrot.slane %v1395_v28, 4  ;;  %v1305_v53 = vrot.slane %v1304_v35, 4 }
  0xff   : > { %v1246_v42 = vrot.slane %v1245_v20, 1  ;;  %v463_v46 = vunpack.c.l.bf16 %v399_v52  ;;  %v476_v61 = vunpack.c.l.bf16 %v412_v33  ;;  %v455_v24 = vunpack.c.l.bf16 %v391_v27 }
 0x100   : > { %2107 = vmatmul.msk.bf16.vlgmr.msra.gmra.mxu3 %vm1820_vm9, %v1793_v57  ;;  %v1257_v49 = vadd.f32 %v1256_v4, %v1255_v31  ;;  %v1397_v0 = vadd.f32 %v1396_v44, %v1395_v28  ;;  %v1306_v6 = vadd.f32 %v1305_v53, %v1304_v35  ;;  %v457_v63 = vunpack.c.l.bf16 %v393_v59  ;;  %v400_v59 = vld [vmem:[%s2242_s16 + $0x5c] sm:$0x3]  ;;  %v403_v57 = vld [vmem:[%s2242_s16 + $0x62] sm:$0x3] }
 0x101   : > { %v769_v48 = vpop.permute.xlu1 %768  ;;  %v983_v54 = vmul.f32 %v2522_v47, %v463_v46  ;;  %v996_v40 = vmul.f32 %v902_v58, %v476_v61  ;;  %v975_v62 = vmul.f32 %v755_v19, %v455_v24  ;;  %v860_v26 = vpop.permute.xlu2 %859  ;;  %v470_v8 = vunpack.c.l.bf16 %v406_v3 }
 0x102   : > { %v2558_v45 = vpop.permute.xlu0 %817  ;;  %v1303_v10 = vadd.f32 %v1302_v51, %v1301_v16  ;;  %v1258_v7 = vrot.slane %v1257_v49, 2  ;;  %v1398_v12 = vrot.slane %v1397_v0, 2  ;;  %v1307_v11 = vrot.slane %v1306_v6, 2 }
 0x103   : > { %v1275_v15 = vadd.f32 %v1274_v1, %v1273_v14  ;;  %v1484_v60 = vpack.c.bf16 %v1240_v18, %v1240_v18  ;;  %v1337_v17 = vrot.slane %v1336_v32, 1  ;;  %v1262_v38 = vsel %vm1002_vm0, %v975_v62, 0.0 }
 0x104   : > { %v1318_v21 = vsel %vm1002_vm0, %v983_v54, 0.0  ;;  %v1409_v22 = vsel %vm1002_vm0, %v996_v40, 0.0  ;;  %v977_v37 = vmul.f32 %v769_v48, %v457_v63  ;;  %v990_v47 = vmul.f32 %v860_v26, %v470_v8 }
 0x105   : > { %v1247_v19 = vadd.f32 %v1246_v42, %v1245_v20  ;;  %v1259_v34 = vadd.f32 %v1258_v7, %v1257_v49  ;;  %v1399_v16 = vadd.f32 %v1398_v12, %v1397_v0  ;;  %v1263_v36 = vrot.slane %v1262_v38, 4 }
 0x106   : > { %v1486_v14 = vpack.c.bf16 %v2527_v5, %v2527_v5  ;;  %v1495_v30 = vpack.c.bf16 %v2534_v23, %v2534_v23  ;;  %v1493_v43 = vpack.c.bf16 %v1303_v10, %v1303_v10  ;;  %v1308_v13 = vadd.f32 %v1307_v11, %v1306_v6  ;;  %v415_v6 = vld [vmem:[%s2242_s16 + $0x7a] sm:$0x3] }
 0x107   : > { %v1705_v39 = vunpack.c.l.b16 %v1491_v25  ;;  %v1489_v41 = vpack.c.bf16 %v1275_v15, %v1275_v15  ;;  %v1319_v1 = vrot.slane %v1318_v21, 4  ;;  %v1410_v50 = vrot.slane %v1409_v22, 4 }
 0x108   : > { %v1698_v52 = vunpack.c.l.b16 %v1484_v60  ;;  %v1338_v33 = vadd.f32 %v1337_v17, %v1336_v32  ;;  %v1276_v20 = vsel %vm1002_vm0, %v977_v37, 0.0  ;;  %v1367_v48 = vsel %vm1002_vm0, %v990_v47, 0.0 }
 0x109   : > { %v839_v9 = vpop.permute.xlu1 %838  ;;  %v1485_v55 = vpack.c.bf16 %v1247_v19, %v1247_v19  ;;  %v1260_v31 = vrot.slane %v1259_v34, 1  ;;  %v1400_v5 = vrot.slane %v1399_v16, 1  ;;  %v1264_v28 = vadd.f32 %v1263_v36, %v1262_v38  ;;  %v923_v42 = vpop.permute.xlu2 %922  ;;  %v404_v19 = vld [vmem:[%s2242_s16 + $0x64] sm:$0x3] }
 0x10a   : > { %v2568_v58 = vpop.permute.xlu0 %831  ;;  %v2576_v35 = vunpack.c.l.b16 %v1486_v14  ;;  %v2578_v23 = vunpack.c.l.b16 %v1495_v30  ;;  %v1707_v25 = vunpack.c.l.b16 %v1493_v43  ;;  %v1309_v27 = vrot.slane %v1308_v13, 1  ;;  %v409_v30 = vld [vmem:[%s2242_s16 + $0x6e] sm:$0x3] }
 0x10b   : > { %v1320_v18 = vadd.f32 %v1319_v1, %v1318_v21  ;;  %v1411_v51 = vadd.f32 %v1410_v50, %v1409_v22  ;;  %v1277_v56 = vrot.slane %v1276_v20, 4  ;;  %v1368_v32 = vrot.slane %v1367_v48, 4  ;;  %v402_v22 = vld [vmem:[%s2242_s16 + $0x60] sm:$0x3]  ;;  %v411_v1 = vld [vmem:[%s2242_s16 + $0x72] sm:$0x3] }
 0x10c   : > { %v1771_v4 = vsel %vm1729_vm1, %v2524_v2, %v1705_v39  ;;  %v2584_v44 = vunpack.c.l.b16 %v1489_v41  ;;  %v1764_v53 = vsel %vm1729_vm1, %v1698_v52, %v2483_v29  ;;  %v1498_v3 = vpack.c.bf16 %v1338_v33, %v1338_v33 }
 0x10d   : > { %v1699_v61 = vunpack.c.l.b16 %v1485_v55  ;;  %v1261_v24 = vadd.f32 %v1260_v31, %v1259_v34  ;;  %v2588_v49 = vadd.f32 %v1400_v5, %v1399_v16  ;;  %v1265_v0 = vrot.slane %v1264_v28, 2 }
 0x10e   : > { %v2592_v54 = vsel %vm1731_vm2, %v1707_v25, %v1771_v4  ;;  %v2594_v2 = vadd.f32 %v1309_v27, %v1308_v13  ;;  %v464_v40 = vunpack.c.l.bf16 %v400_v59  ;;  %v467_v62 = vunpack.c.l.bf16 %v403_v57  ;;  %v413_v27 = vld [vmem:[%s2242_s16 + $0x76] sm:$0x3] }
 0x10f   : > { %v1321_v26 = vrot.slane %v1320_v18, 2  ;;  %v1412_v29 = vrot.slane %v1411_v51, 2  ;;  %v1278_v8 = vadd.f32 %v1277_v56, %v1276_v20  ;;  %v1369_v10 = vadd.f32 %v1368_v32, %v1367_v48 }
 0x110   : > { %v2596_v7 = vunpack.c.l.b16 %v1498_v3  ;;  %v984_v12 = vmul.f32 %v2558_v45, %v464_v40  ;;  %v987_v11 = vmul.f32 %v839_v9, %v467_v62  ;;  %v479_v15 = vunpack.c.l.bf16 %v415_v6  ;;  %v2130_v6 = vld [vmem:[%s2413_s10 + $0x10] sm:$0xff] }
 0x111   : > { %v846_v63 = vpop.permute.xlu1 %845  ;;  %v2600_v60 = vsel %vm1731_vm2, %v1699_v61, %v1764_v53  ;;  %v1487_v17 = vpack.c.bf16 %v1261_v24, %v1261_v24  ;;  %v1507_v38 = vpack.c.bf16 %v2588_v49, %v2588_v49  ;;  %v1266_v21 = vadd.f32 %v1265_v0, %v1264_v28  ;;  %v881_v28 = vpop.permute.xlu2 %880  ;;  %2088 = vmatmul.msk.bf16.gmra.mxu0 %vm1559_vm4, %v2130_v6 }
 0x112   : > { %v895_v46 = vpop.permute.xlu0 %894  ;;  %v1494_v37 = vpack.c.bf16 %v2594_v2, %v2594_v2  ;;  %v1325_v47 = vsel %vm1002_vm0, %v984_v12, 0.0  ;;  %v1346_v45 = vsel %vm1002_vm0, %v987_v11, 0.0  ;;  %v999_v9 = vmul.f32 %v923_v42, %v479_v15 }
 0x113   : > { %v1322_v34 = vadd.f32 %v1321_v26, %v1320_v18  ;;  %v1413_v16 = vadd.f32 %v1412_v29, %v1411_v51  ;;  %v1279_v36 = vrot.slane %v1278_v8, 2  ;;  %v1370_v14 = vrot.slane %v1369_v10, 2 }
 0x114   : > { %v1326_v43 = vrot.slane %v1325_v47, 4  ;;  %v1347_v13 = vrot.slane %v1346_v45, 4  ;;  %v1430_v39 = vsel %vm1002_vm0, %v999_v9, 0.0  ;;  %v466_v41 = vunpack.c.l.bf16 %v402_v22 }
 0x115   : > { %v2615_v52 = vunpack.c.l.b16 %v1487_v17  ;;  %v1267_v33 = vrot.slane %v1266_v21, 1  ;;  %v1431_v20 = vrot.slane %v1430_v39, 4  ;;  %v468_v48 = vunpack.c.l.bf16 %v404_v19 }
 0x116   : > { %v1327_v55 = vadd.f32 %v1326_v43, %v1325_v47  ;;  %v1348_v31 = vadd.f32 %v1347_v13, %v1346_v45  ;;  %v986_v5 = vmul.f32 %v2568_v58, %v466_v41  ;;  %v473_v25 = vunpack.c.l.bf16 %v409_v30 }
 0x117   : > { %v1280_v18 = vadd.f32 %v1279_v36, %v1278_v8  ;;  %v1432_v51 = vadd.f32 %v1431_v20, %v1430_v39  ;;  %v988_v56 = vmul.f32 %v846_v63, %v468_v48  ;;  %v475_v32 = vunpack.c.l.bf16 %v411_v1 }
 0x118   : > { %v1323_v57 = vrot.slane %v1322_v34, 1  ;;  %v1328_v4 = vrot.slane %v1327_v55, 2  ;;  %v1349_v53 = vrot.slane %v1348_v31, 2  ;;  %v1339_v3 = vsel %vm1002_vm0, %v986_v5, 0.0 }
 0x119   : > { %v909_v59 = vpop.permute.xlu1 %908  ;;  %v1340_v42 = vrot.slane %v1339_v3, 4  ;;  %v993_v61 = vmul.f32 %v881_v28, %v473_v25  ;;  %v995_v24 = vmul.f32 %v895_v46, %v475_v32  ;;  %v477_v0 = vunpack.c.l.bf16 %v413_v27 }
 0x11a   : > { %v2613_v50 = vpop.permute.xlu0 %852  ;;  %v1414_v58 = vrot.slane %v1413_v16, 1  ;;  %v1371_v2 = vadd.f32 %v1370_v14, %v1369_v10  ;;  %v1329_v40 = vadd.f32 %v1328_v4, %v1327_v55  ;;  %v1353_v62 = vsel %vm1002_vm0, %v988_v56, 0.0 }
 0x11b   : > { %v1268_v26 = vadd.f32 %v1267_v33, %v1266_v21  ;;  %v1281_v29 = vrot.slane %v1280_v18, 1  ;;  %v1433_v63 = vrot.slane %v1432_v51, 2  ;;  %v1402_v8 = vsel %vm1002_vm0, %v995_v24, 0.0 }
 0x11c   : > { %v1708_v12 = vunpack.c.l.b16 %v1494_v37  ;;  %v1330_v11 = vrot.slane %v1329_v40, 1  ;;  %v1350_v15 = vadd.f32 %v1349_v53, %v1348_v31  ;;  %v1403_v17 = vrot.slane %v1402_v8, 4 }
 0x11d   : > { %v1341_v22 = vadd.f32 %v1340_v42, %v1339_v3  ;;  %v1354_v46 = vrot.slane %v1353_v62, 4  ;;  %v1388_v47 = vsel %vm1002_vm0, %v993_v61, 0.0  ;;  %v997_v45 = vmul.f32 %v909_v59, %v477_v0 }
 0x11e   : > { %v1324_v9 = vadd.f32 %v1323_v57, %v1322_v34  ;;  %v1415_v21 = vadd.f32 %v1414_v58, %v1413_v16  ;;  %v1372_v19 = vrot.slane %v1371_v2, 1  ;;  %v1404_v36 = vadd.f32 %v1403_v17, %v1402_v8  ;;  %v405_v16 = vld [vmem:[%s2242_s16 + $0x66] sm:$0x3] }
 0x11f   : > { %v1488_v14 = vpack.c.bf16 %v1268_v26, %v1268_v26  ;;  %v1282_v30 = vadd.f32 %v1281_v29, %v1280_v18  ;;  %v1434_v43 = vadd.f32 %v1433_v63, %v1432_v51  ;;  %v1416_v37 = vsel %vm1002_vm0, %v997_v45, 0.0 }
 0x120   : > { %v2631_v13 = vunpack.c.l.b16 %v1507_v38  ;;  %v1331_v39 = vadd.f32 %v1330_v11, %v1329_v40  ;;  %v1351_v41 = vrot.slane %v1350_v15, 1  ;;  %v1389_v1 = vrot.slane %v1388_v47, 4  ;;  %v416_v11 = vld [vmem:[%s2242_s16 + $0x7c] sm:$0x3] }
 0x121   : > { %v1342_v33 = vrot.slane %v1341_v22, 2  ;;  %v1355_v20 = vadd.f32 %v1354_v46, %v1353_v62  ;;  %v1405_v34 = vrot.slane %v1404_v36, 2  ;;  %v1417_v48 = vrot.slane %v1416_v37, 4  ;;  %v867_v55 = vpop.permute.xlu1 %866  ;;  %v407_v62 = vld [vmem:[%s2242_s16 + $0x6a] sm:$0x3] }
 0x122   : > { %v2625_v10 = vpop.permute.xlu0 %915  ;;  %v1773_v31 = vsel %vm1733_vm3, %v1708_v12, %v2592_v54  ;;  %v1496_v5 = vpack.c.bf16 %v1324_v9, %v1324_v9  ;;  %v1509_v28 = vpack.c.bf16 %v1415_v21, %v1415_v21  ;;  %v2636_v25 = vadd.f32 %v1372_v19, %v1371_v2 }
 0x123   : > { %v1702_v27 = vunpack.c.l.b16 %v1488_v14  ;;  %v1490_v49 = vpack.c.bf16 %v1282_v30, %v1282_v30  ;;  %v1435_v38 = vrot.slane %v1434_v43, 1  ;;  %v1418_v18 = vadd.f32 %v1417_v48, %v1416_v37  ;;  %v408_v37 = vld [vmem:[%s2242_s16 + $0x6c] sm:$0x3] }
 0x124   : > { %v1497_v51 = vpack.c.bf16 %v1331_v39, %v1331_v39  ;;  %v2638_v56 = vadd.f32 %v1351_v41, %v1350_v15  ;;  %v1390_v32 = vadd.f32 %v1389_v1, %v1388_v47  ;;  %v469_v59 = vunpack.c.l.bf16 %v405_v16  ;;  %v417_v1 = vld [vmem:[%s2242_s16 + $0x7e] sm:$0x3] }
 0x125   : > { %v1343_v57 = vadd.f32 %v1342_v33, %v1341_v22  ;;  %v1356_v4 = vrot.slane %v1355_v20, 2  ;;  %v1406_v53 = vadd.f32 %v1405_v34, %v1404_v36  ;;  %v1766_v54 = vsel %vm1733_vm3, %v2576_v35, %v2600_v60 }
 0x126   : > { %v1710_v42 = vunpack.c.l.b16 %v1496_v5  ;;  %v1419_v61 = vrot.slane %v1418_v18, 2  ;;  %v989_v24 = vmul.f32 %v2613_v50, %v469_v59  ;;  %v1767_v0 = vsel %vm1735_vm5, %v2615_v52, %v1766_v54  ;;  %v414_v50 = vld [vmem:[%s2242_s16 + $0x78] sm:$0x3] }
 0x127   : > { %v2646_v6 = vunpack.c.l.b16 %v1509_v28  ;;  %v1704_v58 = vunpack.c.l.b16 %v1490_v49  ;;  %v2648_v2 = vadd.f32 %v1435_v38, %v1434_v43  ;;  %v1768_v40 = vsel %vm1737_vm6, %v1702_v27, %v1767_v0 }
 0x128   : > { %v1711_v26 = vunpack.c.l.b16 %v1497_v51  ;;  %v1500_v35 = vpack.c.bf16 %v2638_v56, %v2638_v56  ;;  %v1391_v60 = vrot.slane %v1390_v32, 2  ;;  %v1360_v29 = vsel %vm1002_vm0, %v989_v24, 0.0 }
 0x129   : > { %v1344_v63 = vrot.slane %v1343_v57, 1  ;;  %v1357_v8 = vadd.f32 %v1356_v4, %v1355_v20  ;;  %v1407_v12 = vrot.slane %v1406_v53, 1  ;;  %v1361_v52 = vrot.slane %v1360_v29, 4  ;;  %v930_v19 = vpop.permute.xlu1 %929 }
 0x12a   : > { %v874_v3 = vpop.permute.xlu0 %873  ;;  %v1420_v15 = vadd.f32 %v1419_v61, %v1418_v18  ;;  %v1769_v17 = vsel %vm1739_vm7, %v2584_v44, %v1768_v40  ;;  %v1774_v22 = vsel %vm1735_vm5, %v2578_v23, %v1773_v31  ;;  %v471_v46 = vunpack.c.l.bf16 %v407_v62 }
 0x12b   : > { %v1362_v47 = vadd.f32 %v1361_v52, %v1360_v29  ;;  %v1770_v45 = vsel %vm1741_vm8, %v1704_v58, %v1769_v17  ;;  %v1775_v9 = vsel %vm1737_vm6, %v1710_v42, %v1774_v22  ;;  %v478_v21 = vunpack.c.l.bf16 %v414_v50 }
 0x12c   : > { %v1392_v36 = vadd.f32 %v1391_v60, %v1390_v32  ;;  %v1776_v14 = vsel %vm1739_vm7, %v1711_v26, %v1775_v9  ;;  %v991_v30 = vmul.f32 %v867_v55, %v471_v46  ;;  %v480_v43 = vunpack.c.l.bf16 %v416_v11 }
 0x12d   : > { %v1358_v39 = vrot.slane %v1357_v8, 1  ;;  %v1408_v44 = vadd.f32 %v1407_v12, %v1406_v53  ;;  %v1363_v41 = vrot.slane %v1362_v47, 2  ;;  %v1777_v23 = vsel %vm1741_vm8, %v2596_v7, %v1776_v14 }
 0x12e   : > { %v1794_v33 = vpack.c.b16 %v1777_v23, %v1770_v45  ;;  %v1374_v20 = vsel %vm1002_vm0, %v991_v30, 0.0  ;;  %v998_v34 = vmul.f32 %v2625_v10, %v478_v21  ;;  %v1000_v48 = vmul.f32 %v930_v19, %v480_v43  ;;  %v2131_v10 = vld [vmem:[%s2413_s10 + $0x18] sm:$0xff]  ;;  %v2134_v43 = vld [vmem:[%s2749_s6 + $0x8] sm:$0xff] }
 0x12f   : > { %v1421_v16 = vrot.slane %v1420_v15, 1  ;;  %v1364_v31 = vadd.f32 %v1363_v41, %v1362_v47  ;;  %v1375_v5 = vrot.slane %v1374_v20, 4  ;;  %v472_v55 = vunpack.c.l.bf16 %v408_v37  ;;  %2089 = vmatmul.msk.bf16.gmra.mxu0 %vm1559_vm4, %v2131_v10  ;;  %1925 = vmatpush.bf16.msra.mxu2 %v2134_v43 }
 0x130   : > { %v1345_v27 = vadd.f32 %v1344_v63, %v1343_v57  ;;  %2108 = vmatmul.msk.bf16.gmra.mxu3 %vm1820_vm9, %v1794_v33  ;;  %v1423_v49 = vsel %vm1002_vm0, %v998_v34, 0.0  ;;  %v1437_v7 = vsel %vm1002_vm0, %v1000_v48, 0.0  ;;  %v481_v38 = vunpack.c.l.bf16 %v417_v1 }
 0x131   : > { %v1359_v18 = vadd.f32 %v1358_v39, %v1357_v8  ;;  %v1365_v51 = vrot.slane %v1364_v31, 1  ;;  %v1376_v32 = vadd.f32 %v1375_v5, %v1374_v20  ;;  %v1424_v59 = vrot.slane %v1423_v49, 4 }
 0x132   : > { %v937_v28 = vpop.permute.xlu0 %936  ;;  %v1508_v4 = vpack.c.bf16 %v1408_v44, %v1408_v44  ;;  %v1438_v53 = vrot.slane %v1437_v7, 4  ;;  %v992_v54 = vmul.f32 %v874_v3, %v472_v55  ;;  %v1393_v61 = vrot.slane %v1392_v36, 1 }
 0x133   : > { %v1001_v42 = vmul.f32 %v937_v28, %v481_v38  ;;  %v1422_v24 = vadd.f32 %v1421_v16, %v1420_v15  ;;  %v1377_v0 = vrot.slane %v1376_v32, 2  ;;  %v1425_v57 = vadd.f32 %v1424_v59, %v1423_v49 }
 0x134   : > { %v1366_v58 = vadd.f32 %v1365_v51, %v1364_v31  ;;  %v1439_v40 = vadd.f32 %v1438_v53, %v1437_v7  ;;  %v1381_v62 = vsel %vm1002_vm0, %v992_v54, 0.0  ;;  %v1499_v60 = vpack.c.bf16 %v1345_v27, %v1345_v27 }
 0x135   : > { %v1444_v26 = vsel %vm1002_vm0, %v1001_v42, 0.0  ;;  %v1378_v29 = vadd.f32 %v1377_v0, %v1376_v32  ;;  %v1426_v50 = vrot.slane %v1425_v57, 2  ;;  %v1382_v63 = vrot.slane %v1381_v62, 4 }
 0x136   : > { %v1501_v8 = vpack.c.bf16 %v1359_v18, %v1359_v18  ;;  %v1722_v12 = vunpack.c.l.b16 %v1508_v4  ;;  %v1440_v3 = vrot.slane %v1439_v40, 2  ;;  %v1445_v52 = vrot.slane %v1444_v26, 4 }
 0x137   : > { %v1510_v11 = vpack.c.bf16 %v1422_v24, %v1422_v24  ;;  %v1379_v15 = vrot.slane %v1378_v29, 1  ;;  %v1427_v17 = vadd.f32 %v1426_v50, %v1425_v57  ;;  %v1383_v22 = vadd.f32 %v1382_v63, %v1381_v62  ;;  %v1581_v63 = vpop.f32.mrf.mxu0 }
 0x138   : > { %v1714_v46 = vunpack.c.l.b16 %v1500_v35  ;;  %v1502_v47 = vpack.c.bf16 %v1366_v58, %v1366_v58  ;;  %v1441_v45 = vadd.f32 %v1440_v3, %v1439_v40  ;;  %v1446_v9 = vadd.f32 %v1445_v52, %v1444_v26  ;;  %v2150_v3 = vld [vmem:[%s2748_s5] ss:$0 sm:$0xff] }
 0x139   : > { %v1394_v21 = vadd.f32 %v1393_v61, %v1392_v36  ;;  %v1380_v19 = vadd.f32 %v1379_v15, %v1378_v29  ;;  %v1428_v14 = vrot.slane %v1427_v17, 1  ;;  %v1384_v30 = vrot.slane %v1383_v22, 2  ;;  %v2133_v36 = vld [vmem:[%s2749_s6] sm:$0xff] }
 0x13a   : > { %v1713_v37 = vunpack.c.l.b16 %v1499_v60  ;;  %v1715_v39 = vunpack.c.l.b16 %v1501_v8  ;;  %v1442_v44 = vrot.slane %v1441_v45, 1  ;;  %v1447_v41 = vrot.slane %v1446_v9, 2  ;;  %1926 = vmatpush.bf16.msra.mxu2 %v2133_v36 }
 0x13b   : > { %v1785_v23 = vsel %vm1729_vm1, %v1722_v12, %v2631_v13  ;;  %v1724_v56 = vunpack.c.l.b16 %v1510_v11  ;;  %v1429_v35 = vadd.f32 %v1428_v14, %v1427_v17  ;;  %v1385_v1 = vadd.f32 %v1384_v30, %v1383_v22 }
 0x13c   : > { %v1716_v33 = vunpack.c.l.b16 %v1502_v47  ;;  %v1504_v20 = vpack.c.bf16 %v1380_v19, %v1380_v19  ;;  %v1443_v34 = vadd.f32 %v1442_v44, %v1441_v45  ;;  %v1448_v48 = vadd.f32 %v1447_v41, %v1446_v9 }
 0x13d   : > { %v1503_v16 = vpack.c.bf16 %v2636_v25, %v2636_v25  ;;  %v1512_v31 = vpack.c.bf16 %v2648_v2, %v2648_v2  ;;  %v1511_v5 = vpack.c.bf16 %v1429_v35, %v1429_v35  ;;  %v1386_v13 = vrot.slane %v1385_v1, 1 }
 0x13e   : > { %v1778_v55 = vsel %vm1729_vm1, %v1714_v46, %v1713_v37  ;;  %v1506_v28 = vpack.c.bf16 %v1394_v21, %v1394_v21  ;;  %v1513_v27 = vpack.c.bf16 %v1443_v34, %v1443_v34  ;;  %v1449_v49 = vrot.slane %v1448_v48, 1 }
 0x13f   : > { %v1779_v7 = vsel %vm1731_vm2, %v1715_v39, %v1778_v55  ;;  %v1786_v38 = vsel %vm1731_vm2, %v2646_v6, %v1785_v23  ;;  %v1725_v18 = vunpack.c.l.b16 %v1511_v5  ;;  %v1387_v51 = vadd.f32 %v1386_v13, %v1385_v1  ;;  %v1583_v52 = vpop.f32.mrf.mxu0 }
 0x140   : > { %v1787_v25 = vsel %vm1733_vm3, %v1724_v56, %v1786_v38  ;;  %v1780_v32 = vsel %vm1733_vm3, %v1716_v33, %v1779_v7  ;;  %v1718_v2 = vunpack.c.l.b16 %v1504_v20  ;;  %v1450_v59 = vadd.f32 %v1449_v49, %v1448_v48 }
 0x141   : > { %v1717_v10 = vunpack.c.l.b16 %v1503_v16  ;;  %v1727_v4 = vunpack.c.l.b16 %v1513_v27  ;;  %v1505_v53 = vpack.c.bf16 %v1387_v51, %v1387_v51  ;;  %v1788_v54 = vsel %vm1735_vm5, %v1725_v18, %v1787_v25 }
 0x142   : > { %v1726_v42 = vunpack.c.l.b16 %v1512_v31  ;;  %v1514_v61 = vpack.c.bf16 %v1450_v59, %v1450_v59  ;;  %v1720_v6 = vunpack.c.l.b16 %v1506_v28 }
 0x143   : > { %v1719_v24 = vunpack.c.l.b16 %v1505_v53  ;;  %v1781_v0 = vsel %vm1735_vm5, %v1717_v10, %v1780_v32 }
 0x144   : > { %v1728_v57 = vunpack.c.l.b16 %v1514_v61  ;;  %v1782_v58 = vsel %vm1737_vm6, %v1718_v2, %v1781_v0  ;;  %v1789_v40 = vsel %vm1737_vm6, %v1726_v42, %v1788_v54  ;;  %v2151_v2 = vld [vmem:[%s2750_s7] ss:$0 sm:$0xff] }
 0x145   : > { %v1783_v62 = vsel %vm1739_vm7, %v1719_v24, %v1782_v58  ;;  %v1790_v26 = vsel %vm1739_vm7, %v1727_v4, %v1789_v40 }
 0x146   : > { %v1784_v60 = vsel %vm1741_vm8, %v1720_v6, %v1783_v62  ;;  %v1791_v29 = vsel %vm1741_vm8, %v1728_v57, %v1790_v26 }
 0x147   : > { %v1795_v50 = vpack.c.b16 %v1791_v29, %v1784_v60 }
 0x149   : > { %2109 = vmatmul.msk.bf16.gmra.mxu3 %vm1820_vm9, %v1795_v50 }
 0x14d   : > { %v1842_v8 = vpop.f32.mrf.mxu1 }
 0x14e   : > { %v1843_v12 = vadd.f32 %v1842_v8, %v1581_v63 }
 0x150   : > { %v1866_v15 = vadd.f32 %v2150_v3, %v1843_v12 }
 0x152   : > { %v1874_v46 = vmax.f32 %v1866_v15, 0.0 }
 0x155   : > { %v1844_v11 = vpop.f32.mrf.mxu1 }
 0x156   : > { %v1845_v17 = vadd.f32 %v1844_v11, %v1583_v52 }
 0x158   : > { %v1867_v22 = vadd.f32 %v2150_v3, %v1845_v17 }
 0x15a   : > { %v1875_v47 = vmax.f32 %v1867_v22, 0.0 }
 0x15c   : > { %v1882_v45 = vpack.c.bf16 %v1875_v47, %v1874_v46 }
 0x15e   : > { %2118 = vmatmul.msk.bf16.vlgmr.msra.gmra.mxu2 %vm1906_vm10, %v1882_v45 }
 0x163   : > { %v1586_v9 = vpop.f32.mrf.mxu0 }
 0x16b   : > { %v1588_v14 = vpop.f32.mrf.mxu0 }
 0x183   : > { %v1847_v21 = vpop.f32.mrf.mxu3 }
 0x184   : > { %v1848_v19 = vadd.f32 %v1847_v21, %v1586_v9 }
 0x186   : > { %v1868_v43 = vadd.f32 %v2150_v3, %v1848_v19 }
 0x188   : > { %v1876_v44 = vmax.f32 %v1868_v43, 0.0 }
 0x18b   : > { %v1849_v30 = vpop.f32.mrf.mxu3 }
 0x18c   : > { %v1850_v37 = vadd.f32 %v1849_v30, %v1588_v14 }
 0x18e   : > { %v1869_v39 = vadd.f32 %v2150_v3, %v1850_v37  ;;  %v1591_v56 = vpop.f32.mrf.mxu0 }
 0x190   : > { %v1877_v41 = vmax.f32 %v1869_v39, 0.0 }
 0x192   : > { %v1883_v23 = vpack.c.bf16 %v1877_v41, %v1876_v44 }
 0x194   : > { %2119 = vmatmul.msk.bf16.gmra.mxu2 %vm1906_vm10, %v1883_v23 }
 0x196   : > { %v1593_v36 = vpop.f32.mrf.mxu0 }
 0x1ac   : > { %v1596_v13 = vpop.f32.mrf.mxu0 }
 0x1b3   : > { %v1852_v35 = vpop.f32.mrf.mxu3 }
 0x1b4   : > { %v1853_v1 = vadd.f32 %v1852_v35, %v1591_v56  ;;  %v1598_v27 = vpop.f32.mrf.mxu0 }
 0x1b6   : > { %v1870_v20 = vadd.f32 %v2150_v3, %v1853_v1 }
 0x1b8   : > { %v1878_v16 = vmax.f32 %v1870_v20, 0.0 }
 0x1bb   : > { %v1854_v33 = vpop.f32.mrf.mxu3 }
 0x1bc   : > { %v1855_v34 = vadd.f32 %v1854_v33, %v1593_v36 }
 0x1be   : > { %v1871_v48 = vadd.f32 %v2150_v3, %v1855_v34 }
 0x1c0   : > { %v1879_v31 = vmax.f32 %v1871_v48, 0.0 }
 0x1c2   : > { %v1884_v5 = vpack.c.bf16 %v1879_v31, %v1878_v16 }
 0x1c4   : > { %2120 = vmatmul.msk.bf16.gmra.mxu2 %vm1906_vm10, %v1884_v5 }
 0x1cc   : > { %v1857_v55 = vpop.f32.mrf.mxu3 }
 0x1cd   : > { %v1858_v28 = vadd.f32 %v1857_v55, %v1596_v13 }
 0x1cf   : > { %v1872_v7 = vadd.f32 %v2150_v3, %v1858_v28 }
 0x1d1   : > { %v1880_v51 = vmax.f32 %v1872_v7, 0.0 }
 0x1d4   : > { %v1859_v49 = vpop.f32.mrf.mxu3 }
 0x1d5   : > { %v1860_v38 = vadd.f32 %v1859_v49, %v1598_v27 }
 0x1d7   : > { %v1873_v18 = vadd.f32 %v2150_v3, %v1860_v38 }
 0x1d9   : > { %v1881_v25 = vmax.f32 %v1873_v18, 0.0 }
 0x1db   : > { %v1885_v32 = vpack.c.bf16 %v1881_v25, %v1880_v51 }
 0x1dd   : > { %2121 = vmatmul.msk.bf16.gmra.mxu2 %vm1906_vm10, %v1885_v32 }
 0x1e1   : > { %v1928_v59 = vpop.f32.mrf.mxu2 }
 0x1e2   : > { %v1929_v10 = vadd.f32 %v2151_v2, %v1928_v59 }
 0x1e4   : > { %v1948_v4 = vmax.f32 %v1929_v10, 0.0 }
 0x1e6   : > { %v1956_v53 = vpack.c.bf16 %v1948_v4, %v1948_v4 }
 0x1e8   : > { %1965 = vst.msk [vmem:[%s2722_s21] sm:$0xf] %vm1964_vm11, %v1956_v53 }
 0x1e9   : > { %v1930_v54 = vpop.f32.mrf.mxu2 }
 0x1ea   : > { %v1931_v42 = vadd.f32 %v2151_v2, %v1930_v54 }
 0x1ec   : > { %v1949_v61 = vmax.f32 %v1931_v42, 0.0 }
 0x1ee   : > { %v1957_v24 = vpack.c.bf16 %v1949_v61, %v1949_v61 }
 0x1f0   : > { %1966 = vst.msk [vmem:[%s2722_s21 + $0x4] sm:$0xf] %vm1964_vm11, %v1957_v24 }
 0x217   : > { %v1933_v0 = vpop.f32.mrf.mxu2 }
 0x218   : > { %v1934_v6 = vadd.f32 %v2151_v2, %v1933_v0 }
 0x21a   : > { %v1950_v57 = vmax.f32 %v1934_v6, 0.0 }
 0x21c   : > { %v1958_v58 = vpack.c.bf16 %v1950_v57, %v1950_v57 }
 0x21e   : > { %1967 = vst.msk [vmem:[%s2722_s21 + $0x8] sm:$0xf] %vm1964_vm11, %v1958_v58 }
 0x21f   : > { %v1935_v40 = vpop.f32.mrf.mxu2 }
 0x220   : > { %v1936_v62 = vadd.f32 %v2151_v2, %v1935_v40 }
 0x222   : > { %v1951_v26 = vmax.f32 %v1936_v62, 0.0 }
 0x224   : > { %v1959_v60 = vpack.c.bf16 %v1951_v26, %v1951_v26 }
 0x226   : > { %1968 = vst.msk [vmem:[%s2722_s21 + $0xc] sm:$0xf] %vm1964_vm11, %v1959_v60 }
 0x247   : > { %v1938_v29 = vpop.f32.mrf.mxu2 }
 0x248   : > { %v1939_v50 = vadd.f32 %v2151_v2, %v1938_v29 }
 0x24a   : > { %v1952_v63 = vmax.f32 %v1939_v50, 0.0 }
 0x24c   : > { %v1960_v8 = vpack.c.bf16 %v1952_v63, %v1952_v63 }
 0x24e   : > { %1969 = vst.msk [vmem:[%s2722_s21 + $0x10] sm:$0xf] %vm1964_vm11, %v1960_v8 }
 0x24f   : > { %v1940_v12 = vpop.f32.mrf.mxu2 }
 0x250   : > { %v1941_v3 = vadd.f32 %v2151_v2, %v1940_v12 }
 0x252   : > { %v1953_v52 = vmax.f32 %v1941_v3, 0.0 }
 0x254   : > { %v1961_v11 = vpack.c.bf16 %v1953_v52, %v1953_v52 }
 0x256   : > { %1970 = vst.msk [vmem:[%s2722_s21 + $0x14] sm:$0xf] %vm1964_vm11, %v1961_v11 }
 0x260   : > { %v1943_v15 = vpop.f32.mrf.mxu2 }
 0x261   : > { %v1944_v17 = vadd.f32 %v2151_v2, %v1943_v15 }
 0x263   : > { %v1954_v22 = vmax.f32 %v1944_v17, 0.0 }
 0x265   : > { %v1962_v46 = vpack.c.bf16 %v1954_v22, %v1954_v22 }
 0x267   : > { %1971 = vst.msk [vmem:[%s2722_s21 + $0x18] sm:$0xf] %vm1964_vm11, %v1962_v46 }
 0x268   : > { %v1945_v47 = vpop.f32.mrf.mxu2 }
 0x269   : > { %v1946_v45 = vadd.f32 %v2151_v2, %v1945_v47 }
 0x26b   : > { %v1955_v9 = vmax.f32 %v1946_v45, 0.0 }
 0x26d   : > { %v1963_v21 = vpack.c.bf16 %v1955_v9, %v1955_v9 }
 0x26f   : > { %1972 = vst.msk [vmem:[%s2722_s21 + $0x1c] sm:$0xf] %vm1964_vm11, %v1963_v21 }
 0x270 PF: > { %s18_s27 = sadd.s32 1, %s2158_s27  }
 0x271   : > { %p15_p5 = scmp.ge.s32.totalorder %s18_s27, 4  }
 0x273   :  { %17 = sbr.rel (!%p15_p5) target bundleno = 1 (0x1), region = 88 }

</bundles_post_ra>
